<compile_context>
chip_gen: v7x
topology: tpu7x:2x2x1
jax: 0.10.0
libtpu: 0.0.40
codegen_flags: <defaults>
</compile_context>

<pallas_src>
import functools

import numpy as np
import jax
import jax.numpy as jnp
from jax.experimental import pallas as pl
from jax.experimental.pallas import tpu as pltpu

BOND_FDIM = 4
NUC_FDIM = 4
MAX_NB = 3

HIDDEN_PAD = 128   # padded message / node hidden width (real hidden_size = 32)
HH_PAD = 128       # padded per-direction LSTM hidden width (real = hidden_size // 2)
FEAT_PAD = 128     # padded feature width (real NUC_FDIM=4 / NUC_FDIM+BOND_FDIM=8)


def _round_up(x, m):
    return ((x + m - 1) // m) * m


# ----------------------------------------------------------------------------
# Kernel 1: graph message passing + node embedding
# ----------------------------------------------------------------------------
def mpn_kernel(f_nuc_ref, f_bond_ref, g_msg_ref, g_node_ref,
               w_local_ref, w_msg_ref,
               gru_wih_ref, gru_whh_ref, gru_b_i3_ref, gru_b_hn_ref,
               wn_a_ref, wn_b_ref,
               nuc_emb_ref, *, depth, n_real_msgs, hidden_pad):
    H = hidden_pad
    E = f_bond_ref.shape[0]

    # local potentials + initial messages (kept in f32; weights are zero-padded
    # so padded feature lanes contribute nothing)
    local = jnp.dot(f_bond_ref[...], w_local_ref[...],
                    preferred_element_type=jnp.float32)                  # (E, H)
    messages = jnp.maximum(local, 0.0)

    # zero out the dummy message (row 0) and the rows added by padding
    row_idx = jax.lax.broadcasted_iota(jnp.int32, (E, 1), 0)
    mask = ((row_idx != 0) & (row_idx < n_real_msgs)).astype(jnp.float32)

    g_msg = g_msg_ref[...]          # (E, E)  bf16 adjacency counts
    w_msg = w_msg_ref[...]          # (H, H)  bf16
    wih = gru_wih_ref[...]          # (H, 3H) bf16, fused gates (r, z, n)
    whh = gru_whh_ref[...]          # (H, 3H) bf16
    b_i3 = gru_b_i3_ref[...]        # (1, 3H) f32 (b_ih+b_hh folded for r,z; b_ih for n)
    b_hn = gru_b_hn_ref[...]        # (1, H)  f32 (b_hh for n, separate because of r*gh_n)

    for _ in range(1, depth):
        msg_bf = messages.astype(jnp.bfloat16)
        # index_select_ND(messages, 0, message_graph).sum(1) == adjacency matmul
        sum_nei = jnp.dot(g_msg, msg_bf, preferred_element_type=jnp.float32)
        prop = jnp.dot(sum_nei.astype(jnp.bfloat16), w_msg,
                       preferred_element_type=jnp.float32)
        new_msg = jnp.maximum(local + prop, 0.0)

        # torch.nn.GRUCell(new_msg, messages) with fused gate matmuls (r, z, n)
        gi = jnp.dot(new_msg.astype(jnp.bfloat16), wih,
                     preferred_element_type=jnp.float32) + b_i3           # (E, 3H)
        gh = jnp.dot(msg_bf, whh, preferred_element_type=jnp.float32)     # (E, 3H)
        r = jax.nn.sigmoid(gi[:, 0:H] + gh[:, 0:H])
        z = jax.nn.sigmoid(gi[:, H:2 * H] + gh[:, H:2 * H])
        n = jnp.tanh(gi[:, 2 * H:3 * H] + r * (gh[:, 2 * H:3 * H] + b_hn))
        messages = ((1.0 - z) * n + z * messages) * mask

    # node-level aggregation and embedding
    nuc_nb = jnp.dot(g_node_ref[...], messages.astype(jnp.bfloat16),
                     preferred_element_type=jnp.float32)                  # (N, H)
    emb = (jnp.dot(f_nuc_ref[...], wn_a_ref[...], preferred_element_type=jnp.float32)
           + jnp.dot(nuc_nb.astype(jnp.bfloat16), wn_b_ref[...],
                     preferred_element_type=jnp.float32))
    nuc_emb_ref[...] = jnp.maximum(emb, 0.0)


# ----------------------------------------------------------------------------
# Kernel 2: bidirectional LSTM (packed-sequence semantics) + per-seq max pool
# ----------------------------------------------------------------------------
def bilstm_kernel(x_ref, mask_ref,
                  wih_f_ref, whh_f_ref, b_f_ref,
                  wih_r_ref, whh_r_ref, b_r_ref,
                  out_f_ref, out_r_ref, rep_ref, *, hh_pad):
    T, B, _ = x_ref.shape
    Hh = hh_pad
    neg_big = jnp.float32(-1e30)

    wih_f = wih_f_ref[...]; whh_f = whh_f_ref[...]; b_f = b_f_ref[...]
    wih_r = wih_r_ref[...]; whh_r = whh_r_ref[...]; b_r = b_r_ref[...]

    def cell(x_t, h, c, wih, whh, b):
        # fused gates, torch order (i, f, g, o); bf16 operands, f32 accumulation
        gates = (jnp.dot(x_t.astype(jnp.bfloat16), wih, preferred_element_type=jnp.float32)
                 + jnp.dot(h.astype(jnp.bfloat16), whh, preferred_element_type=jnp.float32)
                 + b)                                                   # (B, 4*Hh)
        i = jax.nn.sigmoid(gates[:, 0:Hh])
        f = jax.nn.sigmoid(gates[:, Hh:2 * Hh])
        g = jnp.tanh(gates[:, 2 * Hh:3 * Hh])
        o = jax.nn.sigmoid(gates[:, 3 * Hh:4 * Hh])
        c_new = f * c + i * g
        h_new = o * jnp.tanh(c_new)
        return h_new, c_new

    zero = jnp.zeros((B, Hh), jnp.float32)
    rep0 = jnp.full((B, Hh), neg_big, jnp.float32)

    # forward direction
    def fwd_body(t, carry):
        h, c, rep = carry
        x_t = x_ref[t]                              # (B, H) lane-dense load
        valid = mask_ref[t] > 0.5                   # (B, 1)
        h_new, c_new = cell(x_t, h, c, wih_f, whh_f, b_f)
        h = jnp.where(valid, h_new, h)
        c = jnp.where(valid, c_new, c)
        out_f_ref[t] = jnp.where(valid, h, 0.0)     # zero-filled padding
        rep = jnp.where(valid, jnp.maximum(rep, h), rep)
        return h, c, rep

    _, _, rep_f = jax.lax.fori_loop(0, T, fwd_body, (zero, zero, rep0))

    # reverse direction (starts from each sequence's own last valid position,
    # matching pack_padded_sequence semantics: h/c only update on valid steps)
    def rev_body(i, carry):
        t = T - 1 - i
        h, c, rep = carry
        x_t = x_ref[t]
        valid = mask_ref[t] > 0.5
        h_new, c_new = cell(x_t, h, c, wih_r, whh_r, b_r)
        h = jnp.where(valid, h_new, h)
        c = jnp.where(valid, c_new, c)
        out_r_ref[t] = jnp.where(valid, h, 0.0)
        rep = jnp.where(valid, jnp.maximum(rep, h), rep)
        return h, c, rep

    _, _, rep_r = jax.lax.fori_loop(0, T, rev_body, (zero, zero, rep0))

    rep_ref[:, 0:Hh] = rep_f
    rep_ref[:, Hh:2 * Hh] = rep_r


# ----------------------------------------------------------------------------
# Wrapper (glue): padding, adjacency one-hot, scope bookkeeping, gathers.
# ----------------------------------------------------------------------------
_VMEM = pl.BlockSpec(memory_space=pltpu.MemorySpace.VMEM)
_CPARAMS = pltpu.CompilerParams(vmem_limit_bytes=32 * 1024 * 1024)


def graph_encoder_forward(params, f_nuc, f_bond, node_graph, message_graph,
                          scope, depth, hidden_size):
    HP = HIDDEN_PAD
    HHP = HH_PAD
    Hh = hidden_size // 2

    n_nuc = f_nuc.shape[0]
    n_msg = f_bond.shape[0]
    n_nuc_pad = _round_up(n_nuc, 16)
    n_msg_pad = _round_up(n_msg, 128)   # lane-dense adjacency last dim

    f_nuc_p = jnp.zeros((n_nuc_pad, FEAT_PAD), jnp.float32) \
        .at[:n_nuc, :NUC_FDIM].set(f_nuc)
    f_bond_p = jnp.zeros((n_msg_pad, FEAT_PAD), jnp.float32) \
        .at[:n_msg, :NUC_FDIM + BOND_FDIM].set(f_bond)
    ng_p = jnp.zeros((n_nuc_pad, MAX_NB), jnp.int32).at[:n_nuc].set(node_graph)
    mg_p = jnp.zeros((n_msg_pad, MAX_NB), jnp.int32).at[:n_msg].set(message_graph)

    # adjacency-count matrices built as XLA glue (one-hot) and passed in as bf16;
    # padding indices map to the dummy message row 0, which is always zero.
    # TODO(synk): swap for a scalar-prefetch DMA gather when E grows beyond a few K.
    g_msg = jax.nn.one_hot(mg_p, n_msg_pad, dtype=jnp.float32).sum(axis=1).astype(jnp.bfloat16)
    g_node = jax.nn.one_hot(ng_p, n_msg_pad, dtype=jnp.float32).sum(axis=1).astype(jnp.bfloat16)

    nuc_emb = pl.pallas_call(
        functools.partial(mpn_kernel, depth=depth, n_real_msgs=n_msg, hidden_pad=HP),
        out_shape=jax.ShapeDtypeStruct((n_nuc_pad, HP), jnp.float32),
        in_specs=[_VMEM] * 12,
        out_specs=_VMEM,
        compiler_params=_CPARAMS,
    )(f_nuc_p, f_bond_p, g_msg, g_node,
      params['w_local'], params['w_msg'],
      params['gru_wih'], params['gru_whh'], params['gru_b_i3'], params['gru_b_hn'],
      params['wn_a'], params['wn_b'])

    # --- scope bookkeeping (pad_sequence / pack_padded_sequence glue) ---
    lengths = [int(l) for _, l in scope]
    B = len(scope)
    T = max(lengths)
    B_pad = _round_up(B, 8)
    T_pad = _round_up(T, 8)

    pad_idx = np.zeros((T_pad, B_pad), np.int32)
    mask = np.zeros((T_pad, B_pad, 1), np.float32)
    for b, (s, L) in enumerate(scope):
        pad_idx[:L, b] = np.arange(s, s + L, dtype=np.int32)
        mask[:L, b, 0] = 1.0

    # time-major (T, B, H) layout so the LSTM does lane-dense per-step slab stores
    x_pad = jnp.take(nuc_emb, jnp.asarray(pad_idx.reshape(-1)), axis=0)
    x_pad = x_pad.reshape(T_pad, B_pad, HP)

    out_f, out_r, rep = pl.pallas_call(
        functools.partial(bilstm_kernel, hh_pad=HHP),
        out_shape=(jax.ShapeDtypeStruct((T_pad, B_pad, HHP), jnp.float32),
                   jax.ShapeDtypeStruct((T_pad, B_pad, HHP), jnp.float32),
                   jax.ShapeDtypeStruct((B_pad, 2 * HHP), jnp.float32)),
        in_specs=[_VMEM] * 8,
        out_specs=(_VMEM, _VMEM, _VMEM),
        compiler_params=_CPARAMS,
    )(x_pad, jnp.asarray(mask),
      params['lstm_wih_f'], params['lstm_whh_f'], params['lstm_b_f'],
      params['lstm_wih_r'], params['lstm_whh_r'], params['lstm_b_r'])

    # reassemble: slice padding away, concat directions, flatten, index_select
    out = jnp.concatenate([out_f[:, :, :Hh], out_r[:, :, :Hh]], axis=-1)   # (T, B, H)
    out = jnp.transpose(out, (1, 0, 2)).reshape(B_pad * T_pad, hidden_size)
    pre_idx = np.concatenate(
        [b * T_pad + np.arange(L, dtype=np.int32) for b, L in enumerate(lengths)]
    ).astype(np.int32)
    nuc_embedding = out[jnp.asarray(pre_idx)]

    representation = jnp.concatenate([rep[:B, :Hh], rep[:B, HHP:HHP + Hh]], axis=-1)
    return nuc_embedding, representation


# ----------------------------------------------------------------------------
# Deterministic parameter construction (torch-like, real-sized) + packing
# (pad to 128 lanes, fuse gates, fold biases, cast big operands to bf16).
# ----------------------------------------------------------------------------
def make_raw_params(key, hidden_size):
    H = hidden_size
    Hh = H // 2
    ks = jax.random.split(key, 14)

    def init(k, shape, scale=0.1):
        return (scale * jax.random.normal(k, shape)).astype(jnp.float32)

    return {
        'w_local': init(ks[0], (NUC_FDIM + BOND_FDIM, H)),   # Linear(8->H), x @ W layout
        'w_msg': init(ks[1], (H, H)),                        # Linear(H->H)
        'gru_wih': init(ks[2], (3, H, H)),                   # GRUCell gates (r, z, n)
        'gru_whh': init(ks[3], (3, H, H)),
        'gru_bih': init(ks[4], (3, H)),
        'gru_bhh': init(ks[5], (3, H)),
        'wn_a': init(ks[6], (NUC_FDIM, H)),                  # w_node_emb, f_nuc part
        'wn_b': init(ks[7], (H, H)),                         # w_node_emb, message part
        'lstm_wih_f': init(ks[8], (4, H, Hh)),               # LSTM gates (i, f, g, o)
        'lstm_whh_f': init(ks[9], (4, Hh, Hh)),
        'lstm_b_f': init(ks[10], (4, Hh)),                   # b_ih + b_hh combined
        'lstm_wih_r': init(ks[11], (4, H, Hh)),
        'lstm_whh_r': init(ks[12], (4, Hh, Hh)),
        'lstm_b_r': init(ks[13], (4, Hh)),
    }


def pack_params(raw, hidden_size):
    HP = HIDDEN_PAD
    HHP = HH_PAD
    bf16 = jnp.bfloat16

    def pad2(w, rows, cols):
        return jnp.zeros((rows, cols), jnp.float32).at[:w.shape[0], :w.shape[1]].set(w)

    def fuse_gates(w_list, in_dim_pad, gate_pad):
        out = jnp.zeros((in_dim_pad, len(w_list) * gate_pad), jnp.float32)
        for g, w in enumerate(w_list):
            out = out.at[:w.shape[0], g * gate_pad:g * gate_pad + w.shape[1]].set(w)
        return out

    def fuse_bias(b_list, gate_pad):
        out = jnp.zeros((1, len(b_list) * gate_pad), jnp.float32)
        for g, b in enumerate(b_list):
            out = out.at[0, g * gate_pad:g * gate_pad + b.shape[0]].set(b)
        return out

    p = {
        # feature-side matmuls padded to 128-wide contraction; stay f32 since
        # `local` is reused every depth iteration.
        'w_local': pad2(raw['w_local'], FEAT_PAD, HP),
        'wn_a': pad2(raw['wn_a'], FEAT_PAD, HP),
        # big operands in bf16
        'w_msg': pad2(raw['w_msg'], HP, HP).astype(bf16),
        'wn_b': pad2(raw['wn_b'], HP, HP).astype(bf16),
        # fused GRU gates (r, z, n); biases folded where semantics allow
        'gru_wih': fuse_gates([raw['gru_wih'][g] for g in range(3)], HP, HP).astype(bf16),
        'gru_whh': fuse_gates([raw['gru_whh'][g] for g in range(3)], HP, HP).astype(bf16),
        'gru_b_i3': fuse_bias([raw['gru_bih'][0] + raw['gru_bhh'][0],
                               raw['gru_bih'][1] + raw['gru_bhh'][1],
                               raw['gru_bih'][2]], HP),
        'gru_b_hn': fuse_bias([raw['gru_bhh'][2]], HP),
    }
    for suf in ('f', 'r'):
        p['lstm_wih_' + suf] = fuse_gates(
            [raw['lstm_wih_' + suf][g] for g in range(4)], HP, HHP).astype(bf16)
        p['lstm_whh_' + suf] = fuse_gates(
            [raw['lstm_whh_' + suf][g] for g in range(4)], HHP, HHP).astype(bf16)
        p['lstm_b_' + suf] = fuse_bias(
            [raw['lstm_b_' + suf][g] for g in range(4)], HHP)
    return p


if __name__ == "__main__":
    hidden_size = 32
    depth = 3

    # small synthetic batch: two RNA sequences of lengths 5 and 7
    scope = [(0, 5), (5, 7)]
    total_nuc = 12
    total_bonds = 20   # index 0 is the dummy bond

    key = jax.random.PRNGKey(0)
    k_par, k_fn, k_fb, k_ng, k_mg = jax.random.split(key, 5)
    raw_params = make_raw_params(k_par, hidden_size)
    params = pack_params(raw_params, hidden_size)

    f_nuc = jax.random.normal(k_fn, (total_nuc, NUC_FDIM), jnp.float32)
    f_bond = jax.random.normal(k_fb, (total_bonds, NUC_FDIM + BOND_FDIM), jnp.float32)
    f_bond = f_bond.at[0].set(0.0)  # dummy bond feature row, like prepare_batch_data
    node_graph = jax.random.randint(k_ng, (total_nuc, MAX_NB), 0, total_bonds, jnp.int32)
    message_graph = jax.random.randint(k_mg, (total_bonds, MAX_NB), 0, total_bonds, jnp.int32)
    message_graph = message_graph.at[0].set(0)

    nuc_embedding, representation = graph_encoder_forward(
        params, f_nuc, f_bond, node_graph, message_graph, scope, depth, hidden_size)
    jax.block_until_ready((nuc_embedding, representation))

    assert nuc_embedding.shape == (total_nuc, hidden_size)
    assert representation.shape == (len(scope), hidden_size)
    assert bool(jnp.all(jnp.isfinite(nuc_embedding)))
    assert bool(jnp.all(jnp.isfinite(representation)))

    print("KERNEL_OK")
</pallas_src>

<mosaic_0001>
module attributes {stable_mosaic.version = 11 : i64} {
  func.func @mpn_kernel(%arg0: memref<16x128xf32, #tpu.memory_space<vmem>>, %arg1: memref<128x128xf32, #tpu.memory_space<vmem>>, %arg2: memref<128x128xbf16, #tpu.memory_space<vmem>>, %arg3: memref<16x128xbf16, #tpu.memory_space<vmem>>, %arg4: memref<128x128xf32, #tpu.memory_space<vmem>>, %arg5: memref<128x128xbf16, #tpu.memory_space<vmem>>, %arg6: memref<128x384xbf16, #tpu.memory_space<vmem>>, %arg7: memref<128x384xbf16, #tpu.memory_space<vmem>>, %arg8: memref<1x384xf32, #tpu.memory_space<vmem>>, %arg9: memref<1x128xf32, #tpu.memory_space<vmem>>, %arg10: memref<128x128xf32, #tpu.memory_space<vmem>>, %arg11: memref<128x128xbf16, #tpu.memory_space<vmem>>, %arg12: memref<16x128xf32, #tpu.memory_space<vmem>>) attributes {dimension_semantics = [], scalar_prefetch = 0 : i64, scratch_operands = 0 : i64, tpu.core_type = #tpu.core_type<tc>} {
    %c0 = arith.constant 0 : index
    %c0_0 = arith.constant 0 : index
    %0 = vector.load %arg1[%c0, %c0_0] : memref<128x128xf32, #tpu.memory_space<vmem>>, vector<128x128xf32>
    %c0_1 = arith.constant 0 : index
    %c0_2 = arith.constant 0 : index
    %1 = vector.load %arg4[%c0_1, %c0_2] : memref<128x128xf32, #tpu.memory_space<vmem>>, vector<128x128xf32>
    %cst = arith.constant dense<0.000000e+00> : vector<128x128xf32>
    %2 = tpu.matmul %0, %1, %cst {dimension_numbers = #tpu.dot_dimension_numbers<[1], [0], [0], [1], [0, 0, 1, 1], [], []>} : vector<128x128xf32>, vector<128x128xf32>, vector<128x128xf32> -> vector<128x128xf32>
    %cst_3 = arith.constant 0.000000e+00 : f32
    %3 = vector.broadcast %cst_3 : f32 to vector<128x128xf32>
    %4 = arith.maximumf %2, %3 : vector<128x128xf32>
    %5 = tpu.iota {dimensions = array<i32: 0>} : vector<128x1xi32>
    %c0_i32 = arith.constant 0 : i32
    %6 = vector.broadcast %c0_i32 : i32 to vector<128x1xi32>
    %7 = arith.cmpi ne, %5, %6 : vector<128x1xi32>
    %c20_i32 = arith.constant 20 : i32
    %8 = vector.broadcast %c20_i32 : i32 to vector<128x1xi32>
    %9 = arith.cmpi slt, %5, %8 : vector<128x1xi32>
    %10 = arith.andi %7, %9 : vector<128x1xi1>
    %11 = arith.extui %10 : vector<128x1xi1> to vector<128x1xi32>
    %12 = arith.sitofp %11 : vector<128x1xi32> to vector<128x1xf32>
    %c0_4 = arith.constant 0 : index
    %c0_5 = arith.constant 0 : index
    %13 = vector.load %arg2[%c0_4, %c0_5] : memref<128x128xbf16, #tpu.memory_space<vmem>>, vector<128x128xbf16>
    %c0_6 = arith.constant 0 : index
    %c0_7 = arith.constant 0 : index
    %14 = vector.load %arg5[%c0_6, %c0_7] : memref<128x128xbf16, #tpu.memory_space<vmem>>, vector<128x128xbf16>
    %c0_8 = arith.constant 0 : index
    %c0_9 = arith.constant 0 : index
    %15 = vector.load %arg6[%c0_8, %c0_9] : memref<128x384xbf16, #tpu.memory_space<vmem>>, vector<128x384xbf16>
    %c0_10 = arith.constant 0 : index
    %c0_11 = arith.constant 0 : index
    %16 = vector.load %arg7[%c0_10, %c0_11] : memref<128x384xbf16, #tpu.memory_space<vmem>>, vector<128x384xbf16>
    %c0_12 = arith.constant 0 : index
    %c0_13 = arith.constant 0 : index
    %17 = vector.load %arg8[%c0_12, %c0_13] : memref<1x384xf32, #tpu.memory_space<vmem>>, vector<1x384xf32>
    %c0_14 = arith.constant 0 : index
    %c0_15 = arith.constant 0 : index
    %18 = vector.load %arg9[%c0_14, %c0_15] : memref<1x128xf32, #tpu.memory_space<vmem>>, vector<1x128xf32>
    %19 = arith.truncf %4 : vector<128x128xf32> to vector<128x128xbf16>
    %cst_16 = arith.constant dense<0.000000e+00> : vector<128x128xf32>
    %20 = tpu.matmul %13, %19, %cst_16 {dimension_numbers = #tpu.dot_dimension_numbers<[1], [0], [0], [1], [0, 0, 1, 1], [], []>} : vector<128x128xbf16>, vector<128x128xbf16>, vector<128x128xf32> -> vector<128x128xf32>
    %21 = arith.truncf %20 : vector<128x128xf32> to vector<128x128xbf16>
    %cst_17 = arith.constant dense<0.000000e+00> : vector<128x128xf32>
    %22 = tpu.matmul %21, %14, %cst_17 {dimension_numbers = #tpu.dot_dimension_numbers<[1], [0], [0], [1], [0, 0, 1, 1], [], []>} : vector<128x128xbf16>, vector<128x128xbf16>, vector<128x128xf32> -> vector<128x128xf32>
    %23 = arith.addf %2, %22 : vector<128x128xf32>
    %cst_18 = arith.constant 0.000000e+00 : f32
    %24 = vector.broadcast %cst_18 : f32 to vector<128x128xf32>
    %25 = arith.maximumf %23, %24 : vector<128x128xf32>
    %26 = arith.truncf %25 : vector<128x128xf32> to vector<128x128xbf16>
    %cst_19 = arith.constant dense<0.000000e+00> : vector<128x384xf32>
    %27 = tpu.matmul %26, %15, %cst_19 {dimension_numbers = #tpu.dot_dimension_numbers<[1], [0], [0], [1], [0, 0, 1, 1], [], []>} : vector<128x128xbf16>, vector<128x384xbf16>, vector<128x384xf32> -> vector<128x384xf32>
    %28 = vector.broadcast %17 : vector<1x384xf32> to vector<128x384xf32>
    %29 = arith.addf %27, %28 : vector<128x384xf32>
    %cst_20 = arith.constant dense<0.000000e+00> : vector<128x384xf32>
    %30 = tpu.matmul %19, %16, %cst_20 {dimension_numbers = #tpu.dot_dimension_numbers<[1], [0], [0], [1], [0, 0, 1, 1], [], []>} : vector<128x128xbf16>, vector<128x384xbf16>, vector<128x384xf32> -> vector<128x384xf32>
    %31 = vector.extract_strided_slice %29 {offsets = [0, 0], sizes = [128, 128], strides = [1, 1]} : vector<128x384xf32> to vector<128x128xf32>
    %32 = vector.extract_strided_slice %30 {offsets = [0, 0], sizes = [128, 128], strides = [1, 1]} : vector<128x384xf32> to vector<128x128xf32>
    %33 = arith.addf %31, %32 : vector<128x128xf32>
    %34 = arith.negf %33 : vector<128x128xf32>
    %35 = math.exp %34 : vector<128x128xf32>
    %cst_21 = arith.constant 1.000000e+00 : f32
    %36 = vector.broadcast %cst_21 : f32 to vector<128x128xf32>
    %37 = arith.addf %36, %35 : vector<128x128xf32>
    %38 = arith.divf %36, %37 : vector<128x128xf32>
    %39 = vector.extract_strided_slice %29 {offsets = [0, 128], sizes = [128, 128], strides = [1, 1]} : vector<128x384xf32> to vector<128x128xf32>
    %40 = vector.extract_strided_slice %30 {offsets = [0, 128], sizes = [128, 128], strides = [1, 1]} : vector<128x384xf32> to vector<128x128xf32>
    %41 = arith.addf %39, %40 : vector<128x128xf32>
    %42 = arith.negf %41 : vector<128x128xf32>
    %43 = math.exp %42 : vector<128x128xf32>
    %cst_22 = arith.constant 1.000000e+00 : f32
    %44 = vector.broadcast %cst_22 : f32 to vector<128x128xf32>
    %45 = arith.addf %44, %43 : vector<128x128xf32>
    %46 = arith.divf %44, %45 : vector<128x128xf32>
    %47 = vector.extract_strided_slice %29 {offsets = [0, 256], sizes = [128, 128], strides = [1, 1]} : vector<128x384xf32> to vector<128x128xf32>
    %48 = vector.extract_strided_slice %30 {offsets = [0, 256], sizes = [128, 128], strides = [1, 1]} : vector<128x384xf32> to vector<128x128xf32>
    %49 = vector.broadcast %18 : vector<1x128xf32> to vector<128x128xf32>
    %50 = arith.addf %48, %49 : vector<128x128xf32>
    %51 = arith.mulf %38, %50 : vector<128x128xf32>
    %52 = arith.addf %47, %51 : vector<128x128xf32>
    %53 = math.tanh %52 : vector<128x128xf32>
    %cst_23 = arith.constant 1.000000e+00 : f32
    %54 = vector.broadcast %cst_23 : f32 to vector<128x128xf32>
    %55 = arith.subf %54, %46 : vector<128x128xf32>
    %56 = arith.mulf %55, %53 : vector<128x128xf32>
    %57 = arith.mulf %46, %4 : vector<128x128xf32>
    %58 = arith.addf %56, %57 : vector<128x128xf32>
    %59 = vector.broadcast %12 : vector<128x1xf32> to vector<128x128xf32>
    %60 = arith.mulf %58, %59 : vector<128x128xf32>
    %61 = arith.truncf %60 : vector<128x128xf32> to vector<128x128xbf16>
    %cst_24 = arith.constant dense<0.000000e+00> : vector<128x128xf32>
    %62 = tpu.matmul %13, %61, %cst_24 {dimension_numbers = #tpu.dot_dimension_numbers<[1], [0], [0], [1], [0, 0, 1, 1], [], []>} : vector<128x128xbf16>, vector<128x128xbf16>, vector<128x128xf32> -> vector<128x128xf32>
    %63 = arith.truncf %62 : vector<128x128xf32> to vector<128x128xbf16>
    %cst_25 = arith.constant dense<0.000000e+00> : vector<128x128xf32>
    %64 = tpu.matmul %63, %14, %cst_25 {dimension_numbers = #tpu.dot_dimension_numbers<[1], [0], [0], [1], [0, 0, 1, 1], [], []>} : vector<128x128xbf16>, vector<128x128xbf16>, vector<128x128xf32> -> vector<128x128xf32>
    %65 = arith.addf %2, %64 : vector<128x128xf32>
    %cst_26 = arith.constant 0.000000e+00 : f32
    %66 = vector.broadcast %cst_26 : f32 to vector<128x128xf32>
    %67 = arith.maximumf %65, %66 : vector<128x128xf32>
    %68 = arith.truncf %67 : vector<128x128xf32> to vector<128x128xbf16>
    %cst_27 = arith.constant dense<0.000000e+00> : vector<128x384xf32>
    %69 = tpu.matmul %68, %15, %cst_27 {dimension_numbers = #tpu.dot_dimension_numbers<[1], [0], [0], [1], [0, 0, 1, 1], [], []>} : vector<128x128xbf16>, vector<128x384xbf16>, vector<128x384xf32> -> vector<128x384xf32>
    %70 = vector.broadcast %17 : vector<1x384xf32> to vector<128x384xf32>
    %71 = arith.addf %69, %70 : vector<128x384xf32>
    %cst_28 = arith.constant dense<0.000000e+00> : vector<128x384xf32>
    %72 = tpu.matmul %61, %16, %cst_28 {dimension_numbers = #tpu.dot_dimension_numbers<[1], [0], [0], [1], [0, 0, 1, 1], [], []>} : vector<128x128xbf16>, vector<128x384xbf16>, vector<128x384xf32> -> vector<128x384xf32>
    %73 = vector.extract_strided_slice %71 {offsets = [0, 0], sizes = [128, 128], strides = [1, 1]} : vector<128x384xf32> to vector<128x128xf32>
    %74 = vector.extract_strided_slice %72 {offsets = [0, 0], sizes = [128, 128], strides = [1, 1]} : vector<128x384xf32> to vector<128x128xf32>
    %75 = arith.addf %73, %74 : vector<128x128xf32>
    %76 = arith.negf %75 : vector<128x128xf32>
    %77 = math.exp %76 : vector<128x128xf32>
    %cst_29 = arith.constant 1.000000e+00 : f32
    %78 = vector.broadcast %cst_29 : f32 to vector<128x128xf32>
    %79 = arith.addf %78, %77 : vector<128x128xf32>
    %80 = arith.divf %78, %79 : vector<128x128xf32>
    %81 = vector.extract_strided_slice %71 {offsets = [0, 128], sizes = [128, 128], strides = [1, 1]} : vector<128x384xf32> to vector<128x128xf32>
    %82 = vector.extract_strided_slice %72 {offsets = [0, 128], sizes = [128, 128], strides = [1, 1]} : vector<128x384xf32> to vector<128x128xf32>
    %83 = arith.addf %81, %82 : vector<128x128xf32>
    %84 = arith.negf %83 : vector<128x128xf32>
    %85 = math.exp %84 : vector<128x128xf32>
    %cst_30 = arith.constant 1.000000e+00 : f32
    %86 = vector.broadcast %cst_30 : f32 to vector<128x128xf32>
    %87 = arith.addf %86, %85 : vector<128x128xf32>
    %88 = arith.divf %86, %87 : vector<128x128xf32>
    %89 = vector.extract_strided_slice %71 {offsets = [0, 256], sizes = [128, 128], strides = [1, 1]} : vector<128x384xf32> to vector<128x128xf32>
    %90 = vector.extract_strided_slice %72 {offsets = [0, 256], sizes = [128, 128], strides = [1, 1]} : vector<128x384xf32> to vector<128x128xf32>
    %91 = vector.broadcast %18 : vector<1x128xf32> to vector<128x128xf32>
    %92 = arith.addf %90, %91 : vector<128x128xf32>
    %93 = arith.mulf %80, %92 : vector<128x128xf32>
    %94 = arith.addf %89, %93 : vector<128x128xf32>
    %95 = math.tanh %94 : vector<128x128xf32>
    %cst_31 = arith.constant 1.000000e+00 : f32
    %96 = vector.broadcast %cst_31 : f32 to vector<128x128xf32>
    %97 = arith.subf %96, %88 : vector<128x128xf32>
    %98 = arith.mulf %97, %95 : vector<128x128xf32>
    %99 = arith.mulf %88, %60 : vector<128x128xf32>
    %100 = arith.addf %98, %99 : vector<128x128xf32>
    %101 = vector.broadcast %12 : vector<128x1xf32> to vector<128x128xf32>
    %102 = arith.mulf %100, %101 : vector<128x128xf32>
    %c0_32 = arith.constant 0 : index
    %c0_33 = arith.constant 0 : index
    %103 = vector.load %arg3[%c0_32, %c0_33] : memref<16x128xbf16, #tpu.memory_space<vmem>>, vector<16x128xbf16>
    %104 = arith.truncf %102 : vector<128x128xf32> to vector<128x128xbf16>
    %cst_34 = arith.constant dense<0.000000e+00> : vector<16x128xf32>
    %105 = tpu.matmul %103, %104, %cst_34 {dimension_numbers = #tpu.dot_dimension_numbers<[1], [0], [0], [1], [0, 0, 1, 1], [], []>} : vector<16x128xbf16>, vector<128x128xbf16>, vector<16x128xf32> -> vector<16x128xf32>
    %c0_35 = arith.constant 0 : index
    %c0_36 = arith.constant 0 : index
    %106 = vector.load %arg0[%c0_35, %c0_36] : memref<16x128xf32, #tpu.memory_space<vmem>>, vector<16x128xf32>
    %c0_37 = arith.constant 0 : index
    %c0_38 = arith.constant 0 : index
    %107 = vector.load %arg10[%c0_37, %c0_38] : memref<128x128xf32, #tpu.memory_space<vmem>>, vector<128x128xf32>
    %cst_39 = arith.constant dense<0.000000e+00> : vector<16x128xf32>
    %108 = tpu.matmul %106, %107, %cst_39 {dimension_numbers = #tpu.dot_dimension_numbers<[1], [0], [0], [1], [0, 0, 1, 1], [], []>} : vector<16x128xf32>, vector<128x128xf32>, vector<16x128xf32> -> vector<16x128xf32>
    %109 = arith.truncf %105 : vector<16x128xf32> to vector<16x128xbf16>
    %c0_40 = arith.constant 0 : index
    %c0_41 = arith.constant 0 : index
    %110 = vector.load %arg11[%c0_40, %c0_41] : memref<128x128xbf16, #tpu.memory_space<vmem>>, vector<128x128xbf16>
    %cst_42 = arith.constant dense<0.000000e+00> : vector<16x128xf32>
    %111 = tpu.matmul %109, %110, %cst_42 {dimension_numbers = #tpu.dot_dimension_numbers<[1], [0], [0], [1], [0, 0, 1, 1], [], []>} : vector<16x128xbf16>, vector<128x128xbf16>, vector<16x128xf32> -> vector<16x128xf32>
    %112 = arith.addf %108, %111 : vector<16x128xf32>
    %cst_43 = arith.constant 0.000000e+00 : f32
    %113 = vector.broadcast %cst_43 : f32 to vector<16x128xf32>
    %114 = arith.maximumf %112, %113 : vector<16x128xf32>
    %c0_44 = arith.constant 0 : index
    %c0_45 = arith.constant 0 : index
    %115 = vector.load %arg12[%c0_44, %c0_45] : memref<16x128xf32, #tpu.memory_space<vmem>>, vector<16x128xf32>
    tpu.vector_store %arg12[%c0_44, %c0_45], %114 {strides = array<i32>} : memref<16x128xf32, #tpu.memory_space<vmem>>, vector<16x128xf32>,
    return
  }
}

</mosaic_0001>

<bundles_post_ra>
// kernel: tpu_custom_call.1
= control target key start
LH: loop header
LB: loop body
LE: loop exit
PB: predicated region body
PF: predicated region fallthrough
CT: control target
= control target key end

     0   :  { %17 = vsyncpa [#allocation3], 0  ;;  %s5984_s0 = inlined_call_operand.hbm [shape: f32[16,128], index: 0, kind: input, shape index: {}]   ;;  %s5985_s1 = inlined_call_operand.hbm [shape: f32[128,128], index: 1, kind: input, shape index: {}]   ;;  %s5986_s2 = inlined_call_operand.hbm [shape: bf16[128,128], index: 2, kind: input, shape index: {}]   ;;  %s5987_s3 = inlined_call_operand.vmem [shape: bf16[16,128], index: 3, kind: input, shape index: {}]   ;;  %s5988_s4 = inlined_call_operand.hbm [shape: f32[128,128], index: 4, kind: input, shape index: {}]   ;;  %s5989_s5 = inlined_call_operand.hbm [shape: bf16[128,128], index: 5, kind: input, shape index: {}]   ;;  %s5990_s6 = inlined_call_operand.hbm [shape: bf16[128,384], index: 6, kind: input, shape index: {}]   ;;  %s5991_s7 = inlined_call_operand.hbm [shape: bf16[128,384], index: 7, kind: input, shape index: {}]   ;;  %s5992_s8 = inlined_call_operand.vmem [shape: f32[1,384], index: 8, kind: input, shape index: {}]   ;;  %s5993_s9 = inlined_call_operand.vmem [shape: f32[1,128], index: 9, kind: input, shape index: {}]   ;;  %s5994_s10 = inlined_call_operand.hbm [shape: f32[128,128], index: 10, kind: input, shape index: {}]   ;;  %s5995_s11 = inlined_call_operand.hbm [shape: bf16[128,128], index: 11, kind: input, shape index: {}]   ;;  %s5996_s12 = inlined_call_operand.hbm [shape: f32[16,128], index: 12, kind: output, shape index: {}]  }
   0x1   :  { %18 = vsyncpa [#allocation6], 0 }
   0x2   :  { %19 = vsyncpa [#allocation9], 0 }
   0x3   :  { %20 = vsyncpa [#allocation12], 0 }
   0x4   :  { %21 = vsyncpa [#allocation15], 0 }
   0x5   :  { %22 = vsyncpa [#allocation4], 0  ;;  %s4906_s21 = smov [#allocation5]   ;;  %s4907_s23 = smov [#allocation8]  }
   0x6   :  { %s40_s22 = sshll.u32 %s4906_s21, 4  ;;  %s66_s24 = sshll.u32 %s4907_s23, 4  ;;  %s41_s22 = int_to_ptr.vmem [resolvable:$true] %s40_s22  ;;  %s4990_s24 = int_to_ptr.vmem [resolvable:$true] %s66_s24 }
   0x7   :  { %s4674_s27 = scalar_lea.hbm %s5985_s1, 2048 }
   0x8   :  { %p4675_p0 = scmp.ne.s32.totalorder %s5985_s1, %s4674_s27  ;;  %p4678_p1 = scmp.lt.u32.totalorder %s4674_s27, %s5985_s1 }
   0xa   :  { %p4680_p2 = pnand %p4678_p1, %p4675_p0 }
   0xc   :  { %4683 = shalt.err (!%p4680_p2)
}
   0xd   :  { %s4684_s14 = scalar_lea.vmem %s41_s22, 2048  ;;  %p4689_p4 = scmp.lt.s32.totalorder %s41_s22, %s41_s22 }
   0xe   :  { %p4685_p3 = scmp.ne.s32.totalorder %s41_s22, %s4684_s14  ;;  %p4690_p5 = scmp.lt.s32.totalorder %s4684_s14, %s4684_s14 }
  0x10   :  { %p4691_p6 = por %p4690_p5, %p4689_p4 }
  0x12   :  { %p4692_p7 = pnand %p4691_p6, %p4685_p3 }
  0x14   :  { %4695 = shalt.err (!%p4692_p7)
}
  0x15   :  { %s4908_s15 = smov 128   ;;  %s4909_s16 = smov 8  }
  0x16   :  { %46 = dma.hbm_to_vmem [thread:$0]  %s5985_s1, 2048, %s41_s22, [#allocation6], %s4908_s15, %s4908_s15, %s4909_s16  }
  0x17   :  { %s4696_s21 = scalar_lea.hbm %s5988_s4, 2048 }
  0x18   :  { %p4697_p8 = scmp.ne.s32.totalorder %s5988_s4, %s4696_s21  ;;  %p4700_p9 = scmp.lt.u32.totalorder %s4696_s21, %s5988_s4 }
  0x1a   :  { %p4702_p10 = pnand %p4700_p9, %p4697_p8 }
  0x1c   :  { %4705 = shalt.err (!%p4702_p10)
}
  0x1d   :  { %s4706_s28 = scalar_lea.vmem %s4990_s24, 2048  ;;  %p4711_p12 = scmp.lt.s32.totalorder %s4990_s24, %s4990_s24 }
  0x1e   :  { %p4707_p11 = scmp.ne.s32.totalorder %s4990_s24, %s4706_s28  ;;  %p4712_p13 = scmp.lt.s32.totalorder %s4706_s28, %s4706_s28 }
  0x20   :  { %p4713_p0 = por %p4712_p13, %p4711_p12 }
  0x22   :  { %p4714_p1 = pnand %p4713_p0, %p4707_p11 }
  0x24   :  { %4717 = shalt.err (!%p4714_p1)
}
  0x25   :  { %72 = dma.hbm_to_vmem [thread:$0]  %s5988_s4, 2048, %s4990_s24, [#allocation9], %s4908_s15, %s4908_s15, %s4909_s16  }
  0x26   :  { %s4910_s29 = smov [#allocation11]   ;;  %s4718_s17 = scalar_lea.hbm %s5990_s6, 3072 }
  0x27   :  { %s90_s30 = sshll.u32 %s4910_s29, 4  ;;  %p4719_p2 = scmp.ne.s32.totalorder %s5990_s6, %s4718_s17  ;;  %s91_s30 = int_to_ptr.vmem [resolvable:$true] %s90_s30 }
  0x28   :  { %p4722_p3 = scmp.lt.u32.totalorder %s4718_s17, %s5990_s6 }
  0x2a   :  { %p4724_p4 = pnand %p4722_p3, %p4719_p2 }
  0x2c   :  { %4727 = shalt.err (!%p4724_p4)
}
  0x2d   :  { %s4728_s23 = scalar_lea.vmem %s91_s30, 3072  ;;  %p4733_p6 = scmp.lt.s32.totalorder %s91_s30, %s91_s30 }
  0x2e   :  { %p4729_p5 = scmp.ne.s32.totalorder %s91_s30, %s4728_s23  ;;  %p4734_p7 = scmp.lt.s32.totalorder %s4728_s23, %s4728_s23 }
  0x30   :  { %p4735_p8 = por %p4734_p7, %p4733_p6 }
  0x32   :  { %p4736_p9 = pnand %p4735_p8, %p4729_p5 }
  0x34   :  { %4739 = shalt.err (!%p4736_p9)
}
  0x35   :  { %s4911_s4 = smov 192   ;;  %s4912_s24 = smov 12  }
  0x36   :  { %96 = dma.hbm_to_vmem [thread:$0]  %s5990_s6, 3072, %s91_s30, [#allocation12], %s4911_s4, %s4911_s4, %s4912_s24  }
  0x37   :  { %s4913_s27 = smov [#allocation14]   ;;  %s4914_s1 = smov [#allocation2]  }
  0x38   :  { %s118_s28 = sshll.u32 %s4913_s27, 4  ;;  %s28_s22 = sshll.u32 %s4914_s1, 4  ;;  %s119_s28 = int_to_ptr.vmem [resolvable:$true] %s118_s28  ;;  %s29_s22 = int_to_ptr.vmem [resolvable:$true] %s28_s22 }
  0x39   :  { %s4740_s14 = scalar_lea.hbm %s5994_s10, 2048 }
  0x3a   :  { %p4741_p10 = scmp.ne.s32.totalorder %s5994_s10, %s4740_s14  ;;  %p4744_p11 = scmp.lt.u32.totalorder %s4740_s14, %s5994_s10 }
  0x3c   :  { %p4746_p12 = pnand %p4744_p11, %p4741_p10 }
  0x3e   :  { %4749 = shalt.err (!%p4746_p12)
}
  0x3f   :  { %s4750_s6 = scalar_lea.vmem %s119_s28, 2048  ;;  %p4755_p0 = scmp.lt.s32.totalorder %s119_s28, %s119_s28 }
  0x40   :  { %p4751_p13 = scmp.ne.s32.totalorder %s119_s28, %s4750_s6  ;;  %p4756_p1 = scmp.lt.s32.totalorder %s4750_s6, %s4750_s6 }
  0x42   :  { %p4757_p2 = por %p4756_p1, %p4755_p0 }
  0x44   :  { %p4758_p3 = pnand %p4757_p2, %p4751_p13 }
  0x46   :  { %4761 = shalt.err (!%p4758_p3)
}
  0x47   :  { %124 = dma.hbm_to_vmem [thread:$0]  %s5994_s10, 2048, %s119_s28, [#allocation15], %s4908_s15, %s4908_s15, %s4909_s16  }
  0x48   :  { %s4762_s26 = scalar_lea.hbm %s5984_s0, 256 }
  0x49   :  { %p4763_p4 = scmp.ne.s32.totalorder %s5984_s0, %s4762_s26  ;;  %p4766_p5 = scmp.lt.u32.totalorder %s4762_s26, %s5984_s0 }
  0x4b   :  { %p4768_p6 = pnand %p4766_p5, %p4763_p4 }
  0x4d   :  { %4771 = shalt.err (!%p4768_p6)
}
  0x4e   :  { %s4772_s14 = scalar_lea.vmem %s29_s22, 256  ;;  %p4777_p8 = scmp.lt.s32.totalorder %s29_s22, %s29_s22 }
  0x4f   :  { %p4773_p7 = scmp.ne.s32.totalorder %s29_s22, %s4772_s14  ;;  %p4778_p9 = scmp.lt.s32.totalorder %s4772_s14, %s4772_s14 }
  0x51   :  { %p4779_p10 = por %p4778_p9, %p4777_p8 }
  0x53   :  { %p4780_p11 = pnand %p4779_p10, %p4773_p7 }
  0x55   :  { %4783 = shalt.err (!%p4780_p11)
}
  0x56   :  { %34 = dma.hbm_to_vmem [thread:$0]  %s5984_s0, 256, %s29_s22, [#allocation3], %s4908_s15, %s4908_s15, %s4909_s16  }
  0x57   :  { %s4915_s17 = smov [#allocation7]   ;;  %s4784_s6 = scalar_lea.hbm %s5986_s2, 1024 }
  0x58   :  { %s52_s18 = sshll.u32 %s4915_s17, 4  ;;  %p4785_p12 = scmp.ne.s32.totalorder %s5986_s2, %s4784_s6  ;;  %s53_s18 = int_to_ptr.vmem [resolvable:$true] %s52_s18 }
  0x59   :  { %p4788_p13 = scmp.lt.u32.totalorder %s4784_s6, %s5986_s2 }
  0x5b   :  { %p4790_p0 = pnand %p4788_p13, %p4785_p12 }
  0x5d   :  { %4793 = shalt.err (!%p4790_p0)
}
  0x5e   :  { %s4794_s26 = scalar_lea.vmem %s53_s18, 1024  ;;  %p4799_p2 = scmp.lt.s32.totalorder %s53_s18, %s53_s18 }
  0x5f   :  { %p4795_p1 = scmp.ne.s32.totalorder %s53_s18, %s4794_s26  ;;  %p4800_p3 = scmp.lt.s32.totalorder %s4794_s26, %s4794_s26 }
  0x61   :  { %p4801_p4 = por %p4800_p3, %p4799_p2 }
  0x63   :  { %p4802_p5 = pnand %p4801_p4, %p4795_p1 }
  0x65   :  { %4805 = shalt.err (!%p4802_p5)
}
  0x66   :  { %s4916_s0 = smov 64   ;;  %s4917_s22 = smov 4  }
  0x67   :  { %58 = dma.hbm_to_vmem [thread:$0]  %s5986_s2, 1024, %s53_s18, [#allocation6], %s4916_s0, %s4916_s0, %s4917_s22  }
  0x68   :  { %s4918_s29 = smov [#allocation10]   ;;  %s4919_s14 = smov [#allocation13]  }
  0x69   :  { %s78_s13 = sshll.u32 %s4918_s29, 4  ;;  %s102_s10 = sshll.u32 %s4919_s14, 4  ;;  %s79_s13 = int_to_ptr.vmem [resolvable:$true] %s78_s13  ;;  %s5087_s10 = int_to_ptr.vmem [resolvable:$true] %s102_s10 }
  0x6a   :  { %s4806_s19 = scalar_lea.hbm %s5989_s5, 1024 }
  0x6b   :  { %p4807_p6 = scmp.ne.s32.totalorder %s5989_s5, %s4806_s19  ;;  %p4810_p7 = scmp.lt.u32.totalorder %s4806_s19, %s5989_s5 }
  0x6d   :  { %p4812_p8 = pnand %p4810_p7, %p4807_p6 }
  0x6f   :  { %4815 = shalt.err (!%p4812_p8)
}
  0x70   :  { %s4816_s2 = scalar_lea.vmem %s79_s13, 1024  ;;  %p4821_p10 = scmp.lt.s32.totalorder %s79_s13, %s79_s13 }
  0x71   :  { %p4817_p9 = scmp.ne.s32.totalorder %s79_s13, %s4816_s2  ;;  %p4822_p11 = scmp.lt.s32.totalorder %s4816_s2, %s4816_s2 }
  0x73   :  { %p4823_p12 = por %p4822_p11, %p4821_p10 }
  0x75   :  { %p4824_p13 = pnand %p4823_p12, %p4817_p9 }
  0x77   :  { %4827 = shalt.err (!%p4824_p13)
}
  0x78   :  { %84 = dma.hbm_to_vmem [thread:$0]  %s5989_s5, 1024, %s79_s13, [#allocation9], %s4916_s0, %s4916_s0, %s4917_s22  }
  0x79   :  { %s4828_s27 = scalar_lea.hbm %s5991_s7, 3072 }
  0x7a   :  { %p4829_p0 = scmp.ne.s32.totalorder %s5991_s7, %s4828_s27  ;;  %p4832_p1 = scmp.lt.u32.totalorder %s4828_s27, %s5991_s7 }
  0x7c   :  { %p4834_p2 = pnand %p4832_p1, %p4829_p0 }
  0x7e   :  { %4837 = shalt.err (!%p4834_p2)
}
  0x7f   :  { %s4838_s17 = scalar_lea.vmem %s5087_s10, 3072  ;;  %p4843_p4 = scmp.lt.s32.totalorder %s5087_s10, %s5087_s10 }
  0x80   :  { %p4839_p3 = scmp.ne.s32.totalorder %s5087_s10, %s4838_s17  ;;  %p4844_p5 = scmp.lt.s32.totalorder %s4838_s17, %s4838_s17 }
  0x82   :  { %p4845_p6 = por %p4844_p5, %p4843_p4 }
  0x84   :  { %p4846_p7 = pnand %p4845_p6, %p4839_p3 }
  0x86   :  { %4849 = shalt.err (!%p4846_p7)
}
  0x87   :  { %108 = dma.hbm_to_vmem [thread:$0]  %s5991_s7, 3072, %s5087_s10, [#allocation12], %s4911_s4, %s4911_s4, %s4912_s24  }
  0x88   :  { %s4920_s19 = smov [#allocation16]   ;;  %s4850_s21 = scalar_lea.hbm %s5995_s11, 1024 }
  0x89   :  { %s130_s20 = sshll.u32 %s4920_s19, 4  ;;  %p4851_p8 = scmp.ne.s32.totalorder %s5995_s11, %s4850_s21  ;;  %s131_s20 = int_to_ptr.vmem [resolvable:$true] %s130_s20 }
  0x8a   :  { %p4854_p9 = scmp.lt.u32.totalorder %s4850_s21, %s5995_s11 }
  0x8c   :  { %p4856_p10 = pnand %p4854_p9, %p4851_p8 }
  0x8e   :  { %4859 = shalt.err (!%p4856_p10)
}
  0x8f   :  { %s4860_s26 = scalar_lea.vmem %s131_s20, 1024  ;;  %p4865_p12 = scmp.lt.s32.totalorder %s131_s20, %s131_s20 }
  0x90   :  { %p4861_p11 = scmp.ne.s32.totalorder %s131_s20, %s4860_s26  ;;  %p4866_p13 = scmp.lt.s32.totalorder %s4860_s26, %s4860_s26 }
  0x92   :  { %p4867_p0 = por %p4866_p13, %p4865_p12 }
  0x94   :  { %p4868_p1 = pnand %p4867_p0, %p4861_p11 }
  0x96   :  { %4871 = shalt.err (!%p4868_p1)
}
  0x97   :  { %136 = dma.hbm_to_vmem [thread:$0]  %s5995_s11, 1024, %s131_s20, [#allocation15], %s4916_s0, %s4916_s0, %s4917_s22  }
  0x98   :  { %4894 = dma.done.wait [#allocation3], 256  }
  0x99   :  { %4895 = vsyncadd [#allocation3], 4294967040 }
  0x9a   :  { %4896 = dma.done.wait [#allocation6], 3072  }
  0x9b   :  { %4897 = vsyncadd [#allocation6], 4294964224 }
  0x9c   :  { %4898 = dma.done.wait [#allocation9], 3072  }
  0x9d   :  { %4899 = vsyncadd [#allocation9], 4294964224 }
  0x9e   :  { %4900 = dma.done.wait [#allocation12], 6144  }
  0x9f   :  { %4901 = vsyncadd [#allocation12], 4294961152 }
  0xa0   :  { %4902 = dma.done.wait [#allocation15], 3072  }
  0xa1   :  { %4903 = vsyncadd [#allocation15], 4294964224  ;;  %v181_v0 = vld [vmem:[#allocation8] sm:$0xff]  ;;  %v182_v1 = vld [vmem:[#allocation8 + $0x8] sm:$0xff]  ;;  %vm4923_vm2 = vmmov 0  }
  0xa2   :  { %v183_v2 = vld [vmem:[#allocation8 + $0x10] sm:$0xff]  ;;  %v4007_v3 = vpack.c.bf16 %v182_v1, %v181_v0  ;;  %v184_v4 = vld [vmem:[#allocation8 + $0x18] sm:$0xff]  ;;  %v185_v6 = vld [vmem:[#allocation8 + $0x20] sm:$0xff] }
  0xa3   :  { %v4011_v5 = vpack.c.bf16 %v184_v4, %v183_v2  ;;  %v186_v7 = vld [vmem:[#allocation8 + $0x28] sm:$0xff]  ;;  %v165_v9 = vld [vmem:[#allocation5] sm:$0xff]  ;;  %v187_v10 = vld [vmem:[#allocation8 + $0x30] sm:$0xff] }
  0xa4   :  { %4008 = vmatprep.subr.bf16.mxu0 %v4007_v3  ;;  %v4015_v8 = vpack.c.bf16 %v186_v7, %v185_v6  ;;  %v188_v11 = vld [vmem:[#allocation8 + $0x38] sm:$0xff]  ;;  %3652 = vmatprep.mubr.f32.mxu0 %v165_v9  ;;  %v189_v13 = vld [vmem:[#allocation8 + $0x40] sm:$0xff]  ;;  %v190_v14 = vld [vmem:[#allocation8 + $0x48] sm:$0xff] }
  0xa5   :  { %4010 = vmatpush3.bf16.msra.mxu0 %v4007_v3  ;;  %v4019_v12 = vpack.c.bf16 %v188_v11, %v187_v10  ;;  %v191_v15 = vld [vmem:[#allocation8 + $0x50] sm:$0xff]  ;;  %v192_v16 = vld [vmem:[#allocation8 + $0x58] sm:$0xff]  ;;  %v4023_v17 = vpack.c.bf16 %v190_v14, %v189_v13  ;;  %v193_v18 = vld [vmem:[#allocation8 + $0x60] sm:$0xff] }
  0xa6   :  { %4012 = vmatprep.subr.bf16.mxu0 %v4011_v5  ;;  %v194_v19 = vld [vmem:[#allocation8 + $0x68] sm:$0xff]  ;;  %v4027_v20 = vpack.c.bf16 %v192_v16, %v191_v15  ;;  %v195_v21 = vld [vmem:[#allocation8 + $0x70] sm:$0xff]  ;;  %v196_v22 = vld [vmem:[#allocation8 + $0x78] sm:$0xff] }
  0xa7   :  { %v4031_v23 = vpack.c.bf16 %v194_v19, %v193_v18  ;;  %v4035_v24 = vpack.c.bf16 %v196_v22, %v195_v21  ;;  %v166_v25 = vld [vmem:[#allocation5 + $0x8] sm:$0xff]  ;;  %v167_v26 = vld [vmem:[#allocation5 + $0x10] sm:$0xff]  ;;  %v168_v27 = vld [vmem:[#allocation5 + $0x18] sm:$0xff] }
  0xa8   :  { %v169_v28 = vld [vmem:[#allocation5 + $0x20] sm:$0xff]  ;;  %v170_v29 = vld [vmem:[#allocation5 + $0x28] sm:$0xff]  ;;  %v171_v30 = vld [vmem:[#allocation5 + $0x30] sm:$0xff] }
  0xa9   :  { %4014 = vmatpush3.bf16.msra.mxu0 %v4011_v5  ;;  %v172_v31 = vld [vmem:[#allocation5 + $0x38] sm:$0xff]  ;;  %v173_v32 = vld [vmem:[#allocation5 + $0x40] sm:$0xff]  ;;  %v174_v33 = vld [vmem:[#allocation5 + $0x48] sm:$0xff] }
  0xaa   :  { %4016 = vmatprep.subr.bf16.mxu0 %v4015_v8  ;;  %v175_v34 = vld [vmem:[#allocation5 + $0x50] sm:$0xff]  ;;  %v176_v35 = vld [vmem:[#allocation5 + $0x58] sm:$0xff]  ;;  %v177_v36 = vld [vmem:[#allocation5 + $0x60] sm:$0xff] }
  0xab   :  { %v178_v37 = vld [vmem:[#allocation5 + $0x68] sm:$0xff]  ;;  %v179_v38 = vld [vmem:[#allocation5 + $0x70] sm:$0xff]  ;;  %v180_v39 = vld [vmem:[#allocation5 + $0x78] sm:$0xff] }
  0xac   :  { %v5139_v40 = vld [vmem:[#allocation7] sm:$0xff]   ;;  %v4227_v42 = vld [vmem:[#allocation10 + $0x8] sm:$0xff]   ;;  %v4228_v43 = vld [vmem:[#allocation10 + $0x10] sm:$0xff]  }
  0xad   :  { %4018 = vmatpush3.bf16.msra.mxu0 %v4015_v8  ;;  %3692 = vmatprep.mubr.bf16.mxu1 %v5139_v40  ;;  %v4226_v41 = vld [vmem:[#allocation10] sm:$0xff]   ;;  %v4229_v44 = vld [vmem:[#allocation10 + $0x18] sm:$0xff]   ;;  %v4231_v46 = vld [vmem:[#allocation10 + $0x28] sm:$0xff]  }
  0xae   :  { %4020 = vmatprep.subr.bf16.mxu0 %v4019_v12  ;;  %v4230_v45 = vld [vmem:[#allocation10 + $0x20] sm:$0xff]   ;;  %v4232_v47 = vld [vmem:[#allocation10 + $0x30] sm:$0xff]  }
  0xb1   :  { %4022 = vmatpush3.bf16.msra.mxu0 %v4019_v12 }
  0xb2   :  { %4024 = vmatprep.subr.bf16.mxu0 %v4023_v17 }
  0xb5   :  { %4026 = vmatpush3.bf16.msra.mxu0 %v4023_v17 }
  0xb6   :  { %4028 = vmatprep.subr.bf16.mxu0 %v4027_v20 }
  0xb9   :  { %4030 = vmatpush3.bf16.msra.mxu0 %v4027_v20 }
  0xba   :  { %4032 = vmatprep.subr.bf16.mxu0 %v4031_v23 }
  0xbd   :  { %4034 = vmatpush3.bf16.msra.mxu0 %v4031_v23 }
  0xbe   :  { %4036 = vmatprep.subr.bf16.mxu0 %v4035_v24 }
  0xc1   :  { %4038 = vmatpush3.bf16.msra.mxu0 %v4035_v24  ;;  %v4219_v24 = vld [vmem:[#allocation7 + $0x8] sm:$0xff]  }
  0xc2   :  { %3708 = vmatprep.subr.bf16.mxu0 %v4226_v41 }
  0xc4   :  { %3653 = vmatmul.mubr.f32.vlgmr.msra.gmra.mrb[0].mxu0 %v166_v25  ;;  %v4220_v25 = vld [vmem:[#allocation7 + $0x10] sm:$0xff]  }
  0xc5   :  { %3655 = vmatprep.mubr.f32.mxu0 %v167_v26  ;;  %3709 = vmatpush3.bf16.msra.mxu0 %v4226_v41  ;;  %v4221_v26 = vld [vmem:[#allocation7 + $0x18] sm:$0xff]   ;;  %v5274_v41 = vld [vmem:[#allocation11 + $0x48] ss:$12 sps:$4 sm:$0xff]  }
  0xc6   :  { %3710 = vmatprep.subr.bf16.mxu0 %v4227_v42 }
  0xc8   :  { %3656 = vmatmul.mubr.f32.gmra.mrb[2].mxu0 %v168_v27  ;;  %v4222_v27 = vld [vmem:[#allocation7 + $0x20] sm:$0xff]  }
  0xc9   :  { %3658 = vmatprep.mubr.f32.mxu0 %v169_v28  ;;  %3711 = vmatpush3.bf16.msra.mxu0 %v4227_v42  ;;  %v4223_v28 = vld [vmem:[#allocation7 + $0x28] sm:$0xff]   ;;  %v5277_v42 = vld [vmem:[#allocation11 + $0x64] ss:$12 sps:$4 sm:$0xff]  }
  0xca   :  { %3712 = vmatprep.subr.bf16.mxu0 %v4228_v43 }
  0xcc   :  { %3659 = vmatmul.mubr.f32.gmra.mrb[4].mxu0 %v170_v29  ;;  %v4224_v29 = vld [vmem:[#allocation7 + $0x30] sm:$0xff]  }
  0xcd   :  { %3661 = vmatprep.mubr.f32.mxu0 %v171_v30  ;;  %3713 = vmatpush3.bf16.msra.mxu0 %v4228_v43  ;;  %v4225_v30 = vld [vmem:[#allocation7 + $0x38] sm:$0xff]   ;;  %v5280_v43 = vld [vmem:[#allocation11 + $0x60] ss:$12 sps:$4 sm:$0xff]  }
  0xce   :  { %3714 = vmatprep.subr.bf16.mxu0 %v4229_v44 }
  0xd0   :  { %3662 = vmatmul.mubr.f32.gmra.mrb[6].mxu0 %v172_v31  ;;  %v4233_v31 = vld [vmem:[#allocation10 + $0x38] sm:$0xff]  }
  0xd1   :  { %3664 = vmatprep.mubr.f32.mxu0 %v173_v32  ;;  %3715 = vmatpush3.bf16.msra.mxu0 %v4229_v44  ;;  %v5254_v32 = vld [vmem:[#allocation11] ss:$12 sps:$4 sm:$0xff]   ;;  %v5283_v44 = vld [vmem:[#allocation11 + $0x7c] ss:$12 sps:$4 sm:$0xff]  }
  0xd2   :  { %3716 = vmatprep.subr.bf16.mxu0 %v4230_v45 }
  0xd4   :  { %3665 = vmatmul.mubr.f32.gmra.mrb[8].mxu0 %v174_v33  ;;  %v5256_v33 = vld [vmem:[#allocation11 + $0x4] ss:$12 sps:$4 sm:$0xff]  }
  0xd5   :  { %3667 = vmatprep.mubr.f32.mxu0 %v175_v34  ;;  %3717 = vmatpush3.bf16.msra.mxu0 %v4230_v45  ;;  %v4237_v34 = vld [vmem:[#allocation11 + $0x8] ss:$12 sps:$4 sm:$0xff]   ;;  %v5286_v45 = vld [vmem:[#allocation11 + $0x78] ss:$12 sps:$4 sm:$0xff]  }
  0xd6   :  { %3718 = vmatprep.subr.bf16.mxu0 %v4231_v46 }
  0xd8   :  { %3668 = vmatmul.mubr.f32.gmra.mrb[10].mxu0 %v176_v35  ;;  %v5258_v35 = vld [vmem:[#allocation11 + $0x1c] ss:$12 sps:$4 sm:$0xff]  }
  0xd9   :  { %3670 = vmatprep.mubr.f32.mxu0 %v177_v36  ;;  %3719 = vmatpush3.bf16.msra.mxu0 %v4231_v46  ;;  %v5262_v36 = vld [vmem:[#allocation11 + $0x18] ss:$12 sps:$4 sm:$0xff]  }
  0xda   :  { %3720 = vmatprep.subr.bf16.mxu0 %v4232_v47 }
  0xdc   :  { %3671 = vmatmul.mubr.f32.gmra.mrb[12].mxu0 %v178_v37  ;;  %v5265_v37 = vld [vmem:[#allocation11 + $0x34] ss:$12 sps:$4 sm:$0xff]  }
  0xdd   :  { %3673 = vmatprep.mubr.f32.mxu0 %v179_v38  ;;  %3721 = vmatpush3.bf16.msra.mxu0 %v4232_v47  ;;  %v5268_v38 = vld [vmem:[#allocation11 + $0x30] ss:$12 sps:$4 sm:$0xff]  }
  0xde   :  { %3722 = vmatprep.subr.bf16.mxu0 %v4233_v31 }
  0xe0   :  { %3674 = vmatmul.mubr.f32.gmra.mrb[14].mxu0 %v180_v39  ;;  %v5271_v39 = vld [vmem:[#allocation11 + $0x4c] ss:$12 sps:$4 sm:$0xff]  }
  0xe1   :  { %3723 = vmatpush3.bf16.msra.mxu0 %v4233_v31  ;;  %v4245_v31 = vld [vmem:[#allocation11 + $0x38] ss:$12 sps:$4 sm:$0xff]  }
  0xe2   :  { %3740 = vmatprep.subr.bf16.mxu0 %v4237_v34 }
 0x197   :  { %v5142_v48 = vpop.f32.mrb[0].mxu0 }
 0x198   :  { %v6011_v49 = vmax.f32 %v5142_v48, 0.0  ;;  %v5145_v50 = vpop.f32.mrb[1].mxu0 }
 0x199   :  { %6037 = vst [vmem:[#allocation24_spill] sm:$0xff] %v5145_v50  ;;  %v6012_v51 = vmax.f32 %v5145_v50, 0.0 }
 0x19b   :  { %v5152_v52 = vpack.c.bf16 %v6011_v49, %v6012_v51  ;;  %v5154_v53 = vpop.f32.mrb[2].mxu0  ;;  %v4273_v49 = vld [vmem:[#allocation13 + $0x1c] ss:$12 sps:$4 sm:$0xff]  }
 0x19c   :  { %v6009_v54 = vmax.f32 %v5154_v53, 0.0  ;;  %v5157_v55 = vpop.f32.mrb[3].mxu0 }
 0x19d   :  { %v6010_v56 = vmax.f32 %v5157_v55, 0.0  ;;  %3676 = vmatprep.subr.bf16.mxu1 %v5152_v52 }
 0x19e   :  { %3677 = vmatpush3.bf16.msra.mxu1 %v5152_v52 }
 0x19f   :  { %v5166_v57 = vpack.c.bf16 %v6009_v54, %v6010_v56  ;;  %v5168_v58 = vpop.f32.mrb[4].mxu0  ;;  %v4270_v56 = vld [vmem:[#allocation13 + $0x20] ss:$12 sps:$4 sm:$0xff]  }
 0x1a0   :  { %v6007_v59 = vmax.f32 %v5168_v58, 0.0  ;;  %v5171_v60 = vpop.f32.mrb[5].mxu0 }
 0x1a1   :  { %v6008_v61 = vmax.f32 %v5171_v60, 0.0  ;;  %3678 = vmatprep.subr.bf16.mxu1 %v5166_v57 }
 0x1a2   :  { %3679 = vmatpush3.bf16.msra.mxu1 %v5166_v57 }
 0x1a3   :  { %v5180_v62 = vpack.c.bf16 %v6007_v59, %v6008_v61  ;;  %v5182_v63 = vpop.f32.mrb[6].mxu0 }
 0x1a4   :  { %v6005_v0 = vmax.f32 %v5182_v63, 0.0  ;;  %v5185_v1 = vpop.f32.mrb[7].mxu0 }
 0x1a5   :  { %v6006_v2 = vmax.f32 %v5185_v1, 0.0  ;;  %3680 = vmatprep.subr.bf16.mxu1 %v5180_v62 }
 0x1a6   :  { %3681 = vmatpush3.bf16.msra.mxu1 %v5180_v62 }
 0x1a7   :  { %v5194_v3 = vpack.c.bf16 %v6005_v0, %v6006_v2  ;;  %v5196_v4 = vpop.f32.mrb[8].mxu0  ;;  %v4266_v2 = vld [vmem:[#allocation13] ss:$12 sps:$4 sm:$0xff]  }
 0x1a8   :  { %v6003_v5 = vmax.f32 %v5196_v4, 0.0  ;;  %v5199_v6 = vpop.f32.mrb[9].mxu0 }
 0x1a9   :  { %v6004_v7 = vmax.f32 %v5199_v6, 0.0  ;;  %3682 = vmatprep.subr.bf16.mxu1 %v5194_v3 }
 0x1aa   :  { %3683 = vmatpush3.bf16.msra.mxu1 %v5194_v3 }
 0x1ab   :  { %v5208_v8 = vpack.c.bf16 %v6003_v5, %v6004_v7  ;;  %v5210_v9 = vpop.f32.mrb[10].mxu0 }
 0x1ac   :  { %6038 = vst [vmem:[#allocation25_spill] sm:$0xff] %v5210_v9  ;;  %v6001_v10 = vmax.f32 %v5210_v9, 0.0  ;;  %v5213_v11 = vpop.f32.mrb[11].mxu0 }
 0x1ad   :  { %6039 = vst [vmem:[#allocation26_spill] sm:$0xff] %v5213_v11  ;;  %v6002_v12 = vmax.f32 %v5213_v11, 0.0  ;;  %3684 = vmatprep.subr.bf16.mxu1 %v5208_v8 }
 0x1ae   :  { %3685 = vmatpush3.bf16.msra.mxu1 %v5208_v8 }
 0x1af   :  { %v5222_v13 = vpack.c.bf16 %v6001_v10, %v6002_v12  ;;  %v5224_v14 = vpop.f32.mrb[12].mxu0  ;;  %v4249_v10 = vld [vmem:[#allocation11 + $0x50] ss:$12 sps:$4 sm:$0xff]   ;;  %v4257_v12 = vld [vmem:[#allocation11 + $0x80] ss:$12 sps:$4 sm:$0xff]  }
 0x1b0   :  { %6040 = vst [vmem:[#allocation27_spill] sm:$0xff] %v5224_v14  ;;  %v5999_v15 = vmax.f32 %v5224_v14, 0.0  ;;  %v5227_v16 = vpop.f32.mrb[13].mxu0 }
 0x1b1   :  { %6041 = vst [vmem:[#allocation28_spill] sm:$0xff] %v5227_v16  ;;  %v6000_v17 = vmax.f32 %v5227_v16, 0.0  ;;  %3686 = vmatprep.subr.bf16.mxu1 %v5222_v13 }
 0x1b2   :  { %3687 = vmatpush3.bf16.msra.mxu1 %v5222_v13 }
 0x1b3   :  { %v5236_v18 = vpack.c.bf16 %v5999_v15, %v6000_v17  ;;  %v5238_v19 = vpop.f32.mrb[14].mxu0 }
 0x1b4   :  { %6042 = vst [vmem:[#allocation29_spill] sm:$0xff] %v5238_v19  ;;  %v5997_v20 = vmax.f32 %v5238_v19, 0.0  ;;  %v5241_v21 = vpop.f32.mrb[15].mxu0 }
 0x1b5   :  { %6043 = vst [vmem:[#allocation30_spill] sm:$0xff] %v5241_v21  ;;  %v5998_v22 = vmax.f32 %v5241_v21, 0.0  ;;  %3688 = vmatprep.subr.bf16.mxu1 %v5236_v18 }
 0x1b6   :  { %3689 = vmatpush3.bf16.msra.mxu1 %v5236_v18 }
 0x1b7   :  { %v5250_v23 = vpack.c.bf16 %v5997_v20, %v5998_v22 }
 0x1b9   :  { %3690 = vmatprep.subr.bf16.mxu1 %v5250_v23 }
 0x1ba   :  { %3691 = vmatpush3.bf16.msra.mxu1 %v5250_v23 }
 0x1bb   :  { %1043 = vmatprep.subr.bf16.mxu1 %v5256_v33 }
 0x1bd   :  { %3693 = vmatmul.mubr.bf16.vlgmr.msra.gmra.mrb[0].mxu1 %v4219_v24 }
 0x1be   :  { %3696 = vmatprep.mubr.bf16.mxu1 %v4220_v25  ;;  %1044 = vmatpush1.bf16.msra.mxu1 %v5254_v32 }
 0x1bf   :  { %1045 = vmatprep.subr.bf16.mxu1 %v5258_v35 }
 0x1c2   :  { %1046 = vmatpush1.bf16.msra.mxu1 %v5262_v36 }
 0x1c3   :  { %1047 = vmatprep.subr.bf16.mxu1 %v5265_v37 }
 0x1c5   :  { %3697 = vmatmul.mubr.bf16.gmra.mrb[4].mxu1 %v4221_v26 }
 0x1c6   :  { %3700 = vmatprep.mubr.bf16.mxu1 %v4222_v27  ;;  %1048 = vmatpush1.bf16.msra.mxu1 %v5268_v38 }
 0x1c7   :  { %1049 = vmatprep.subr.bf16.mxu1 %v5271_v39 }
 0x1ca   :  { %1050 = vmatpush1.bf16.msra.mxu1 %v5274_v41 }
 0x1cb   :  { %1051 = vmatprep.subr.bf16.mxu1 %v5277_v42 }
 0x1cd   :  { %3701 = vmatmul.mubr.bf16.gmra.mrb[8].mxu1 %v4223_v28  ;;  %v4241_v28 = vld [vmem:[#allocation11 + $0x20] ss:$12 sps:$4 sm:$0xff]  }
 0x1ce   :  { %3704 = vmatprep.mubr.bf16.mxu1 %v4224_v29  ;;  %1052 = vmatpush1.bf16.msra.mxu1 %v5280_v43 }
 0x1cf   :  { %1053 = vmatprep.subr.bf16.mxu1 %v5283_v44 }
 0x1d2   :  { %1054 = vmatpush1.bf16.msra.mxu1 %v5286_v45 }
 0x1d5   :  { %3705 = vmatmul.mubr.bf16.gmra.mrb[12].mxu1 %v4225_v30 }
 0x290   :  { %v3694_v46 = vpop.f32.mrb[0].mxu1 }
 0x291   :  { %v643_v47 = vpop.f32.mrb[1].mxu1 }
 0x292   :  { %v3695_v24 = vpop.f32.mrb[2].mxu1 }
 0x293   :  { %v707_v25 = vpack.c.bf16 %v3695_v24, %v3694_v46  ;;  %v646_v26 = vpop.f32.mrb[3].mxu1  ;;  %v4253_v24 = vld [vmem:[#allocation11 + $0x68] ss:$12 sps:$4 sm:$0xff]  }
 0x294   :  { %v706_v27 = vpack.c.bf16 %v646_v26, %v643_v47 }
 0x296   :  { %3724 = vmatprep.mubr.bf16.mxu0 %v706_v27 }
 0x297   :  { %3725 = vmatmul.mubr.bf16.vlgmr.msra.gmra.mrb[16].mxu0 %v707_v25 }
 0x298   :  { %v3698_v29 = vpop.f32.mrb[4].mxu1  ;;  %3741 = vmatpush3.bf16.msra.mxu0 %v4237_v34 }
 0x299   :  { %v659_v30 = vpop.f32.mrb[5].mxu1  ;;  %3742 = vmatprep.subr.bf16.mxu0 %v4241_v28 }
 0x29a   :  { %v3699_v20 = vpop.f32.mrb[6].mxu1 }
 0x29b   :  { %v709_v22 = vpack.c.bf16 %v3699_v20, %v3698_v29  ;;  %v662_v15 = vpop.f32.mrb[7].mxu1 }
 0x29c   :  { %v708_v17 = vpack.c.bf16 %v662_v15, %v659_v30  ;;  %3743 = vmatpush3.bf16.msra.mxu0 %v4241_v28  ;;  %v5290_v30 = vld [vmem:[#allocation11 + $0x94] ss:$12 sps:$4 sm:$0xff]  }
 0x29d   :  { %3744 = vmatprep.subr.bf16.mxu0 %v4245_v31  ;;  %1055 = vmatprep.subr.bf16.mxu1 %v5290_v30 }
 0x29e   :  { %3728 = vmatprep.mubr.bf16.mxu0 %v708_v17 }
 0x29f   :  { %3729 = vmatmul.mubr.bf16.gmra.mrb[20].mxu0 %v709_v22 }
 0x2a0   :  { %v3702_v46 = vpop.f32.mrb[8].mxu1  ;;  %3745 = vmatpush3.bf16.msra.mxu0 %v4245_v31  ;;  %v5292_v31 = vld [vmem:[#allocation11 + $0x90] ss:$12 sps:$4 sm:$0xff]  }
 0x2a1   :  { %v675_v47 = vpop.f32.mrb[9].mxu1  ;;  %3746 = vmatprep.subr.bf16.mxu0 %v4249_v10  ;;  %1056 = vmatpush1.bf16.msra.mxu1 %v5292_v31 }
 0x2a2   :  { %v3703_v25 = vpop.f32.mrb[10].mxu1 }
 0x2a3   :  { %v711_v26 = vpack.c.bf16 %v3703_v25, %v3702_v46  ;;  %v678_v34 = vpop.f32.mrb[11].mxu1  ;;  %v5296_v46 = vld [vmem:[#allocation11 + $0xac] ss:$12 sps:$4 sm:$0xff]   ;;  %v4269_v25 = vld [vmem:[#allocation13 + $0x8] ss:$12 sps:$4 sm:$0xff]  }
 0x2a4   :  { %v710_v27 = vpack.c.bf16 %v678_v34, %v675_v47  ;;  %3747 = vmatpush3.bf16.msra.mxu0 %v4249_v10  ;;  %v4261_v10 = vld [vmem:[#allocation11 + $0x98] ss:$12 sps:$4 sm:$0xff]   ;;  %v5298_v47 = vld [vmem:[#allocation11 + $0xa8] ss:$12 sps:$4 sm:$0xff]   ;;  %1057 = vmatprep.subr.bf16.mxu1 %v5296_v46 }
 0x2a5   :  { %3748 = vmatprep.subr.bf16.mxu0 %v4253_v24  ;;  %1058 = vmatpush1.bf16.msra.mxu1 %v5298_v47 }
 0x2a6   :  { %3732 = vmatprep.mubr.bf16.mxu0 %v710_v27 }
 0x2a7   :  { %3733 = vmatmul.mubr.bf16.gmra.mrb[24].mxu0 %v711_v26  ;;  %v5303_v26 = vld [vmem:[#allocation13 + $0x4] ss:$12 sps:$4 sm:$0xff]  }
 0x2a8   :  { %v3706_v15 = vpop.f32.mrb[12].mxu1  ;;  %3749 = vmatpush3.bf16.msra.mxu0 %v4253_v24  ;;  %v4265_v24 = vld [vmem:[#allocation11 + $0xb0] ss:$12 sps:$4 sm:$0xff]   ;;  %1381 = vmatprep.subr.bf16.mxu1 %v5303_v26 }
 0x2a9   :  { %v691_v20 = vpop.f32.mrb[13].mxu1  ;;  %3750 = vmatprep.subr.bf16.mxu0 %v4257_v12 }
 0x2aa   :  { %v3707_v17 = vpop.f32.mrb[14].mxu1 }
 0x2ab   :  { %v713_v22 = vpack.c.bf16 %v3707_v17, %v3706_v15  ;;  %v694_v28 = vpop.f32.mrb[15].mxu1 }
 0x2ac   :  { %v712_v29 = vpack.c.bf16 %v694_v28, %v691_v20  ;;  %3751 = vmatpush3.bf16.msra.mxu0 %v4257_v12  ;;  %v6015_v12 = vmov 0  }
 0x2ad   :  { %3752 = vmatprep.subr.bf16.mxu0 %v4261_v10  ;;  %1075 = vmatprep.mubr.bf16.mxu1 %v6015_v12 }
 0x2ae   :  { %3736 = vmatprep.mubr.bf16.mxu0 %v712_v29 }
 0x2af   :  { %3737 = vmatmul.mubr.bf16.gmra.mrb[28].mxu0 %v713_v22 }
 0x2b0   :  { %3753 = vmatpush3.bf16.msra.mxu0 %v4261_v10 }
 0x2b1   :  { %3754 = vmatprep.subr.bf16.mxu0 %v4265_v24 }
 0x2b4   :  { %3755 = vmatpush3.bf16.msra.mxu0 %v4265_v24 }
 0x2b5   :  { %3772 = vmatprep.subr.bf16.mxu0 %v4269_v25 }
 0x36a   :  { %v3726_v34 = vpop.f32.mrb[16].mxu0 }
 0x36b   :  { %v861_v27 = vadd.f32 %v3726_v34, %v5157_v55  ;;  %v796_v15 = vpop.f32.mrb[17].mxu0 }
 0x36c   :  { %v859_v20 = vadd.f32 %v796_v15, %v5145_v50  ;;  %v3727_v17 = vpop.f32.mrb[18].mxu0 }
 0x36d   :  { %v862_v22 = vadd.f32 %v3727_v17, %v5154_v53  ;;  %v799_v28 = vpop.f32.mrb[19].mxu0  ;;  %v877_v10 = vmax.f32 %v861_v27, 0.0 }
 0x36e   :  { %v860_v29 = vadd.f32 %v5142_v48, %v799_v28  ;;  %v875_v5 = vmax.f32 %v859_v20, 0.0  ;;  %v4271_v20 = vld [vmem:[#allocation13 + $0x18] ss:$12 sps:$4 sm:$0xff]  }
 0x36f   :  { %v878_v24 = vmax.f32 %v862_v22, 0.0  ;;  %v4274_v28 = vld [vmem:[#allocation13 + $0x38] ss:$12 sps:$4 sm:$0xff]  }
 0x370   :  { %v876_v7 = vmax.f32 %v860_v29, 0.0 }
 0x371   :  { %v892_v0 = vpack.c.bf16 %v878_v24, %v877_v10 }
 0x372   :  { %v891_v59 = vpack.c.bf16 %v876_v7, %v875_v5  ;;  %v3730_v61 = vpop.f32.mrb[20].mxu0 }
 0x373   :  { %v865_v54 = vadd.f32 %v3730_v61, %v5185_v1  ;;  %v812_v34 = vpop.f32.mrb[21].mxu0  ;;  %v4278_v61 = vld [vmem:[#allocation13 + $0x34] ss:$12 sps:$4 sm:$0xff]  }
 0x374   :  { %v863_v15 = vadd.f32 %v812_v34, %v5171_v60  ;;  %v3731_v51 = vpop.f32.mrb[22].mxu0  ;;  %1076 = vmatmul.mubr.bf16.vlgmr.msra.gmra.mrb[16].mxu1 %v891_v59  ;;  %3756 = vmatprep.mubr.bf16.mxu0 %v891_v59 }
 0x375   :  { %v866_v17 = vadd.f32 %v3731_v51, %v5182_v63  ;;  %v815_v27 = vpop.f32.mrb[23].mxu0  ;;  %3757 = vmatmul.mubr.bf16.vlgmr.msra.gmra.mrb[32].mxu0 %v892_v0  ;;  %1382 = vmatpush1.bf16.msra.mxu1 %v4266_v2  ;;  %v881_v5 = vmax.f32 %v865_v54, 0.0  ;;  %v4276_v2 = vld [vmem:[#allocation13 + $0x30] ss:$12 sps:$4 sm:$0xff]   ;;  %v4283_v54 = vld [vmem:[#allocation13 + $0x4c] ss:$12 sps:$4 sm:$0xff]  }
 0x376   :  { %v864_v22 = vadd.f32 %v5168_v58, %v815_v27  ;;  %3773 = vmatpush3.bf16.msra.mxu0 %v4269_v25  ;;  %1085 = vmatprep.mubr.bf16.mxu1 %v6015_v12  ;;  %v879_v29 = vmax.f32 %v863_v15, 0.0  ;;  %v4275_v27 = vld [vmem:[#allocation13 + $0x50] ss:$12 sps:$4 sm:$0xff]  }
 0x377   :  { %v882_v7 = vmax.f32 %v866_v17, 0.0  ;;  %3774 = vmatprep.subr.bf16.mxu0 %v4270_v56  ;;  %1383 = vmatprep.subr.bf16.mxu1 %v4273_v49 }
 0x378   :  { %v880_v10 = vmax.f32 %v864_v22, 0.0 }
 0x379   :  { %v5315_v59 = vpack.c.bf16 %v882_v7, %v881_v5  ;;  %1384 = vmatpush1.bf16.msra.mxu1 %v4271_v20  ;;  %v4281_v20 = vld [vmem:[#allocation13 + $0x48] ss:$12 sps:$4 sm:$0xff]  }
 0x37a   :  { %v893_v51 = vpack.c.bf16 %v880_v10, %v879_v29  ;;  %v3734_v24 = vpop.f32.mrb[24].mxu0  ;;  %3775 = vmatpush3.bf16.msra.mxu0 %v4270_v56  ;;  %1385 = vmatprep.subr.bf16.mxu1 %v4278_v61  ;;  %v4279_v7 = vld [vmem:[#allocation13 + $0x68] ss:$12 sps:$4 sm:$0xff]   ;;  %v4288_v29 = vld [vmem:[#allocation13 + $0x64] ss:$12 sps:$4 sm:$0xff]  }
 0x37b   :  { %v869_v25 = vadd.f32 %v3734_v24, %v5213_v11  ;;  %v828_v34 = vpop.f32.mrb[25].mxu0  ;;  %3776 = vmatprep.subr.bf16.mxu0 %v4274_v28 }
 0x37c   :  { %v867_v17 = vadd.f32 %v828_v34, %v5199_v6  ;;  %v3735_v49 = vpop.f32.mrb[26].mxu0  ;;  %1086 = vmatmul.mubr.bf16.gmra.mrb[20].mxu1 %v892_v0  ;;  %3760 = vmatprep.mubr.bf16.mxu0 %v893_v51 }
 0x37d   :  { %v870_v15 = vadd.f32 %v3735_v49, %v5210_v9  ;;  %v831_v22 = vpop.f32.mrb[27].mxu0  ;;  %3761 = vmatmul.mubr.bf16.gmra.mrb[36].mxu0 %v5315_v59  ;;  %1095 = vmatprep.mubr.bf16.mxu1 %v6015_v12  ;;  %v885_v61 = vmax.f32 %v869_v25, 0.0  ;;  %v4286_v9 = vld [vmem:[#allocation13 + $0x60] ss:$12 sps:$4 sm:$0xff]  }
 0x37e   :  { %v868_v56 = vadd.f32 %v5196_v4, %v831_v22  ;;  %3777 = vmatpush3.bf16.msra.mxu0 %v4274_v28  ;;  %1386 = vmatpush1.bf16.msra.mxu1 %v4276_v2  ;;  %v883_v0 = vmax.f32 %v867_v17, 0.0  ;;  %v4280_v28 = vld [vmem:[#allocation13 + $0x80] ss:$12 sps:$4 sm:$0xff]   ;;  %v4291_v2 = vld [vmem:[#allocation13 + $0x7c] ss:$12 sps:$4 sm:$0xff]  }
 0x37f   :  { %v886_v5 = vmax.f32 %v870_v15, 0.0  ;;  %3778 = vmatprep.subr.bf16.mxu0 %v4275_v27  ;;  %1387 = vmatprep.subr.bf16.mxu1 %v4283_v54 }
 0x380   :  { %v884_v10 = vmax.f32 %v868_v56, 0.0  ;;  %v6044_v56 = vmov 0  }
 0x381   :  { %v896_v24 = vpack.c.bf16 %v886_v5, %v885_v61 }
 0x382   :  { %v895_v34 = vpack.c.bf16 %v884_v10, %v883_v0  ;;  %v3738_v49 = vpop.f32.mrb[28].mxu0  ;;  %3779 = vmatpush3.bf16.msra.mxu0 %v4275_v27  ;;  %1388 = vmatpush1.bf16.msra.mxu1 %v4281_v20  ;;  %v4289_v20 = vld [vmem:[#allocation13 + $0x78] ss:$12 sps:$4 sm:$0xff]   ;;  %v4294_v0 = vld [vmem:[#allocation13 + $0x94] ss:$12 sps:$4 sm:$0xff]  }
 0x383   :  { %v873_v12 = vadd.f32 %v3738_v49, %v5241_v21  ;;  %v844_v22 = vpop.f32.mrb[29].mxu0  ;;  %3780 = vmatprep.subr.bf16.mxu0 %v4279_v7  ;;  %1389 = vmatprep.subr.bf16.mxu1 %v4288_v29  ;;  %v4284_v29 = vld [vmem:[#allocation13 + $0x98] ss:$12 sps:$4 sm:$0xff]  }
 0x384   :  { %v871_v25 = vadd.f32 %v844_v22, %v5227_v16  ;;  %v3739_v15 = vpop.f32.mrb[30].mxu0  ;;  %1096 = vmatmul.mubr.bf16.gmra.mrb[24].mxu1 %v893_v51  ;;  %3764 = vmatprep.mubr.bf16.mxu0 %v895_v34 }
 0x385   :  { %v874_v54 = vadd.f32 %v3739_v15, %v5238_v19  ;;  %v847_v17 = vpop.f32.mrb[31].mxu0  ;;  %3765 = vmatmul.mubr.bf16.gmra.mrb[40].mxu0 %v896_v24  ;;  %1105 = vmatprep.mubr.bf16.mxu1 %v6044_v56  ;;  %v889_v61 = vmax.f32 %v873_v12, 0.0  ;;  %v4285_v15 = vld [vmem:[#allocation13 + $0xb0] ss:$12 sps:$4 sm:$0xff]   ;;  %v4295_v12 = vld [vmem:[#allocation13 + $0xa8] ss:$12 sps:$4 sm:$0xff]  }
 0x386   :  { %v872_v27 = vadd.f32 %v5224_v14, %v847_v17  ;;  %3781 = vmatpush3.bf16.msra.mxu0 %v4279_v7  ;;  %1390 = vmatpush1.bf16.msra.mxu1 %v4286_v9  ;;  %v887_v10 = vmax.f32 %v871_v25, 0.0  ;;  %v4292_v19 = vld [vmem:[#allocation13 + $0x90] ss:$12 sps:$4 sm:$0xff]   ;;  %v4297_v9 = vld [vmem:[#allocation13 + $0xac] ss:$12 sps:$4 sm:$0xff]  }
 0x387   :  { %v890_v5 = vmax.f32 %v874_v54, 0.0  ;;  %3782 = vmatprep.subr.bf16.mxu0 %v4280_v28  ;;  %1391 = vmatprep.subr.bf16.mxu1 %v4291_v2  ;;  %v551_v17 = vld [vmem:[%s5992_s8] sm:$0x7] }
 0x388   :  { %v888_v51 = vmax.f32 %v872_v27, 0.0 }
 0x389   :  { %v898_v49 = vpack.c.bf16 %v890_v5, %v889_v61 }
 0x38a   :  { %v897_v22 = vpack.c.bf16 %v888_v51, %v887_v10  ;;  %3783 = vmatpush3.bf16.msra.mxu0 %v4280_v28  ;;  %1392 = vmatpush1.bf16.msra.mxu1 %v4289_v20 }
 0x38b   :  { %3784 = vmatprep.subr.bf16.mxu0 %v4284_v29  ;;  %1393 = vmatprep.subr.bf16.mxu1 %v4294_v0 }
 0x38c   :  { %1106 = vmatmul.mubr.bf16.gmra.mrb[28].mxu1 %v5315_v59  ;;  %3768 = vmatprep.mubr.bf16.mxu0 %v897_v22 }
 0x38d   :  { %3769 = vmatmul.mubr.bf16.gmra.mrb[44].mxu0 %v898_v49  ;;  %1115 = vmatprep.mubr.bf16.mxu1 %v6044_v56 }
 0x38e   :  { %3785 = vmatpush3.bf16.msra.mxu0 %v4284_v29  ;;  %3788 = vmatprep.mubr.bf16.mxu0 %v5152_v52 }
 0x38f   :  { %3786 = vmatprep.subr.bf16.mxu0 %v4285_v15  ;;  %1394 = vmatpush1.bf16.msra.mxu1 %v4292_v19 }
 0x390   :  { %1395 = vmatprep.subr.bf16.mxu1 %v4297_v9 }
 0x392   :  { %3787 = vmatpush3.bf16.msra.mxu0 %v4285_v15 }
 0x393   :  { %1396 = vmatpush1.bf16.msra.mxu1 %v4295_v12 }
 0x394   :  { %1116 = vmatmul.mubr.bf16.gmra.mrb[32].mxu1 %v895_v34  ;;  %2215 = vmatprep.subr.bf16.mxu1 %v5256_v33 }
 0x395   :  { %3789 = vmatmul.mubr.bf16.vlgmr.msra.gmra.mrb[48].mxu0 %v5166_v57  ;;  %1125 = vmatprep.mubr.bf16.mxu1 %v6044_v56 }
 0x396   :  { %3792 = vmatprep.mubr.bf16.mxu0 %v5180_v62 }
 0x39c   :  { %1126 = vmatmul.mubr.bf16.gmra.mrb[36].mxu1 %v896_v24 }
 0x39d   :  { %3793 = vmatmul.mubr.bf16.gmra.mrb[52].mxu0 %v5194_v3  ;;  %1135 = vmatprep.mubr.bf16.mxu1 %v6044_v56 }
 0x39e   :  { %3796 = vmatprep.mubr.bf16.mxu0 %v5208_v8 }
 0x3a4   :  { %1136 = vmatmul.mubr.bf16.gmra.mrb[40].mxu1 %v897_v22 }
 0x3a5   :  { %3797 = vmatmul.mubr.bf16.gmra.mrb[56].mxu0 %v5222_v13  ;;  %1145 = vmatprep.mubr.bf16.mxu1 %v6044_v56 }
 0x3a6   :  { %3800 = vmatprep.mubr.bf16.mxu0 %v5236_v18 }
 0x3ac   :  { %1146 = vmatmul.mubr.bf16.gmra.mrb[44].mxu1 %v898_v49 }
 0x3ad   :  { %3801 = vmatmul.mubr.bf16.gmra.mrb[60].mxu0 %v5250_v23  ;;  %1413 = vmatprep.mubr.bf16.mxu1 %v6044_v56 }
 0x3ae   :  { %3820 = vmatprep.mubr.bf16.mxu0 %v5139_v40 }
 0x3b4   :  { %1414 = vmatmul.mubr.bf16.vlgmr.msra.gmra.mrb[16].mxu1 %v5152_v52 }
 0x3b5   :  { %1423 = vmatprep.mubr.bf16.mxu1 %v6044_v56  ;;  %2216 = vmatpush1.bf16.msra.mxu1 %v5254_v32 }
 0x3b6   :  { %2217 = vmatprep.subr.bf16.mxu1 %v5258_v35 }
 0x3b9   :  { %2218 = vmatpush1.bf16.msra.mxu1 %v5262_v36 }
 0x3ba   :  { %2219 = vmatprep.subr.bf16.mxu1 %v5265_v37 }
 0x3bc   :  { %1424 = vmatmul.mubr.bf16.gmra.mrb[20].mxu1 %v5166_v57 }
 0x3bd   :  { %1433 = vmatprep.mubr.bf16.mxu1 %v6044_v56  ;;  %2220 = vmatpush1.bf16.msra.mxu1 %v5268_v38 }
 0x3be   :  { %2221 = vmatprep.subr.bf16.mxu1 %v5271_v39 }
 0x3c1   :  { %2222 = vmatpush1.bf16.msra.mxu1 %v5274_v41 }
 0x3c2   :  { %2223 = vmatprep.subr.bf16.mxu1 %v5277_v42 }
 0x3c4   :  { %1434 = vmatmul.mubr.bf16.gmra.mrb[24].mxu1 %v5180_v62 }
 0x3c5   :  { %1443 = vmatprep.mubr.bf16.mxu1 %v6044_v56  ;;  %2224 = vmatpush1.bf16.msra.mxu1 %v5280_v43 }
 0x3c6   :  { %2225 = vmatprep.subr.bf16.mxu1 %v5283_v44 }
 0x3c9   :  { %2226 = vmatpush1.bf16.msra.mxu1 %v5286_v45 }
 0x3ca   :  { %2227 = vmatprep.subr.bf16.mxu1 %v5290_v30 }
 0x3cc   :  { %1444 = vmatmul.mubr.bf16.gmra.mrb[28].mxu1 %v5194_v3 }
 0x3cd   :  { %1453 = vmatprep.mubr.bf16.mxu1 %v6044_v56  ;;  %2228 = vmatpush1.bf16.msra.mxu1 %v5292_v31 }
 0x3ce   :  { %2229 = vmatprep.subr.bf16.mxu1 %v5296_v46 }
 0x3d1   :  { %2230 = vmatpush1.bf16.msra.mxu1 %v5298_v47 }
 0x3d2   :  { %2425 = vmatprep.subr.bf16.mxu1 %v5303_v26  ;;  %v358_v26 = vlaneseq }
 0x3d4   :  { %1454 = vmatmul.mubr.bf16.gmra.mrb[32].mxu1 %v5208_v8  ;;  %v5432_v24 = vshrl.u32 %v358_v26, 7 }
 0x3d5   :  { %1463 = vmatprep.mubr.bf16.mxu1 %v6044_v56 }
 0x3d6   :  { %v902_v28 = vsub.s32 0, %v5432_v24  ;;  %v906_v25 = vsub.s32 1, %v5432_v24  ;;  %vm375_vm0 = vcmp.ne.s32.totalorder %v5432_v24, 0 }
 0x3d8   :  { %v5447_v20 = vrot.slane %v551_v17, %v902_v28  ;;  %v5449_v61 = vrot.slane %v551_v17, %v906_v25 }
 0x3dc   :  { %1464 = vmatmul.mubr.bf16.gmra.mrb[36].mxu1 %v5222_v13 }
 0x3dd   :  { %1473 = vmatprep.mubr.bf16.mxu1 %v6044_v56 }
 0x3e4   :  { %1474 = vmatmul.mubr.bf16.gmra.mrb[40].mxu1 %v5236_v18 }
 0x3e5   :  { %1483 = vmatprep.mubr.bf16.mxu1 %v6044_v56 }
 0x3ec   :  { %1484 = vmatmul.mubr.bf16.gmra.mrb[44].mxu1 %v5250_v23 }
 0x3ed   :  { %2247 = vmatprep.mubr.bf16.mxu1 %v6044_v56 }
 0x448   :  { %v5376_v40 = vpop.f32.mrb[32].mxu0 }
 0x449   :  { %v5378_v52 = vpop.f32.mrb[33].mxu0 }
 0x44a   :  { %v5380_v57 = vpop.f32.mrb[34].mxu0 }
 0x44b   :  { %v5382_v62 = vpop.f32.mrb[35].mxu0 }
 0x450   :  { %v5384_v3 = vpop.f32.mrb[36].mxu0 }
 0x451   :  { %v5386_v8 = vpop.f32.mrb[37].mxu0 }
 0x452   :  { %v5388_v13 = vpop.f32.mrb[38].mxu0 }
 0x453   :  { %v5390_v18 = vpop.f32.mrb[39].mxu0 }
 0x458   :  { %v5392_v19 = vpop.f32.mrb[40].mxu0 }
 0x459   :  { %v5394_v23 = vpop.f32.mrb[41].mxu0 }
 0x45a   :  { %v5396_v32 = vpop.f32.mrb[42].mxu0 }
 0x45b   :  { %v5398_v33 = vpop.f32.mrb[43].mxu0 }
 0x460   :  { %v5400_v35 = vpop.f32.mrb[44].mxu0 }
 0x461   :  { %6045 = vst [vmem:[#allocation31_spill] sm:$0xff] %v5400_v35  ;;  %v5402_v36 = vpop.f32.mrb[45].mxu0 }
 0x462   :  { %v5404_v37 = vpop.f32.mrb[46].mxu0 }
 0x463   :  { %6046 = vst [vmem:[#allocation32_spill] sm:$0xff] %v5404_v37  ;;  %v5406_v38 = vpop.f32.mrb[47].mxu0 }
 0x464   :  { %6047 = vst [vmem:[#allocation33_spill] sm:$0xff] %v5406_v38 }
 0x468   :  { %v5408_v39 = vpop.f32.mrb[48].mxu0 }
 0x469   :  { %v5410_v41 = vpop.f32.mrb[49].mxu0 }
 0x46a   :  { %v5412_v42 = vpop.f32.mrb[50].mxu0 }
 0x46b   :  { %v5414_v43 = vpop.f32.mrb[51].mxu0 }
 0x470   :  { %v5416_v44 = vpop.f32.mrb[52].mxu0 }
 0x471   :  { %v5418_v45 = vpop.f32.mrb[53].mxu0 }
 0x472   :  { %v5420_v30 = vpop.f32.mrb[54].mxu0 }
 0x473   :  { %v5422_v31 = vpop.f32.mrb[55].mxu0 }
 0x478   :  { %v5424_v46 = vpop.f32.mrb[56].mxu0 }
 0x479   :  { %v5426_v47 = vpop.f32.mrb[57].mxu0 }
 0x47a   :  { %v5428_v59 = vpop.f32.mrb[58].mxu0 }
 0x47b   :  { %v5430_v7 = vpop.f32.mrb[59].mxu0 }
 0x480   :  { %v5434_v34 = vpop.f32.mrb[60].mxu0 }
 0x481   :  { %6048 = vst [vmem:[#allocation34_spill] sm:$0xff] %v5434_v34  ;;  %v5437_v2 = vpop.f32.mrb[61].mxu0 }
 0x482   :  { %v5440_v54 = vpop.f32.mrb[62].mxu0 }
 0x483   :  { %6049 = vst [vmem:[#allocation35_spill] sm:$0xff] %v5440_v54  ;;  %v5445_v27 = vpop.f32.mrb[63].mxu0 }
 0x487   :  { %v1415_v5 = vpop.f32.mrb[16].mxu1 }
 0x488   :  { %v4071_v29 = vadd.f32 %v1415_v5, %v5447_v20  ;;  %v1417_v0 = vpop.f32.mrb[17].mxu1 }
 0x489   :  { %v4072_v10 = vadd.f32 %v1417_v0, %v5449_v61  ;;  %v1419_v51 = vpop.f32.mrb[18].mxu1 }
 0x48a   :  { %v3350_v49 = vmul.f32 -1.442695, %v4071_v29  ;;  %v4073_v22 = vadd.f32 %v1419_v51, %v5447_v20  ;;  %v1421_v15 = vpop.f32.mrb[19].mxu1 }
 0x48b   :  { %v3366_v9 = vmul.f32 -1.442695, %v4072_v10  ;;  %v4074_v12 = vadd.f32 %v1421_v15, %v5449_v61 }
 0x48c   :  { %4307 = vpow2.f32 %v3350_v49  ;;  %v3351_v26 = vmul.f32 -1.442695, %v4073_v22 }
 0x48d   :  { %4309 = vpow2.f32 %v3366_v9  ;;  %v3367_v28 = vmul.f32 -1.442695, %v4074_v12 }
 0x48e   :  { %4311 = vpow2.f32 %v3351_v26 }
 0x48f   :  { %v1425_v25 = vpop.f32.mrb[20].mxu1  ;;  %4313 = vpow2.f32 %v3367_v28 }
 0x490   :  { %v4075_v56 = vadd.f32 %v1425_v25, %v5447_v20  ;;  %v1427_v5 = vpop.f32.mrb[21].mxu1 }
 0x491   :  { %v4076_v0 = vadd.f32 %v1427_v5, %v5449_v61  ;;  %v1429_v21 = vpop.f32.mrb[22].mxu1 }
 0x492   :  { %v3352_v29 = vmul.f32 -1.442695, %v4075_v56  ;;  %v4077_v51 = vadd.f32 %v1429_v21, %v5447_v20  ;;  %v1431_v14 = vpop.f32.mrb[23].mxu1 }
 0x493   :  { %v4078_v10 = vadd.f32 %v1431_v14, %v5449_v61  ;;  %v3368_v49 = vmul.f32 -1.442695, %v4076_v0 }
 0x494   :  { %4315 = vpow2.f32 %v3352_v29  ;;  %v3353_v22 = vmul.f32 -1.442695, %v4077_v51 }
 0x495   :  { %v3369_v9 = vmul.f32 -1.442695, %v4078_v10 }
 0x496   :  { %v4308_v15 = vpop.eup %4307  ;;  %4317 = vpow2.f32 %v3353_v22  ;;  %v910_v22 = vsub.s32 2, %v5432_v24 }
 0x497   :  { %v4310_v12 = vpop.eup %4309  ;;  %v1655_v26 = vadd.f32 1.0, %v4308_v15  ;;  %v1435_v25 = vpop.f32.mrb[24].mxu1  ;;  %4319 = vpow2.f32 %v3368_v49 }
 0x498   :  { %v4312_v37 = vpop.eup %4311  ;;  %v4079_v28 = vadd.f32 %v1435_v25, %v5447_v20  ;;  %v1437_v5 = vpop.f32.mrb[25].mxu1  ;;  %v1767_v14 = vadd.f32 1.0, %v4310_v12 }
 0x499   :  { %4321 = vrcp.f32 %v1655_v26  ;;  %v1656_v56 = vadd.f32 1.0, %v4312_v37  ;;  %v4080_v21 = vadd.f32 %v1437_v5, %v5449_v61  ;;  %v1439_v16 = vpop.f32.mrb[26].mxu1  ;;  %v4314_v10 = vpop.eup %4313  ;;  %v5464_v5 = vrot.slane %v551_v17, %v910_v22 }
 0x49a   :  { %4323 = vpow2.f32 %v3369_v9  ;;  %v3354_v0 = vmul.f32 -1.442695, %v4079_v28  ;;  %v4081_v29 = vadd.f32 %v1439_v16, %v5447_v20  ;;  %v1441_v51 = vpop.f32.mrb[27].mxu1  ;;  %v1768_v37 = vadd.f32 1.0, %v4314_v10  ;;  %v5469_v9 = vld [vmem:[%s5993_s9] ss:$0 sm:$0xff] }
 0x49b   :  { %4325 = vrcp.f32 %v1656_v56  ;;  %v3370_v15 = vmul.f32 -1.442695, %v4080_v21  ;;  %v4082_v25 = vadd.f32 %v1441_v51, %v5449_v61  ;;  %v1821_v10 = vadd.f32 %v5469_v9, %v5410_v41 }
 0x49c   :  { %v3355_v49 = vmul.f32 -1.442695, %v4081_v29  ;;  %4327 = vpow2.f32 %v3354_v0 }
 0x49d   :  { %4329 = vrcp.f32 %v1767_v14  ;;  %v3371_v56 = vmul.f32 -1.442695, %v4082_v25 }
 0x49e   :  { %v4316_v26 = vpop.eup %4315  ;;  %4331 = vpow2.f32 %v3355_v49 }
 0x49f   :  { %v1657_v16 = vadd.f32 1.0, %v4316_v26  ;;  %v1445_v12 = vpop.f32.mrb[28].mxu1  ;;  %4333 = vpow2.f32 %v3370_v15  ;;  %v1191_v26 = vadd.f32 %v5378_v52, %v5464_v5 }
 0x4a0   :  { %v4318_v28 = vpop.eup %4317  ;;  %v4083_v21 = vadd.f32 %v1445_v12, %v5447_v20  ;;  %v1447_v29 = vpop.f32.mrb[29].mxu1  ;;  %v361_v12 = vadd.s32 16, %v5432_v24 }
 0x4a1   :  { %4335 = vrcp.f32 %v1657_v16  ;;  %v1658_v0 = vadd.f32 1.0, %v4318_v28  ;;  %v4084_v14 = vadd.f32 %v1447_v29, %v5449_v61  ;;  %v1449_v17 = vpop.f32.mrb[30].mxu1  ;;  %v4320_v51 = vpop.eup %4319  ;;  %v1822_v29 = vadd.f32 %v5469_v9, %v5414_v43 }
 0x4a2   :  { %4337 = vrcp.f32 %v1768_v37  ;;  %v3356_v22 = vmul.f32 -1.442695, %v4083_v21  ;;  %v4085_v49 = vadd.f32 %v1449_v17, %v5447_v20  ;;  %v1451_v15 = vpop.f32.mrb[31].mxu1  ;;  %v1194_v21 = vadd.f32 %v5382_v62, %v5464_v5 }
 0x4a3   :  { %v4322_v25 = vpop.eup %4321  ;;  %4339 = vrcp.f32 %v1658_v0  ;;  %v3372_v16 = vmul.f32 -1.442695, %v4084_v14  ;;  %v1769_v17 = vadd.f32 1.0, %v4320_v51  ;;  %v4086_v52 = vadd.f32 %v1451_v15, %v5449_v61 }
 0x4a4   :  { %v4324_v28 = vpop.eup %4323  ;;  %v1837_v54 = vmul.f32 %v4322_v25, %v1821_v10  ;;  %4341 = vpow2.f32 %v3371_v56  ;;  %v3357_v41 = vmul.f32 -1.442695, %v4085_v49  ;;  %vm393_vm1 = vcmp.lt.s32.totalorder %v361_v12, 20 }
 0x4a5   :  { %v4326_v37 = vpop.eup %4325  ;;  %4343 = vpow2.f32 %v3356_v22  ;;  %v1770_v14 = vadd.f32 1.0, %v4324_v28  ;;  %v6026_v15 = vmov 0.0  }
 0x4a6   :  { %v1853_v35 = vadd.f32 %v1837_v54, %v1191_v26  ;;  %v1838_v34 = vmul.f32 %v4326_v37, %v1822_v29  ;;  %4345 = vpow2.f32 %v3372_v16  ;;  %v4328_v0 = vpop.eup %4327  ;;  %v1199_v54 = vadd.f32 %v5376_v40, %v5464_v5 }
 0x4a7   :  { %4347 = vpow2.f32 %v3357_v41  ;;  %v1455_v38 = vpop.f32.mrb[32].mxu1  ;;  %v5485_v43 = vpop.eup %4329  ;;  %v1659_v10 = vadd.f32 1.0, %v4328_v0  ;;  %v5493_v25 = vsel %vm375_vm0, 1.0, %v6026_v15  ;;  %v1202_v40 = vadd.f32 %v5380_v57, %v5464_v5 }
 0x4a8   :  { %4349 = vtanh.f32 %v1853_v35  ;;  %v1854_v56 = vadd.f32 %v1838_v34, %v1194_v21  ;;  %v4087_v49 = vadd.f32 %v1455_v38, %v5447_v20  ;;  %v1457_v62 = vpop.f32.mrb[33].mxu1  ;;  %v4332_v51 = vpop.eup %4331  ;;  %v1823_v35 = vadd.f32 %v5408_v39, %v5469_v9 }
 0x4a9   :  { %4351 = vrcp.f32 %v1769_v17  ;;  %v1459_v22 = vpop.f32.mrb[34].mxu1  ;;  %v4334_v26 = vpop.eup %4333  ;;  %v1660_v34 = vadd.f32 1.0, %v4332_v51  ;;  %v3373_v38 = vmul.f32 -1.442695, %v4086_v52  ;;  %v5501_v41 = vsel %vm393_vm1, 1.0, %v6026_v15 }
 0x4aa   :  { %4353 = vtanh.f32 %v1854_v56  ;;  %v1461_v16 = vpop.f32.mrb[35].mxu1  ;;  %v3358_v29 = vmul.f32 -1.442695, %v4087_v49  ;;  %v1824_v37 = vadd.f32 %v5412_v42, %v5469_v9  ;;  %v4088_v39 = vadd.f32 %v1457_v62, %v5449_v61 }
 0x4ab   :  { %v4336_v28 = vpop.eup %4335  ;;  %4355 = vrcp.f32 %v1659_v10  ;;  %v5508_v52 = vadd.f32 %v5384_v3, %v5464_v5  ;;  %v1207_v57 = vadd.f32 %v5386_v8, %v5464_v5  ;;  %v1771_v0 = vadd.f32 1.0, %v4334_v26 }
 0x4ac   :  { %v4338_v24 = vpop.eup %4337  ;;  %v1839_v21 = vmul.f32 %v4336_v28, %v1823_v35  ;;  %4357 = vrcp.f32 %v1770_v14  ;;  %v5514_v56 = vadd.f32 %v5388_v13, %v5464_v5  ;;  %v5518_v49 = vadd.f32 %v5390_v18, %v5464_v5 }
 0x4ad   :  { %v4340_v17 = vpop.eup %4339  ;;  %4359 = vrcp.f32 %v1660_v34  ;;  %v1825_v3 = vadd.f32 %v5469_v9, %v5418_v45  ;;  %v4089_v8 = vadd.f32 %v1459_v22, %v5447_v20  ;;  %v3374_v35 = vmul.f32 -1.442695, %v4088_v39 }
 0x4ae   :  { %v4342_v12 = vpop.eup %4341  ;;  %v1855_v42 = vadd.f32 %v1839_v21, %v1199_v54  ;;  %v1840_v10 = vmul.f32 %v4340_v17, %v1824_v37  ;;  %4361 = vpow2.f32 %v3373_v38  ;;  %v1885_v18 = vsub.f32 1.0, %v5485_v43 }
 0x4af   :  { %v4344_v14 = vpop.eup %4343  ;;  %4363 = vpow2.f32 %v3358_v29  ;;  %v1465_v62 = vpop.f32.mrb[36].mxu1  ;;  %v6050_v37 = vmax.f32 %v5145_v50, 0.0  ;;  %v1772_v22 = vadd.f32 1.0, %v4342_v12 }
 0x4b0   :  { %v4346_v51 = vpop.eup %4345  ;;  %4365 = vtanh.f32 %v1855_v42  ;;  %v1856_v26 = vadd.f32 %v1840_v10, %v1202_v40  ;;  %v1661_v13 = vadd.f32 1.0, %v4344_v14  ;;  %v1467_v54 = vpop.f32.mrb[37].mxu1  ;;  %v4091_v38 = vadd.f32 %v1465_v62, %v5447_v20 }
 0x4b1   :  { %v4348_v34 = vpop.eup %4347  ;;  %4367 = vrcp.f32 %v1771_v0  ;;  %v1469_v28 = vpop.f32.mrb[38].mxu1  ;;  %v1917_v45 = vmul.f32 %v5485_v43, %v6050_v37  ;;  %v4090_v40 = vadd.f32 %v1461_v16, %v5449_v61  ;;  %v3359_v42 = vmul.f32 -1.442695, %v4089_v8 }
 0x4b2   :  { %v4350_v29 = vpop.eup %4349  ;;  %4369 = vtanh.f32 %v1856_v26  ;;  %v1662_v21 = vadd.f32 1.0, %v4348_v34  ;;  %v1471_v17 = vpop.f32.mrb[39].mxu1  ;;  %v1886_v0 = vsub.f32 1.0, %v4338_v24  ;;  %v1826_v62 = vadd.f32 %v5469_v9, %v5422_v31 }
 0x4b3   :  { %v4352_v39 = vpop.eup %4351  ;;  %4371 = vrcp.f32 %v1661_v13  ;;  %v1901_v10 = vmul.f32 %v4350_v29, %v1885_v18  ;;  %v1773_v15 = vadd.f32 1.0, %v4346_v51  ;;  %v6051_v43 = vmax.f32 %v5142_v48, 0.0 }
 0x4b4   :  { %v4354_v14 = vpop.eup %4353  ;;  %4373 = vpow2.f32 %v3374_v35  ;;  %v3360_v12 = vmul.f32 -1.442695, %v4091_v38  ;;  %v3375_v8 = vmul.f32 -1.442695, %v4090_v40  ;;  %v4092_v13 = vadd.f32 %v1467_v54, %v5449_v61 }
 0x4b5   :  { %v1918_v37 = vmul.f32 %v4338_v24, %v6051_v43  ;;  %v4356_v26 = vpop.eup %4355  ;;  %4375 = vrcp.f32 %v1662_v21  ;;  %v1902_v34 = vmul.f32 %v4354_v14, %v1886_v0  ;;  %v1933_v16 = vadd.f32 %v1917_v45, %v1901_v10 }
 0x4b6   :  { %v4358_v50 = vpop.eup %4357  ;;  %v1841_v11 = vmul.f32 %v4356_v26, %v1825_v3  ;;  %4377 = vrcp.f32 %v1772_v22  ;;  %v4093_v31 = vadd.f32 %v1469_v28, %v5447_v20  ;;  %v1827_v38 = vadd.f32 %v5416_v44, %v5469_v9 }
 0x4b7   :  { %v4360_v18 = vpop.eup %4359  ;;  %4379 = vpow2.f32 %v3359_v42  ;;  %v1475_v51 = vpop.f32.mrb[40].mxu1  ;;  %v5535_v35 = vadd.f32 %v1918_v37, %v1902_v34  ;;  %v5538_v24 = vmul.f32 %v5493_v25, %v1933_v16  ;;  %v1887_v42 = vsub.f32 1.0, %v4352_v39 }
 0x4b8   :  { %v4362_v29 = vpop.eup %4361  ;;  %v1857_v45 = vadd.f32 %v1841_v11, %v1207_v57  ;;  %v1842_v3 = vmul.f32 %v4360_v18, %v1826_v62  ;;  %4381 = vrcp.f32 %v1773_v15  ;;  %v1477_v22 = vpop.f32.mrb[41].mxu1  ;;  %v4095_v54 = vadd.f32 %v1475_v51, %v5447_v20 }
 0x4b9   :  { %v4364_v21 = vpop.eup %4363  ;;  %4383 = vpow2.f32 %v3360_v12  ;;  %v1479_v40 = vpop.f32.mrb[42].mxu1  ;;  %v5545_v28 = vpack.c.bf16 %v5535_v35, %v5538_v24  ;;  %v3376_v44 = vmul.f32 -1.442695, %v4092_v13  ;;  %v3361_v15 = vmul.f32 -1.442695, %v4093_v31 }
 0x4ba   :  { %v4366_v0 = vpop.eup %4365  ;;  %4385 = vtanh.f32 %v1857_v45  ;;  %v1858_v10 = vadd.f32 %v1842_v3, %v5518_v49  ;;  %v1663_v14 = vadd.f32 1.0, %v4364_v21  ;;  %v1481_v11 = vpop.f32.mrb[43].mxu1  ;;  %v4094_v62 = vadd.f32 %v1471_v17, %v5449_v61 }
 0x4bb   :  { %v4368_v57 = vpop.eup %4367  ;;  %4387 = vpow2.f32 %v3375_v8  ;;  %3804 = vmatprep.subr.bf16.mxu0 %v5545_v28  ;;  %v1888_v43 = vsub.f32 1.0, %v4358_v50  ;;  %v1774_v26 = vadd.f32 1.0, %v4362_v29  ;;  %v1903_v12 = vmul.f32 %v4366_v0, %v1887_v42 }
 0x4bc   :  { %v4370_v37 = vpop.eup %4369  ;;  %4389 = vtanh.f32 %v1858_v10  ;;  %3805 = vmatpush3.bf16.msra.mxu0 %v5545_v28  ;;  %v6052_v34 = vmax.f32 %v5157_v55, 0.0  ;;  %v3362_v13 = vmul.f32 -1.442695, %v4095_v54  ;;  %v6053_v8 = vmax.f32 %v5154_v53, 0.0 }
 0x4bd   :  { %v4372_v16 = vpop.eup %4371  ;;  %4391 = vrcp.f32 %v1663_v14  ;;  %v1904_v18 = vmul.f32 %v4370_v37, %v1888_v43  ;;  %v1828_v51 = vadd.f32 %v5420_v30, %v5469_v9  ;;  %v3377_v21 = vmul.f32 -1.442695, %v4094_v62 }
 0x4be   :  { %v1919_v49 = vmul.f32 %v4352_v39, %v6052_v34  ;;  %v1920_v31 = vmul.f32 %v4358_v50, %v6053_v8  ;;  %v4374_v17 = vpop.eup %4373  ;;  %v1843_v45 = vmul.f32 %v4372_v16, %v1827_v38  ;;  %4393 = vpow2.f32 %v3376_v44 }
 0x4bf   :  { %v4376_v3 = vpop.eup %4375  ;;  %4395 = vpow2.f32 %v3361_v15  ;;  %v4096_v42 = vadd.f32 %v1477_v22, %v5449_v61  ;;  %v1485_v39 = vpop.f32.mrb[44].mxu1  ;;  %v1889_v43 = vsub.f32 1.0, %v4368_v57  ;;  %v1775_v34 = vadd.f32 1.0, %v4374_v17 }
 0x4c0   :  { %v1935_v29 = vadd.f32 %v1919_v49, %v1903_v12  ;;  %v1936_v0 = vadd.f32 %v1920_v31, %v1904_v18  ;;  %v4378_v10 = vpop.eup %4377  ;;  %v1859_v54 = vadd.f32 %v1843_v45, %v5508_v52  ;;  %v1844_v14 = vmul.f32 %v4376_v3, %v1828_v51  ;;  %v1487_v50 = vpop.f32.mrb[45].mxu1 }
 0x4c1   :  { %4397 = vrcp.f32 %v1774_v26  ;;  %v4380_v37 = vpop.eup %4379  ;;  %v4097_v30 = vadd.f32 %v1479_v40, %v5447_v20  ;;  %v1489_v38 = vpop.f32.mrb[46].mxu1  ;;  %v3378_v49 = vmul.f32 -1.442695, %v4096_v42  ;;  %v4099_v16 = vadd.f32 %v1485_v39, %v5447_v20 }
 0x4c2   :  { %4399 = vpow2.f32 %v3362_v13  ;;  %v5560_v44 = vmul.f32 0.0, %v1936_v0  ;;  %v4382_v15 = vpop.eup %4381  ;;  %v1860_v22 = vadd.f32 %v1844_v14, %v5514_v56  ;;  %v1664_v62 = vadd.f32 1.0, %v4380_v37  ;;  %v5563_v12 = vpop.f32.mrb[47].mxu1 }
 0x4c3   :  { %4401 = vtanh.f32 %v1859_v54  ;;  %v5566_v52 = vmul.f32 %v5501_v41, %v1935_v29  ;;  %v4384_v26 = vpop.eup %4383  ;;  %v1890_v13 = vsub.f32 1.0, %v4378_v10  ;;  %v4098_v8 = vadd.f32 %v1481_v11, %v5449_v61 }
 0x4c4   :  { %4403 = vpow2.f32 %v3377_v21  ;;  %v4386_v40 = vpop.eup %4385  ;;  %v1665_v18 = vadd.f32 1.0, %v4384_v26  ;;  %v3363_v17 = vmul.f32 -1.442695, %v4097_v30  ;;  %v6054_v45 = vmax.f32 %v5171_v60, 0.0 }
 0x4c5   :  { %4405 = vtanh.f32 %v1860_v22  ;;  %v5572_v56 = vpack.c.bf16 %v5560_v44, %v5566_v52  ;;  %v4388_v31 = vpop.eup %4387  ;;  %v1905_v51 = vmul.f32 %v4386_v40, %v1889_v43  ;;  %v1829_v21 = vadd.f32 %v5469_v9, %v5426_v47 }
 0x4c6   :  { %4407 = vrcp.f32 %v1664_v62  ;;  %v1921_v29 = vmul.f32 %v4368_v57, %v6054_v45  ;;  %v4390_v3 = vpop.eup %4389  ;;  %v6055_v11 = vmax.f32 %v5168_v58, 0.0  ;;  %v3364_v0 = vmul.f32 -1.442695, %v4099_v16 }
 0x4c7   :  { %4409 = vrcp.f32 %v1775_v34  ;;  %3806 = vmatprep.subr.bf16.mxu0 %v5572_v56  ;;  %v4392_v39 = vpop.eup %4391  ;;  %v1906_v54 = vmul.f32 %v4390_v3, %v1890_v13  ;;  %v1223_v57 = vadd.f32 %v5394_v23, %v5464_v5  ;;  %v1226_v47 = vadd.f32 %v5398_v33, %v5464_v5 }
 0x4c8   :  { %v1922_v42 = vmul.f32 %v4378_v10, %v6055_v11  ;;  %4411 = vrcp.f32 %v1665_v18  ;;  %3807 = vmatpush3.bf16.msra.mxu0 %v5572_v56  ;;  %v1937_v14 = vadd.f32 %v1921_v29, %v1905_v51  ;;  %v4394_v43 = vpop.eup %4393  ;;  %v1845_v37 = vmul.f32 %v4392_v39, %v1829_v21 }
 0x4c9   :  { %4413 = vpow2.f32 %v3378_v49  ;;  %v4396_v34 = vpop.eup %4395  ;;  %v3379_v30 = vmul.f32 -1.442695, %v4098_v8  ;;  %v4100_v10 = vadd.f32 %v1487_v50, %v5449_v61  ;;  %v1776_v16 = vadd.f32 1.0, %v4388_v31 }
 0x4ca   :  { %4415 = vpow2.f32 %v3363_v17  ;;  %v1938_v22 = vadd.f32 %v1922_v42, %v1906_v54  ;;  %v1861_v26 = vadd.f32 %v1845_v37, %v1223_v57  ;;  %v1666_v13 = vadd.f32 1.0, %v4396_v34 }
 0x4cb   :  { %v4398_v62 = vpop.eup %4397  ;;  %v4101_v40 = vadd.f32 %v1489_v38, %v5447_v20  ;;  %4417 = vpow2.f32 %v3364_v0  ;;  %v5588_v23 = vmul.f32 0.0, %v1937_v14  ;;  %v1891_v33 = vsub.f32 1.0, %v4382_v15 }
 0x4cc   :  { %v4400_v18 = vpop.eup %4399  ;;  %v5590_v51 = vmul.f32 0.0, %v1938_v22  ;;  %4419 = vtanh.f32 %v1861_v26  ;;  %v1777_v17 = vadd.f32 1.0, %v4394_v43  ;;  %v6056_v50 = vmax.f32 %v5185_v1, 0.0 }
 0x4cd   :  { %v4402_v49 = vpop.eup %4401  ;;  %v1667_v8 = vadd.f32 1.0, %v4400_v18  ;;  %4421 = vrcp.f32 %v1666_v13  ;;  %v1892_v38 = vsub.f32 1.0, %v4398_v62  ;;  %v1830_v11 = vadd.f32 %v5469_v9, %v5430_v7 }
 0x4ce   :  { %v1923_v45 = vmul.f32 %v4382_v15, %v6056_v50  ;;  %v4404_v29 = vpop.eup %4403  ;;  %v5596_v31 = vpack.c.bf16 %v5590_v51, %v5588_v23  ;;  %v1907_v3 = vmul.f32 %v4402_v49, %v1891_v33  ;;  %4423 = vrcp.f32 %v1776_v16 }
 0x4cf   :  { %v4406_v21 = vpop.eup %4405  ;;  %v3380_v42 = vmul.f32 -1.442695, %v4100_v10  ;;  %v3365_v39 = vmul.f32 -1.442695, %v4101_v40  ;;  %4425 = vrcp.f32 %v1667_v8  ;;  %v6057_v54 = vmax.f32 %v5182_v63, 0.0 }
 0x4d0   :  { %v4408_v0 = vpop.eup %4407  ;;  %3808 = vmatprep.subr.bf16.mxu0 %v5596_v31  ;;  %v1908_v15 = vmul.f32 %v4406_v21, %v1892_v38  ;;  %v1939_v43 = vadd.f32 %v1923_v45, %v1907_v3  ;;  %v1831_v37 = vadd.f32 %v5424_v46, %v5469_v9  ;;  %4427 = vrcp.f32 %v1777_v17 }
 0x4d1   :  { %v1924_v14 = vmul.f32 %v4398_v62, %v6057_v54  ;;  %v4410_v57 = vpop.eup %4409  ;;  %v1846_v34 = vmul.f32 %v4408_v0, %v1830_v11  ;;  %v4102_v7 = vadd.f32 %v5563_v12, %v5449_v61  ;;  %3809 = vmatpush3.bf16.msra.mxu0 %v5596_v31  ;;  %v1778_v22 = vadd.f32 1.0, %v4404_v29 }
 0x4d2   :  { %v4412_v10 = vpop.eup %4411  ;;  %4429 = vpow2.f32 %v3379_v30  ;;  %v1231_v62 = vadd.f32 %v5392_v19, %v5464_v5  ;;  %v5610_v46 = vmul.f32 0.0, %v1939_v43  ;;  %v1893_v19 = vsub.f32 1.0, %v4410_v57 }
 0x4d3   :  { %v1940_v26 = vadd.f32 %v1924_v14, %v1908_v15  ;;  %v4414_v16 = vpop.eup %4413  ;;  %v1862_v13 = vadd.f32 %v1846_v34, %v1226_v47  ;;  %v1847_v40 = vmul.f32 %v4412_v10, %v1831_v37  ;;  %4431 = vpow2.f32 %v3365_v39 }
 0x4d4   :  { %v4416_v18 = vpop.eup %4415  ;;  %4433 = vpow2.f32 %v3380_v42  ;;  %v3381_v17 = vmul.f32 -1.442695, %v4102_v7  ;;  %v1832_v50 = vadd.f32 %v5428_v59, %v5469_v9  ;;  %v1779_v45 = vadd.f32 1.0, %v4414_v16 }
 0x4d5   :  { %v5612_v33 = vmul.f32 0.0, %v1940_v26  ;;  %4435 = vtanh.f32 %v1862_v13  ;;  %v1863_v12 = vadd.f32 %v1847_v40, %v1231_v62  ;;  %v1668_v49 = vadd.f32 1.0, %v4416_v18  ;;  %v4418_v8 = vpop.eup %4417 }
 0x4d6   :  { %4437 = vrcp.f32 %v1778_v22  ;;  %v4420_v47 = vpop.eup %4419  ;;  %v1669_v29 = vadd.f32 1.0, %v4418_v8  ;;  %v6058_v21 = vmax.f32 %v5199_v6, 0.0  ;;  %v1234_v39 = vadd.f32 %v5396_v32, %v5464_v5 }
 0x4d7   :  { %v5616_v30 = vpack.c.bf16 %v5612_v33, %v5610_v46  ;;  %4439 = vtanh.f32 %v1863_v12  ;;  %v4422_v38 = vpop.eup %4421  ;;  %v1909_v3 = vmul.f32 %v4420_v47, %v1893_v19  ;;  %v1833_v0 = vadd.f32 %v5469_v9, %v5437_v2 }
 0x4d8   :  { %4441 = vrcp.f32 %v1668_v49  ;;  %v1925_v11 = vmul.f32 %v4410_v57, %v6058_v21  ;;  %v4424_v42 = vpop.eup %4423  ;;  %v1848_v15 = vmul.f32 %v4422_v38, %v1832_v50  ;;  %v1239_v43 = vadd.f32 %v5402_v36, %v5464_v5  ;;  %v6060_v50 = vld [vmem:[#allocation26_spill] sm:$0xff] }
 0x4d9   :  { %3810 = vmatprep.subr.bf16.mxu0 %v5616_v30  ;;  %4443 = vpow2.f32 %v3381_v17  ;;  %v4426_v59 = vpop.eup %4425  ;;  %v1894_v22 = vsub.f32 1.0, %v4424_v42  ;;  %v6059_v40 = vmax.f32 %v5196_v4, 0.0  ;;  %v1834_v49 = vadd.f32 %v5469_v9, %v5445_v27 }
 0x4da   :  { %3811 = vmatpush3.bf16.msra.mxu0 %v5616_v30  ;;  %4445 = vrcp.f32 %v1669_v29  ;;  %v1941_v54 = vadd.f32 %v1925_v11, %v1909_v3  ;;  %v4428_v14 = vpop.eup %4427  ;;  %v1864_v37 = vadd.f32 %v1848_v15, %v1234_v39  ;;  %v1849_v57 = vmul.f32 %v4426_v59, %v1833_v0  ;;  %v6062_v3 = vld [vmem:[#allocation33_spill] sm:$0xff]  ;;  %v6063_v11 = vld [vmem:[#allocation34_spill] sm:$0xff] }
 0x4db   :  { %4447 = vrcp.f32 %v1779_v45  ;;  %v1926_v18 = vmul.f32 %v4424_v42, %v6059_v40  ;;  %v1895_v12 = vsub.f32 1.0, %v4428_v14  ;;  %v6061_v45 = vmax.f32 %v6060_v50, 0.0 }
 0x4dc   :  { %v4430_v34 = vpop.eup %4429  ;;  %4449 = vtanh.f32 %v1864_v37  ;;  %v1865_v32 = vadd.f32 %v1849_v57, %v1239_v43  ;;  %v1242_v21 = vadd.f32 %v6062_v3, %v5464_v5  ;;  %v1835_v42 = vadd.f32 %v6063_v11, %v5469_v9  ;;  %v6064_v37 = vld [vmem:[#allocation31_spill] sm:$0xff] }
 0x4dd   :  { %v4432_v7 = vpop.eup %4431  ;;  %v1780_v16 = vadd.f32 1.0, %v4430_v34  ;;  %v1927_v29 = vmul.f32 %v4428_v14, %v6061_v45  ;;  %v5640_v15 = vmul.f32 0.0, %v1941_v54  ;;  %v1247_v57 = vadd.f32 %v6064_v37, %v5464_v5 }
 0x4de   :  { %v4434_v10 = vpop.eup %4433  ;;  %v1670_v2 = vadd.f32 1.0, %v4432_v7  ;;  %4451 = vtanh.f32 %v1865_v32 }
 0x4df   :  { %v4436_v26 = vpop.eup %4435  ;;  %v1781_v17 = vadd.f32 1.0, %v4434_v10 }
 0x4e0   :  { %v4438_v62 = vpop.eup %4437  ;;  %v1910_v13 = vmul.f32 %v4436_v26, %v1894_v22  ;;  %4453 = vrcp.f32 %v1670_v2  ;;  %v6065_v26 = vld [vmem:[#allocation25_spill] sm:$0xff] }
 0x4e1   :  { %v4440_v36 = vpop.eup %4439  ;;  %4455 = vrcp.f32 %v1780_v16  ;;  %v1896_v32 = vsub.f32 1.0, %v4438_v62  ;;  %v6066_v16 = vmax.f32 %v6065_v26, 0.0 }
 0x4e2   :  { %v4442_v8 = vpop.eup %4441  ;;  %v1942_v19 = vadd.f32 %v1926_v18, %v1910_v13  ;;  %v1911_v47 = vmul.f32 %v4440_v36, %v1895_v12  ;;  %4457 = vrcp.f32 %v1781_v17  ;;  %v6067_v12 = vld [vmem:[#allocation35_spill] sm:$0xff] }
 0x4e3   :  { %v4444_v38 = vpop.eup %4443  ;;  %v1850_v39 = vmul.f32 %v4442_v8, %v1834_v49  ;;  %v1928_v13 = vmul.f32 %v4438_v62, %v6066_v16  ;;  %v1836_v36 = vadd.f32 %v6067_v12, %v5469_v9  ;;  %v6068_v8 = vld [vmem:[#allocation28_spill] sm:$0xff] }
 0x4e4   :  { %v4446_v0 = vpop.eup %4445  ;;  %v5642_v27 = vmul.f32 0.0, %v1942_v19  ;;  %v1943_v59 = vadd.f32 %v1927_v29, %v1911_v47  ;;  %v1782_v54 = vadd.f32 1.0, %v4444_v38  ;;  %v6069_v19 = vmax.f32 %v6068_v8, 0.0  ;;  %v6070_v29 = vld [vmem:[#allocation32_spill] sm:$0xff] }
 0x4e5   :  { %v4448_v43 = vpop.eup %4447  ;;  %v1866_v14 = vadd.f32 %v1850_v39, %v1242_v21  ;;  %v1851_v34 = vmul.f32 %v4446_v0, %v1835_v42  ;;  %v1250_v38 = vadd.f32 %v6070_v29, %v5464_v5 }
 0x4e6   :  { %v5648_v7 = vpack.c.bf16 %v5642_v27, %v5640_v15  ;;  %v4450_v10 = vpop.eup %4449  ;;  %v1897_v40 = vsub.f32 1.0, %v4448_v43  ;;  %v1929_v47 = vmul.f32 %v4448_v43, %v6069_v19  ;;  %v5660_v62 = vmul.f32 0.0, %v1943_v59  ;;  %v6073_v59 = vld [vmem:[#allocation27_spill] sm:$0xff] }
 0x4e7   :  { %4459 = vtanh.f32 %v1866_v14  ;;  %v1867_v2 = vadd.f32 %v1851_v34, %v1247_v57  ;;  %v1912_v22 = vmul.f32 %v4450_v10, %v1896_v32  ;;  %v6074_v14 = vmax.f32 %v6073_v59, 0.0 }
 0x4e8   :  { %3812 = vmatprep.subr.bf16.mxu0 %v5648_v7  ;;  %v4452_v18 = vpop.eup %4451  ;;  %6071 = vst [vmem:[#allocation26_spill] sm:$0xff] %v5660_v62 }
 0x4e9   :  { %4461 = vtanh.f32 %v1867_v2  ;;  %3813 = vmatpush3.bf16.msra.mxu0 %v5648_v7  ;;  %v1944_v49 = vadd.f32 %v1928_v13, %v1912_v22  ;;  %v1913_v17 = vmul.f32 %v4452_v18, %v1897_v40  ;;  %v6075_v22 = vld [vmem:[#allocation30_spill] sm:$0xff] }
 0x4ea   :  { %v4454_v45 = vpop.eup %4453  ;;  %4463 = vrcp.f32 %v1782_v54  ;;  %v6076_v16 = vmax.f32 %v6075_v22, 0.0 }
 0x4eb   :  { %v1852_v3 = vmul.f32 %v4454_v45, %v1836_v36  ;;  %v5662_v21 = vmul.f32 0.0, %v1944_v49  ;;  %v1945_v11 = vadd.f32 %v1929_v47, %v1913_v17  ;;  %v4456_v42 = vpop.eup %4455  ;;  %v6079_v45 = vld [vmem:[#allocation29_spill] sm:$0xff] }
 0x4ec   :  { %v4458_v0 = vpop.eup %4457  ;;  %v1898_v43 = vsub.f32 1.0, %v4456_v42  ;;  %v1930_v34 = vmul.f32 %v4456_v42, %v6074_v14  ;;  %v6080_v29 = vmax.f32 %v6079_v45, 0.0  ;;  %v4631_v14 = vld [vmem:[#allocation10 + $0x10] sm:$0xff]  }
 0x4ed   :  { %6072 = vst [vmem:[#allocation33_spill] sm:$0xff] %v5662_v21  ;;  %v1868_v39 = vadd.f32 %v1852_v3, %v1250_v38  ;;  %v5666_v9 = vpack.c.bf16 %v5662_v21, %v5660_v62  ;;  %v1899_v32 = vsub.f32 1.0, %v4458_v0  ;;  %v1931_v13 = vmul.f32 %v4458_v0, %v6076_v16  ;;  %v4627_v0 = vld [vmem:[#allocation10] sm:$0xff]   ;;  %v4637_v16 = vld [vmem:[#allocation7 + $0x30] sm:$0xff]   ;;  %v3075_v62 = vld [vmem:[#allocation14 + $0x68] sm:$0xff] }
 0x4ee   :  { %v5674_v18 = vmul.f32 0.0, %v1945_v11 }
 0x4ef   :  { %4465 = vtanh.f32 %v1868_v39  ;;  %3814 = vmatprep.subr.bf16.mxu0 %v5666_v9 }
 0x4f0   :  { %3815 = vmatpush3.bf16.msra.mxu0 %v5666_v9  ;;  %6077 = vst [vmem:[#allocation34_spill] sm:$0xff] %v5674_v18 }
 0x4f1   :  { %v4460_v37 = vpop.eup %4459 }
 0x4f2   :  { %v1914_v57 = vmul.f32 %v4460_v37, %v1898_v43  ;;  %v4628_v43 = vld [vmem:[#allocation7 + $0x8] sm:$0xff]   ;;  %v4629_v37 = vld [vmem:[#allocation7 + $0x10] sm:$0xff]  }
 0x4f3   :  { %v4462_v10 = vpop.eup %4461 }
 0x4f4   :  { %v1946_v2 = vadd.f32 %v1930_v34, %v1914_v57  ;;  %v1915_v54 = vmul.f32 %v4462_v10, %v1899_v32  ;;  %v4464_v40 = vpop.eup %4463  ;;  %v4630_v57 = vld [vmem:[#allocation10 + $0x8] sm:$0xff]   ;;  %v4632_v34 = vld [vmem:[#allocation7 + $0x18] sm:$0xff]   ;;  %v4633_v32 = vld [vmem:[#allocation7 + $0x20] sm:$0xff]  }
 0x4f5   :  { %v1900_v17 = vsub.f32 1.0, %v4464_v40  ;;  %v1932_v38 = vmul.f32 %v4464_v40, %v6080_v29  ;;  %v4634_v10 = vld [vmem:[#allocation10 + $0x18] sm:$0xff]   ;;  %v4639_v40 = vld [vmem:[#allocation10 + $0x30] sm:$0xff]  }
 0x4f6   :  { %v5676_v12 = vmul.f32 0.0, %v1946_v2  ;;  %v1947_v36 = vadd.f32 %v1931_v13, %v1915_v54  ;;  %v4635_v2 = vld [vmem:[#allocation10 + $0x20] sm:$0xff]   ;;  %v4636_v54 = vld [vmem:[#allocation7 + $0x28] sm:$0xff]  }
 0x4f7   :  { %v4638_v13 = vld [vmem:[#allocation10 + $0x28] sm:$0xff]  }
 0x4f8   :  { %6078 = vst [vmem:[#allocation31_spill] sm:$0xff] %v5676_v12  ;;  %v5680_v49 = vpack.c.bf16 %v5676_v12, %v5674_v18  ;;  %v5686_v11 = vmul.f32 0.0, %v1947_v36  ;;  %v4640_v36 = vld [vmem:[#allocation7 + $0x38] sm:$0xff]  }
 0x4f9   :  { %v4466_v19 = vpop.eup %4465 }
 0x4fa   :  { %3816 = vmatprep.subr.bf16.mxu0 %v5680_v49  ;;  %v1916_v47 = vmul.f32 %v4466_v19, %v1900_v17  ;;  %6081 = vst [vmem:[#allocation25_spill] sm:$0xff] %v5686_v11  ;;  %v4641_v17 = vld [vmem:[#allocation10 + $0x38] sm:$0xff]   ;;  %v4642_v19 = vld [vmem:[#allocation11 + $0x8] ss:$12 sps:$4 sm:$0xff]  }
 0x4fb   :  { %3817 = vmatpush3.bf16.msra.mxu0 %v5680_v49 }
 0x4fc   :  { %v1948_v3 = vadd.f32 %v1932_v38, %v1916_v47 }
 0x4fe   :  { %v5688_v42 = vmul.f32 0.0, %v1948_v3 }
 0x500   :  { %6082 = vst [vmem:[#allocation35_spill] sm:$0xff] %v5688_v42  ;;  %v5692_v39 = vpack.c.bf16 %v5688_v42, %v5686_v11 }
 0x502   :  { %3818 = vmatprep.subr.bf16.mxu0 %v5692_v39 }
 0x503   :  { %3819 = vmatpush3.bf16.msra.mxu0 %v5692_v39 }
 0x504   :  { %3836 = vmatprep.subr.bf16.mxu0 %v4627_v0 }
 0x506   :  { %3821 = vmatmul.mubr.bf16.vlgmr.msra.gmra.mrb[64].mxu0 %v4628_v43 }
 0x507   :  { %3824 = vmatprep.mubr.bf16.mxu0 %v4629_v37  ;;  %3837 = vmatpush3.bf16.msra.mxu0 %v4627_v0 }
 0x508   :  { %3838 = vmatprep.subr.bf16.mxu0 %v4630_v57 }
 0x50b   :  { %3839 = vmatpush3.bf16.msra.mxu0 %v4630_v57 }
 0x50c   :  { %3840 = vmatprep.subr.bf16.mxu0 %v4631_v14 }
 0x50e   :  { %3825 = vmatmul.mubr.bf16.gmra.mrb[68].mxu0 %v4632_v34 }
 0x50f   :  { %3828 = vmatprep.mubr.bf16.mxu0 %v4633_v32  ;;  %3841 = vmatpush3.bf16.msra.mxu0 %v4631_v14  ;;  %v4643_v14 = vld [vmem:[#allocation11 + $0x20] ss:$12 sps:$4 sm:$0xff]  }
 0x510   :  { %3842 = vmatprep.subr.bf16.mxu0 %v4634_v10 }
 0x513   :  { %3843 = vmatpush3.bf16.msra.mxu0 %v4634_v10 }
 0x514   :  { %3844 = vmatprep.subr.bf16.mxu0 %v4635_v2 }
 0x516   :  { %3829 = vmatmul.mubr.bf16.gmra.mrb[72].mxu0 %v4636_v54  ;;  %v4644_v54 = vld [vmem:[#allocation11 + $0x38] ss:$12 sps:$4 sm:$0xff]  }
 0x517   :  { %3832 = vmatprep.mubr.bf16.mxu0 %v4637_v16  ;;  %3845 = vmatpush3.bf16.msra.mxu0 %v4635_v2 }
 0x518   :  { %3846 = vmatprep.subr.bf16.mxu0 %v4638_v13 }
 0x51b   :  { %3847 = vmatpush3.bf16.msra.mxu0 %v4638_v13 }
 0x51c   :  { %3848 = vmatprep.subr.bf16.mxu0 %v4639_v40 }
 0x51e   :  { %3833 = vmatmul.mubr.bf16.gmra.mrb[76].mxu0 %v4640_v36 }
 0x51f   :  { %3849 = vmatpush3.bf16.msra.mxu0 %v4639_v40  ;;  %v4645_v40 = vld [vmem:[#allocation11 + $0x50] ss:$12 sps:$4 sm:$0xff]  }
 0x520   :  { %3850 = vmatprep.subr.bf16.mxu0 %v4641_v17 }
 0x523   :  { %3851 = vmatpush3.bf16.msra.mxu0 %v4641_v17 }
 0x524   :  { %3868 = vmatprep.subr.bf16.mxu0 %v4642_v19 }
 0x5d9   :  { %v3822_v47 = vpop.f32.mrb[64].mxu0 }
 0x5da   :  { %v2007_v29 = vpop.f32.mrb[65].mxu0 }
 0x5db   :  { %v3823_v38 = vpop.f32.mrb[66].mxu0 }
 0x5dc   :  { %v2071_v3 = vpack.c.bf16 %v3823_v38, %v3822_v47  ;;  %v2010_v0 = vpop.f32.mrb[67].mxu0 }
 0x5dd   :  { %v2070_v43 = vpack.c.bf16 %v2010_v0, %v2007_v29  ;;  %v4646_v29 = vld [vmem:[#allocation11 + $0x68] ss:$12 sps:$4 sm:$0xff]   ;;  %v4647_v0 = vld [vmem:[#allocation11 + $0x80] ss:$12 sps:$4 sm:$0xff]  }
 0x5df   :  { %3852 = vmatprep.mubr.bf16.mxu0 %v2070_v43 }
 0x5e0   :  { %3853 = vmatmul.mubr.bf16.vlgmr.msra.gmra.mrb[80].mxu0 %v2071_v3 }
 0x5e1   :  { %v3826_v37 = vpop.f32.mrb[68].mxu0  ;;  %3869 = vmatpush3.bf16.msra.mxu0 %v4642_v19 }
 0x5e2   :  { %v2023_v57 = vpop.f32.mrb[69].mxu0  ;;  %3870 = vmatprep.subr.bf16.mxu0 %v4643_v14 }
 0x5e3   :  { %v3827_v34 = vpop.f32.mrb[70].mxu0 }
 0x5e4   :  { %v2073_v32 = vpack.c.bf16 %v3827_v34, %v3826_v37  ;;  %v2026_v10 = vpop.f32.mrb[71].mxu0  ;;  %v4648_v34 = vld [vmem:[#allocation11 + $0x98] ss:$12 sps:$4 sm:$0xff]  }
 0x5e5   :  { %v2072_v2 = vpack.c.bf16 %v2026_v10, %v2023_v57  ;;  %3871 = vmatpush3.bf16.msra.mxu0 %v4643_v14  ;;  %v4650_v10 = vld [vmem:[#allocation13 + $0x8] ss:$12 sps:$4 sm:$0xff]  }
 0x5e6   :  { %3872 = vmatprep.subr.bf16.mxu0 %v4644_v54 }
 0x5e7   :  { %3856 = vmatprep.mubr.bf16.mxu0 %v2072_v2 }
 0x5e8   :  { %3857 = vmatmul.mubr.bf16.gmra.mrb[84].mxu0 %v2073_v32  ;;  %v4649_v32 = vld [vmem:[#allocation11 + $0xb0] ss:$12 sps:$4 sm:$0xff]  }
 0x5e9   :  { %v3830_v16 = vpop.f32.mrb[72].mxu0  ;;  %3873 = vmatpush3.bf16.msra.mxu0 %v4644_v54 }
 0x5ea   :  { %v2039_v13 = vpop.f32.mrb[73].mxu0  ;;  %3874 = vmatprep.subr.bf16.mxu0 %v4645_v40 }
 0x5eb   :  { %v3831_v36 = vpop.f32.mrb[74].mxu0 }
 0x5ec   :  { %v2075_v17 = vpack.c.bf16 %v3831_v36, %v3830_v16  ;;  %v2042_v19 = vpop.f32.mrb[75].mxu0 }
 0x5ed   :  { %v2074_v47 = vpack.c.bf16 %v2042_v19, %v2039_v13  ;;  %3875 = vmatpush3.bf16.msra.mxu0 %v4645_v40  ;;  %v6083_v13 = vld [vmem:[#allocation24_spill] sm:$0xff] }
 0x5ee   :  { %3876 = vmatprep.subr.bf16.mxu0 %v4646_v29 }
 0x5ef   :  { %3860 = vmatprep.mubr.bf16.mxu0 %v2074_v47 }
 0x5f0   :  { %3861 = vmatmul.mubr.bf16.gmra.mrb[88].mxu0 %v2075_v17 }
 0x5f1   :  { %v3834_v38 = vpop.f32.mrb[76].mxu0  ;;  %3877 = vmatpush3.bf16.msra.mxu0 %v4646_v29 }
 0x5f2   :  { %v2055_v3 = vpop.f32.mrb[77].mxu0  ;;  %3878 = vmatprep.subr.bf16.mxu0 %v4647_v0 }
 0x5f3   :  { %v3835_v43 = vpop.f32.mrb[78].mxu0 }
 0x5f4   :  { %v2077_v37 = vpack.c.bf16 %v3835_v43, %v3834_v38  ;;  %v2058_v57 = vpop.f32.mrb[79].mxu0 }
 0x5f5   :  { %v2076_v14 = vpack.c.bf16 %v2058_v57, %v2055_v3  ;;  %3879 = vmatpush3.bf16.msra.mxu0 %v4647_v0 }
 0x5f6   :  { %3880 = vmatprep.subr.bf16.mxu0 %v4648_v34 }
 0x5f7   :  { %3864 = vmatprep.mubr.bf16.mxu0 %v2076_v14 }
 0x5f8   :  { %3865 = vmatmul.mubr.bf16.gmra.mrb[92].mxu0 %v2077_v37 }
 0x5f9   :  { %3881 = vmatpush3.bf16.msra.mxu0 %v4648_v34 }
 0x5fa   :  { %3882 = vmatprep.subr.bf16.mxu0 %v4649_v32 }
 0x5fd   :  { %3883 = vmatpush3.bf16.msra.mxu0 %v4649_v32 }
 0x5fe   :  { %3900 = vmatprep.subr.bf16.mxu0 %v4650_v10 }
 0x6b3   :  { %v3854_v2 = vpop.f32.mrb[80].mxu0 }
 0x6b4   :  { %v2177_v54 = vadd.f32 %v3854_v2, %v5157_v55  ;;  %v2112_v16 = vpop.f32.mrb[81].mxu0 }
 0x6b5   :  { %v2175_v40 = vadd.f32 %v2112_v16, %v6083_v13  ;;  %v3855_v36 = vpop.f32.mrb[82].mxu0  ;;  %v6084_v16 = vmov 0  }
 0x6b6   :  { %v2178_v17 = vadd.f32 %v3855_v36, %v5154_v53  ;;  %v2115_v19 = vpop.f32.mrb[83].mxu0  ;;  %v2193_v29 = vmax.f32 %v2177_v54, 0.0  ;;  %v4653_v36 = vld [vmem:[#allocation13 + $0x1c] ss:$12 sps:$4 sm:$0xff]  }
 0x6b7   :  { %v2176_v47 = vadd.f32 %v5142_v48, %v2115_v19  ;;  %v2191_v3 = vmax.f32 %v2175_v40, 0.0  ;;  %v4651_v48 = vld [vmem:[#allocation13] ss:$12 sps:$4 sm:$0xff]  }
 0x6b8   :  { %v2194_v38 = vmax.f32 %v2178_v17, 0.0 }
 0x6b9   :  { %v2192_v0 = vmax.f32 %v2176_v47, 0.0 }
 0x6ba   :  { %v2208_v43 = vpack.c.bf16 %v2194_v38, %v2193_v29  ;;  %v4655_v38 = vld [vmem:[#allocation13 + $0x34] ss:$12 sps:$4 sm:$0xff]  }
 0x6bb   :  { %v2207_v37 = vpack.c.bf16 %v2192_v0, %v2191_v3  ;;  %v3858_v57 = vpop.f32.mrb[84].mxu0  ;;  %v4656_v3 = vld [vmem:[#allocation13 + $0x38] ss:$12 sps:$4 sm:$0xff]  }
 0x6bc   :  { %v2181_v14 = vadd.f32 %v3858_v57, %v5185_v1  ;;  %v2128_v34 = vpop.f32.mrb[85].mxu0  ;;  %v4652_v1 = vld [vmem:[#allocation13 + $0x20] ss:$12 sps:$4 sm:$0xff]  }
 0x6bd   :  { %v2179_v55 = vadd.f32 %v2128_v34, %v5171_v60  ;;  %v3859_v32 = vpop.f32.mrb[86].mxu0  ;;  %2248 = vmatmul.mubr.bf16.vlgmr.msra.gmra.mrb[48].mxu1 %v2207_v37  ;;  %3884 = vmatprep.mubr.bf16.mxu0 %v2207_v37 }
 0x6be   :  { %v2182_v53 = vadd.f32 %v3859_v32, %v5182_v63  ;;  %v2131_v2 = vpop.f32.mrb[87].mxu0  ;;  %3885 = vmatmul.mubr.bf16.vlgmr.msra.gmra.mrb[96].mxu0 %v2208_v43  ;;  %2426 = vmatpush1.bf16.msra.mxu1 %v4651_v48  ;;  %v2197_v13 = vmax.f32 %v2181_v14, 0.0  ;;  %v4654_v63 = vld [vmem:[#allocation13 + $0x18] ss:$12 sps:$4 sm:$0xff]  }
 0x6bf   :  { %v2180_v54 = vadd.f32 %v5168_v58, %v2131_v2  ;;  %3901 = vmatpush3.bf16.msra.mxu0 %v4650_v10  ;;  %2257 = vmatprep.mubr.bf16.mxu1 %v6084_v16  ;;  %v2195_v60 = vmax.f32 %v2179_v55, 0.0  ;;  %v4657_v55 = vld [vmem:[#allocation13 + $0x30] ss:$12 sps:$4 sm:$0xff]  }
 0x6c0   :  { %v2198_v40 = vmax.f32 %v2182_v53, 0.0  ;;  %3902 = vmatprep.subr.bf16.mxu0 %v4652_v1  ;;  %2427 = vmatprep.subr.bf16.mxu1 %v4653_v36  ;;  %v4658_v53 = vld [vmem:[#allocation13 + $0x50] ss:$12 sps:$4 sm:$0xff]  }
 0x6c1   :  { %v2196_v17 = vmax.f32 %v2180_v54, 0.0  ;;  %v4662_v36 = vld [vmem:[#allocation13 + $0x64] ss:$12 sps:$4 sm:$0xff]  }
 0x6c2   :  { %v5705_v19 = vpack.c.bf16 %v2198_v40, %v2197_v13  ;;  %2428 = vmatpush1.bf16.msra.mxu1 %v4654_v63  ;;  %v4660_v13 = vld [vmem:[#allocation13 + $0x48] ss:$12 sps:$4 sm:$0xff]  }
 0x6c3   :  { %v2209_v47 = vpack.c.bf16 %v2196_v17, %v2195_v60  ;;  %v3862_v29 = vpop.f32.mrb[88].mxu0  ;;  %3903 = vmatpush3.bf16.msra.mxu0 %v4652_v1  ;;  %2429 = vmatprep.subr.bf16.mxu1 %v4655_v38  ;;  %v4661_v1 = vld [vmem:[#allocation13 + $0x68] ss:$12 sps:$4 sm:$0xff]  }
 0x6c4   :  { %v2185_v58 = vadd.f32 %v3862_v29, %v6060_v50  ;;  %v2144_v10 = vpop.f32.mrb[89].mxu0  ;;  %3904 = vmatprep.subr.bf16.mxu0 %v4656_v3 }
 0x6c5   :  { %v2183_v0 = vadd.f32 %v2144_v10, %v5199_v6  ;;  %v3863_v37 = vpop.f32.mrb[90].mxu0  ;;  %2258 = vmatmul.mubr.bf16.gmra.mrb[52].mxu1 %v2208_v43  ;;  %3888 = vmatprep.mubr.bf16.mxu0 %v2209_v47  ;;  %v4659_v6 = vld [vmem:[#allocation13 + $0x4c] ss:$12 sps:$4 sm:$0xff]  }
 0x6c6   :  { %v2186_v57 = vadd.f32 %v3863_v37, %v6065_v26  ;;  %v2147_v14 = vpop.f32.mrb[91].mxu0  ;;  %3889 = vmatmul.mubr.bf16.gmra.mrb[100].mxu0 %v5705_v19  ;;  %2267 = vmatprep.mubr.bf16.mxu1 %v6084_v16  ;;  %v2201_v50 = vmax.f32 %v2185_v58, 0.0 }
 0x6c7   :  { %v2184_v34 = vadd.f32 %v5196_v4, %v2147_v14  ;;  %3905 = vmatpush3.bf16.msra.mxu0 %v4656_v3  ;;  %2430 = vmatpush1.bf16.msra.mxu1 %v4657_v55  ;;  %v2199_v43 = vmax.f32 %v2183_v0, 0.0  ;;  %v4664_v3 = vld [vmem:[#allocation13 + $0x80] ss:$12 sps:$4 sm:$0xff]   ;;  %v4665_v0 = vld [vmem:[#allocation13 + $0x7c] ss:$12 sps:$4 sm:$0xff]  }
 0x6c8   :  { %v2202_v32 = vmax.f32 %v2186_v57, 0.0  ;;  %3906 = vmatprep.subr.bf16.mxu0 %v4658_v53  ;;  %2431 = vmatprep.subr.bf16.mxu1 %v4659_v6  ;;  %v4667_v14 = vld [vmem:[#allocation13 + $0x98] ss:$12 sps:$4 sm:$0xff]   ;;  %v4670_v55 = vld [vmem:[#allocation13 + $0x90] ss:$12 sps:$4 sm:$0xff]  }
 0x6c9   :  { %v2200_v2 = vmax.f32 %v2184_v34, 0.0  ;;  %v4668_v34 = vld [vmem:[#allocation13 + $0x94] ss:$12 sps:$4 sm:$0xff]  }
 0x6ca   :  { %v2212_v48 = vpack.c.bf16 %v2202_v32, %v2201_v50  ;;  %v4671_v50 = vld [vmem:[#allocation13 + $0xac] ss:$12 sps:$4 sm:$0xff]   ;;  %v4672_v32 = vld [vmem:[#allocation13 + $0xa8] ss:$12 sps:$4 sm:$0xff]  }
 0x6cb   :  { %v2211_v26 = vpack.c.bf16 %v2200_v2, %v2199_v43  ;;  %v3866_v54 = vpop.f32.mrb[92].mxu0  ;;  %3907 = vmatpush3.bf16.msra.mxu0 %v4658_v53  ;;  %2432 = vmatpush1.bf16.msra.mxu1 %v4660_v13  ;;  %v6085_v53 = vmov 0.0  }
 0x6cc   :  { %v2189_v40 = vadd.f32 %v3866_v54, %v6075_v22  ;;  %v2160_v4 = vpop.f32.mrb[93].mxu0  ;;  %3908 = vmatprep.subr.bf16.mxu0 %v4661_v1  ;;  %2433 = vmatprep.subr.bf16.mxu1 %v4662_v36  ;;  %v4663_v22 = vld [vmem:[#allocation13 + $0x60] ss:$12 sps:$4 sm:$0xff]  }
 0x6cd   :  { %v2187_v60 = vadd.f32 %v2160_v4, %v6068_v8  ;;  %v3867_v17 = vpop.f32.mrb[94].mxu0  ;;  %2268 = vmatmul.mubr.bf16.gmra.mrb[56].mxu1 %v2209_v47  ;;  %3892 = vmatprep.mubr.bf16.mxu0 %v2211_v26 }
 0x6ce   :  { %v2190_v63 = vadd.f32 %v3867_v17, %v6079_v45  ;;  %v2163_v29 = vpop.f32.mrb[95].mxu0  ;;  %3893 = vmatmul.mubr.bf16.gmra.mrb[104].mxu0 %v2212_v48  ;;  %2277 = vmatprep.mubr.bf16.mxu1 %v6084_v16  ;;  %v2205_v58 = vmax.f32 %v2189_v40, 0.0  ;;  %v4666_v45 = vld [vmem:[#allocation13 + $0x78] ss:$12 sps:$4 sm:$0xff]  }
 0x6cf   :  { %v2188_v38 = vadd.f32 %v6073_v59, %v2163_v29  ;;  %3909 = vmatpush3.bf16.msra.mxu0 %v4661_v1  ;;  %2434 = vmatpush1.bf16.msra.mxu1 %v4663_v22  ;;  %v2203_v8 = vmax.f32 %v2187_v60, 0.0  ;;  %v4669_v59 = vld [vmem:[#allocation13 + $0xb0] ss:$12 sps:$4 sm:$0xff]  }
 0x6d0   :  { %v2206_v10 = vmax.f32 %v2190_v63, 0.0  ;;  %3910 = vmatprep.subr.bf16.mxu0 %v4664_v3  ;;  %2435 = vmatprep.subr.bf16.mxu1 %v4665_v0 }
 0x6d1   :  { %v2204_v47 = vmax.f32 %v2188_v38, 0.0 }
 0x6d2   :  { %v2214_v37 = vpack.c.bf16 %v2206_v10, %v2205_v58 }
 0x6d3   :  { %v2213_v57 = vpack.c.bf16 %v2204_v47, %v2203_v8  ;;  %3911 = vmatpush3.bf16.msra.mxu0 %v4664_v3  ;;  %2436 = vmatpush1.bf16.msra.mxu1 %v4666_v45  ;;  %v3062_v47 = vld [vmem:[#allocation14] sm:$0xff] }
 0x6d4   :  { %3912 = vmatprep.subr.bf16.mxu0 %v4667_v14  ;;  %2437 = vmatprep.subr.bf16.mxu1 %v4668_v34 }
 0x6d5   :  { %2278 = vmatmul.mubr.bf16.gmra.mrb[60].mxu1 %v5705_v19  ;;  %3896 = vmatprep.mubr.bf16.mxu0 %v2213_v57 }
 0x6d6   :  { %3897 = vmatmul.mubr.bf16.gmra.mrb[108].mxu0 %v2214_v37  ;;  %2287 = vmatprep.mubr.bf16.mxu1 %v6084_v16 }
 0x6d7   :  { %3913 = vmatpush3.bf16.msra.mxu0 %v4667_v14  ;;  %3916 = vmatprep.mubr.bf16.mxu0 %v5545_v28  ;;  %v3065_v14 = vld [vmem:[#allocation14 + $0x18] sm:$0xff] }
 0x6d8   :  { %3914 = vmatprep.subr.bf16.mxu0 %v4669_v59  ;;  %2438 = vmatpush1.bf16.msra.mxu1 %v4670_v55  ;;  %v3066_v55 = vld [vmem:[#allocation14 + $0x20] sm:$0xff] }
 0x6d9   :  { %2439 = vmatprep.subr.bf16.mxu1 %v4671_v50  ;;  %v3067_v50 = vld [vmem:[#allocation14 + $0x28] sm:$0xff] }
 0x6da   :  { %v4047_v21 = vpack.c.bf16 %v3067_v50, %v3066_v55 }
 0x6db   :  { %3915 = vmatpush3.bf16.msra.mxu0 %v4669_v59 }
 0x6dc   :  { %2440 = vmatpush1.bf16.msra.mxu1 %v4672_v32  ;;  %3932 = vmatprep.subr.bf16.mxu0 %v6085_v53 }
 0x6dd   :  { %2288 = vmatmul.mubr.bf16.gmra.mrb[64].mxu1 %v2211_v26 }
 0x6de   :  { %3917 = vmatmul.mubr.bf16.vlgmr.msra.gmra.mrb[112].mxu0 %v5572_v56  ;;  %2297 = vmatprep.mubr.bf16.mxu1 %v6084_v16 }
 0x6df   :  { %3920 = vmatprep.mubr.bf16.mxu0 %v5596_v31 }
 0x6e5   :  { %2298 = vmatmul.mubr.bf16.gmra.mrb[68].mxu1 %v2212_v48 }
 0x6e6   :  { %3921 = vmatmul.mubr.bf16.gmra.mrb[116].mxu0 %v5616_v30  ;;  %2307 = vmatprep.mubr.bf16.mxu1 %v6084_v16 }
 0x6e7   :  { %3924 = vmatprep.mubr.bf16.mxu0 %v5648_v7 }
 0x6ed   :  { %2308 = vmatmul.mubr.bf16.gmra.mrb[72].mxu1 %v2213_v57  ;;  %v3064_v57 = vld [vmem:[#allocation14 + $0x10] sm:$0xff] }
 0x6ee   :  { %3925 = vmatmul.mubr.bf16.gmra.mrb[120].mxu0 %v5666_v9  ;;  %2317 = vmatprep.mubr.bf16.mxu1 %v6084_v16  ;;  %v4043_v59 = vpack.c.bf16 %v3065_v14, %v3064_v57  ;;  %v3068_v57 = vld [vmem:[#allocation14 + $0x30] sm:$0xff]  ;;  %v3069_v14 = vld [vmem:[#allocation14 + $0x38] sm:$0xff] }
 0x6ef   :  { %3928 = vmatprep.mubr.bf16.mxu0 %v5680_v49 }
 0x6f5   :  { %2318 = vmatmul.mubr.bf16.gmra.mrb[76].mxu1 %v2214_v37  ;;  %v3063_v37 = vld [vmem:[#allocation14 + $0x8] sm:$0xff] }
 0x6f6   :  { %3929 = vmatmul.mubr.bf16.gmra.mrb[124].mxu0 %v5692_v39  ;;  %2457 = vmatprep.mubr.bf16.mxu1 %v6084_v16  ;;  %v4039_v45 = vpack.c.bf16 %v3063_v37, %v3062_v47 }
 0x6f7   :  { %3948 = vmatprep.mubr.msk.bf16.mxu0 %vm4923_vm2, %v6085_v53 }
 0x6f8   :  { %4040 = vmatprep.subr.bf16.mxu1 %v4039_v45 }
 0x6fd   :  { %2458 = vmatmul.mubr.bf16.vlgmr.msra.gmra.mrb[48].mxu1 %v5545_v28 }
 0x6fe   :  { %2467 = vmatprep.mubr.bf16.mxu1 %v6084_v16  ;;  %4042 = vmatpush3.bf16.msra.mxu1 %v4039_v45 }
 0x6ff   :  { %4044 = vmatprep.subr.bf16.mxu1 %v4043_v59 }
 0x702   :  { %4046 = vmatpush3.bf16.msra.mxu1 %v4043_v59 }
 0x703   :  { %4048 = vmatprep.subr.bf16.mxu1 %v4047_v21 }
 0x705   :  { %2468 = vmatmul.mubr.bf16.gmra.mrb[52].mxu1 %v5572_v56 }
 0x706   :  { %2477 = vmatprep.mubr.bf16.mxu1 %v6084_v16  ;;  %4050 = vmatpush3.bf16.msra.mxu1 %v4047_v21 }
 0x70d   :  { %2478 = vmatmul.mubr.bf16.gmra.mrb[56].mxu1 %v5596_v31 }
 0x70e   :  { %2487 = vmatprep.mubr.bf16.mxu1 %v6084_v16 }
 0x715   :  { %2488 = vmatmul.mubr.bf16.gmra.mrb[60].mxu1 %v5616_v30 }
 0x716   :  { %2497 = vmatprep.mubr.bf16.mxu1 %v6084_v16 }
 0x71d   :  { %2498 = vmatmul.mubr.bf16.gmra.mrb[64].mxu1 %v5648_v7 }
 0x71e   :  { %2507 = vmatprep.mubr.bf16.mxu1 %v6084_v16 }
 0x725   :  { %2508 = vmatmul.mubr.bf16.gmra.mrb[68].mxu1 %v5666_v9 }
 0x726   :  { %2517 = vmatprep.mubr.bf16.mxu1 %v6084_v16 }
 0x72d   :  { %2518 = vmatmul.mubr.bf16.gmra.mrb[72].mxu1 %v5680_v49 }
 0x72e   :  { %2527 = vmatprep.mubr.bf16.mxu1 %v6084_v16 }
 0x735   :  { %2528 = vmatmul.mubr.bf16.gmra.mrb[76].mxu1 %v5692_v39 }
 0x791   :  { %v5748_v28 = vpop.f32.mrb[96].mxu0 }
 0x792   :  { %v5750_v56 = vpop.f32.mrb[97].mxu0 }
 0x793   :  { %v5752_v31 = vpop.f32.mrb[98].mxu0 }
 0x794   :  { %v5754_v30 = vpop.f32.mrb[99].mxu0 }
 0x799   :  { %v5756_v7 = vpop.f32.mrb[100].mxu0 }
 0x79a   :  { %v5758_v19 = vpop.f32.mrb[101].mxu0 }
 0x79b   :  { %v5760_v9 = vpop.f32.mrb[102].mxu0 }
 0x79c   :  { %v5762_v6 = vpop.f32.mrb[103].mxu0 }
 0x7a1   :  { %v5764_v49 = vpop.f32.mrb[104].mxu0 }
 0x7a2   :  { %v5766_v16 = vpop.f32.mrb[105].mxu0 }
 0x7a3   :  { %v5768_v39 = vpop.f32.mrb[106].mxu0 }
 0x7a4   :  { %v5770_v43 = vpop.f32.mrb[107].mxu0 }
 0x7a9   :  { %v5772_v2 = vpop.f32.mrb[108].mxu0 }
 0x7aa   :  { %6086 = vst [vmem:[#allocation28_spill] sm:$0xff] %v5772_v2  ;;  %v5774_v48 = vpop.f32.mrb[109].mxu0 }
 0x7ab   :  { %v5776_v26 = vpop.f32.mrb[110].mxu0 }
 0x7ac   :  { %6087 = vst [vmem:[#allocation32_spill] sm:$0xff] %v5776_v26  ;;  %v5778_v54 = vpop.f32.mrb[111].mxu0 }
 0x7ad   :  { %6088 = vst [vmem:[#allocation27_spill] sm:$0xff] %v5778_v54 }
 0x7b1   :  { %v5780_v13 = vpop.f32.mrb[112].mxu0 }
 0x7b2   :  { %v5782_v40 = vpop.f32.mrb[113].mxu0 }
 0x7b3   :  { %v5784_v4 = vpop.f32.mrb[114].mxu0 }
 0x7b4   :  { %v5786_v1 = vpop.f32.mrb[115].mxu0 }
 0x7b9   :  { %v5788_v36 = vpop.f32.mrb[116].mxu0 }
 0x7ba   :  { %v5790_v60 = vpop.f32.mrb[117].mxu0 }
 0x7bb   :  { %v5792_v17 = vpop.f32.mrb[118].mxu0 }
 0x7bc   :  { %v5794_v63 = vpop.f32.mrb[119].mxu0 }
 0x7c1   :  { %v5796_v29 = vpop.f32.mrb[120].mxu0 }
 0x7c2   :  { %v5798_v38 = vpop.f32.mrb[121].mxu0 }
 0x7c3   :  { %v5800_v22 = vpop.f32.mrb[122].mxu0 }
 0x7c4   :  { %v5802_v58 = vpop.f32.mrb[123].mxu0 }
 0x7c9   :  { %v5804_v10 = vpop.f32.mrb[124].mxu0 }
 0x7ca   :  { %6089 = vst [vmem:[#allocation30_spill] sm:$0xff] %v5804_v10  ;;  %v5806_v3 = vpop.f32.mrb[125].mxu0  ;;  %v3071_v10 = vld [vmem:[#allocation14 + $0x48] sm:$0xff] }
 0x7cb   :  { %v5808_v0 = vpop.f32.mrb[126].mxu0 }
 0x7cc   :  { %6090 = vst [vmem:[#allocation29_spill] sm:$0xff] %v5808_v0  ;;  %v5810_v8 = vpop.f32.mrb[127].mxu0 }
 0x7cd   :  { %6091 = vst [vmem:[#allocation24_spill] sm:$0xff] %v5810_v8 }
 0x7d0   :  { %v2459_v34 = vpop.f32.mrb[48].mxu1 }
 0x7d1   :  { %v4103_v32 = vadd.f32 %v2459_v34, %v5447_v20  ;;  %v2461_v42 = vpop.f32.mrb[49].mxu1 }
 0x7d2   :  { %v4104_v11 = vadd.f32 %v2461_v42, %v5449_v61  ;;  %v2463_v12 = vpop.f32.mrb[50].mxu1  ;;  %v4051_v42 = vpack.c.bf16 %v3069_v14, %v3068_v57 }
 0x7d3   :  { %v3383_v26 = vmul.f32 -1.442695, %v4103_v32  ;;  %v4105_v18 = vadd.f32 %v2463_v12, %v5447_v20  ;;  %v2465_v0 = vpop.f32.mrb[51].mxu1  ;;  %v3070_v32 = vld [vmem:[#allocation14 + $0x40] sm:$0xff] }
 0x7d4   :  { %v3399_v47 = vmul.f32 -1.442695, %v4104_v11  ;;  %v4106_v37 = vadd.f32 %v2465_v0, %v5449_v61  ;;  %4052 = vmatprep.subr.bf16.mxu1 %v4051_v42  ;;  %v4055_v59 = vpack.c.bf16 %v3071_v10, %v3070_v32 }
 0x7d5   :  { %4467 = vpow2.f32 %v3383_v26  ;;  %v3384_v2 = vmul.f32 -1.442695, %v4105_v18  ;;  %4054 = vmatpush3.bf16.msra.mxu1 %v4051_v42 }
 0x7d6   :  { %4469 = vpow2.f32 %v3399_v47  ;;  %v3400_v34 = vmul.f32 -1.442695, %v4106_v37  ;;  %v3072_v47 = vld [vmem:[#allocation14 + $0x50] sm:$0xff]  ;;  %v3073_v37 = vld [vmem:[#allocation14 + $0x58] sm:$0xff]  ;;  %4056 = vmatprep.subr.bf16.mxu1 %v4055_v59 }
 0x7d7   :  { %4471 = vpow2.f32 %v3384_v2 }
 0x7d8   :  { %v2469_v45 = vpop.f32.mrb[52].mxu1  ;;  %4473 = vpow2.f32 %v3400_v34 }
 0x7d9   :  { %v4107_v12 = vadd.f32 %v2469_v45, %v5447_v20  ;;  %v2471_v54 = vpop.f32.mrb[53].mxu1  ;;  %4058 = vmatpush3.bf16.msra.mxu1 %v4055_v59  ;;  %v3076_v59 = vld [vmem:[#allocation14 + $0x70] sm:$0xff] }
 0x7da   :  { %v4108_v11 = vadd.f32 %v2471_v54, %v5449_v61  ;;  %v2473_v0 = vpop.f32.mrb[54].mxu1  ;;  %v4059_v54 = vpack.c.bf16 %v3073_v37, %v3072_v47 }
 0x7db   :  { %v3385_v55 = vmul.f32 -1.442695, %v4107_v12  ;;  %v4109_v18 = vadd.f32 %v2473_v0, %v5447_v20  ;;  %v2475_v26 = vpop.f32.mrb[55].mxu1  ;;  %v3074_v0 = vld [vmem:[#allocation14 + $0x60] sm:$0xff] }
 0x7dc   :  { %v3401_v2 = vmul.f32 -1.442695, %v4108_v11  ;;  %v4110_v50 = vadd.f32 %v2475_v26, %v5449_v61  ;;  %4060 = vmatprep.subr.bf16.mxu1 %v4059_v54 }
 0x7dd   :  { %4475 = vpow2.f32 %v3385_v55  ;;  %v3386_v57 = vmul.f32 -1.442695, %v4109_v18  ;;  %4062 = vmatpush3.bf16.msra.mxu1 %v4059_v54 }
 0x7de   :  { %v3402_v14 = vmul.f32 -1.442695, %v4110_v50 }
 0x7df   :  { %v4468_v34 = vpop.eup %4467  ;;  %4477 = vpow2.f32 %v3386_v57 }
 0x7e0   :  { %v4470_v21 = vpop.eup %4469  ;;  %v2699_v45 = vadd.f32 1.0, %v4468_v34  ;;  %4479 = vpow2.f32 %v3401_v2  ;;  %v2479_v12 = vpop.f32.mrb[56].mxu1  ;;  %v4063_v2 = vpack.c.bf16 %v3075_v62, %v3074_v0 }
 0x7e1   :  { %v4472_v10 = vpop.eup %4471  ;;  %4481 = vpow2.f32 %v3402_v14  ;;  %v4111_v32 = vadd.f32 %v2479_v12, %v5447_v20  ;;  %v2481_v11 = vpop.f32.mrb[57].mxu1  ;;  %v2811_v26 = vadd.f32 1.0, %v4470_v21  ;;  %v3077_v21 = vld [vmem:[#allocation14 + $0x78] sm:$0xff] }
 0x7e2   :  { %4483 = vrcp.f32 %v2699_v45  ;;  %v2700_v55 = vadd.f32 1.0, %v4472_v10  ;;  %v4112_v18 = vadd.f32 %v2481_v11, %v5449_v61  ;;  %v2483_v42 = vpop.f32.mrb[58].mxu1  ;;  %v4474_v57 = vpop.eup %4473  ;;  %4064 = vmatprep.subr.bf16.mxu1 %v4063_v2 }
 0x7e3   :  { %v3387_v50 = vmul.f32 -1.442695, %v4111_v32  ;;  %v4113_v47 = vadd.f32 %v2483_v42, %v5447_v20  ;;  %v2485_v37 = vpop.f32.mrb[59].mxu1  ;;  %v2812_v10 = vadd.f32 1.0, %v4474_v57  ;;  %v4067_v42 = vpack.c.bf16 %v3077_v21, %v3076_v59  ;;  %4066 = vmatpush3.bf16.msra.mxu1 %v4063_v2 }
 0x7e4   :  { %4485 = vrcp.f32 %v2700_v55  ;;  %v3403_v34 = vmul.f32 -1.442695, %v4112_v18  ;;  %v4114_v12 = vadd.f32 %v2485_v37, %v5449_v61  ;;  %v5831_v37 = vld [vmem:[%s5993_s9] ss:$0 sm:$0xff] }
 0x7e5   :  { %v3388_v14 = vmul.f32 -1.442695, %v4113_v47  ;;  %4487 = vpow2.f32 %v3387_v50  ;;  %v2859_v57 = vadd.f32 %v5831_v37, %v5782_v40  ;;  %4068 = vmatprep.subr.bf16.mxu1 %v4067_v42  ;;  %v2860_v59 = vadd.f32 %v5831_v37, %v5786_v1 }
 0x7e6   :  { %4489 = vrcp.f32 %v2811_v26  ;;  %v3404_v62 = vmul.f32 -1.442695, %v4114_v12  ;;  %v2366_v40 = vadd.f32 %v5754_v30, %v5464_v5 }
 0x7e7   :  { %v4476_v45 = vpop.eup %4475  ;;  %4491 = vpow2.f32 %v3388_v14  ;;  %4070 = vmatpush3.bf16.msra.mxu1 %v4067_v42 }
 0x7e8   :  { %v2701_v32 = vadd.f32 1.0, %v4476_v45  ;;  %v2489_v11 = vpop.f32.mrb[60].mxu1  ;;  %4493 = vpow2.f32 %v3403_v34  ;;  %v2363_v45 = vadd.f32 %v5750_v56, %v5464_v5 }
 0x7e9   :  { %v4478_v8 = vpop.eup %4477  ;;  %v4115_v0 = vadd.f32 %v2489_v11, %v5447_v20  ;;  %v2491_v55 = vpop.f32.mrb[61].mxu1 }
 0x7ea   :  { %v4480_v18 = vpop.eup %4479  ;;  %4495 = vrcp.f32 %v2701_v32  ;;  %v2702_v50 = vadd.f32 1.0, %v4478_v8  ;;  %v4116_v54 = vadd.f32 %v2491_v55, %v5449_v61  ;;  %v2493_v26 = vpop.f32.mrb[62].mxu1 }
 0x7eb   :  { %v4482_v47 = vpop.eup %4481  ;;  %4497 = vrcp.f32 %v2812_v10  ;;  %v3389_v34 = vmul.f32 -1.442695, %v4115_v0  ;;  %v4117_v14 = vadd.f32 %v2493_v26, %v5447_v20  ;;  %v2495_v12 = vpop.f32.mrb[63].mxu1  ;;  %v2813_v10 = vadd.f32 1.0, %v4480_v18 }
 0x7ec   :  { %v4484_v8 = vpop.eup %4483  ;;  %4499 = vrcp.f32 %v2702_v50  ;;  %v3405_v2 = vmul.f32 -1.442695, %v4116_v54  ;;  %v4118_v56 = vadd.f32 %v2495_v12, %v5449_v61  ;;  %v2814_v54 = vadd.f32 1.0, %v4482_v47 }
 0x7ed   :  { %v2875_v21 = vmul.f32 %v4484_v8, %v2859_v57  ;;  %4501 = vpow2.f32 %v3404_v62  ;;  %v3390_v32 = vmul.f32 -1.442695, %v4117_v14  ;;  %v2861_v8 = vadd.f32 %v5831_v37, %v5780_v13 }
 0x7ee   :  { %v4486_v11 = vpop.eup %4485  ;;  %4503 = vpow2.f32 %v3389_v34  ;;  %v3406_v47 = vmul.f32 -1.442695, %v4118_v56 }
 0x7ef   :  { %v2891_v0 = vadd.f32 %v2875_v21, %v2363_v45  ;;  %v2876_v55 = vmul.f32 %v4486_v11, %v2860_v59  ;;  %4505 = vpow2.f32 %v3405_v2  ;;  %v4488_v50 = vpop.eup %4487  ;;  %v2371_v59 = vadd.f32 %v5748_v28, %v5464_v5 }
 0x7f0   :  { %4507 = vpow2.f32 %v3390_v32  ;;  %v2499_v26 = vpop.f32.mrb[64].mxu1  ;;  %v5843_v1 = vpop.eup %4489  ;;  %v2703_v57 = vadd.f32 1.0, %v4488_v50  ;;  %v2374_v21 = vadd.f32 %v5752_v31, %v5464_v5  ;;  %v2379_v28 = vadd.f32 %v5758_v19, %v5464_v5 }
 0x7f1   :  { %4509 = vtanh.f32 %v2891_v0  ;;  %v2892_v62 = vadd.f32 %v2876_v55, %v2366_v40  ;;  %v4119_v14 = vadd.f32 %v2499_v26, %v5447_v20  ;;  %v2501_v30 = vpop.f32.mrb[65].mxu1  ;;  %v4492_v18 = vpop.eup %4491  ;;  %v2862_v40 = vadd.f32 %v5831_v37, %v5784_v4 }
 0x7f2   :  { %4511 = vrcp.f32 %v2813_v10  ;;  %v2503_v42 = vpop.f32.mrb[66].mxu1  ;;  %v4494_v34 = vpop.eup %4493  ;;  %v2704_v12 = vadd.f32 1.0, %v4492_v18  ;;  %v4120_v13 = vadd.f32 %v2501_v30, %v5449_v61  ;;  %v5857_v55 = vadd.f32 %v5756_v7, %v5464_v5 }
 0x7f3   :  { %4513 = vtanh.f32 %v2892_v62  ;;  %v2505_v45 = vpop.f32.mrb[67].mxu1  ;;  %v3391_v32 = vmul.f32 -1.442695, %v4119_v14  ;;  %v2815_v56 = vadd.f32 1.0, %v4494_v34  ;;  %v5863_v50 = vadd.f32 %v5760_v9, %v5464_v5 }
 0x7f4   :  { %v4496_v2 = vpop.eup %4495  ;;  %4515 = vrcp.f32 %v2703_v57  ;;  %v5867_v62 = vadd.f32 %v5762_v6, %v5464_v5  ;;  %v2863_v7 = vadd.f32 %v5831_v37, %v5790_v60  ;;  %v4121_v19 = vadd.f32 %v2503_v42, %v5447_v20 }
 0x7f5   :  { %v4498_v11 = vpop.eup %4497  ;;  %v2877_v10 = vmul.f32 %v4496_v2, %v2861_v8  ;;  %4517 = vrcp.f32 %v2814_v54  ;;  %v3407_v18 = vmul.f32 -1.442695, %v4120_v13  ;;  %v2923_v6 = vsub.f32 1.0, %v5843_v1 }
 0x7f6   :  { %v4500_v0 = vpop.eup %4499  ;;  %4519 = vrcp.f32 %v2704_v12  ;;  %v2955_v60 = vmul.f32 %v5843_v1, %v5538_v24  ;;  %v2924_v13 = vsub.f32 1.0, %v4498_v11  ;;  %v2956_v24 = vmul.f32 %v4498_v11, %v5535_v35 }
 0x7f7   :  { %v4502_v31 = vpop.eup %4501  ;;  %v2893_v4 = vadd.f32 %v2877_v10, %v2371_v59  ;;  %v2878_v26 = vmul.f32 %v4500_v0, %v2862_v40  ;;  %4521 = vpow2.f32 %v3406_v47  ;;  %v3392_v10 = vmul.f32 -1.442695, %v4121_v19 }
 0x7f8   :  { %v4504_v54 = vpop.eup %4503  ;;  %4523 = vpow2.f32 %v3391_v32  ;;  %v2509_v57 = vpop.f32.mrb[68].mxu1  ;;  %v2816_v42 = vadd.f32 1.0, %v4502_v31  ;;  %v4122_v32 = vadd.f32 %v2505_v45, %v5449_v61  ;;  %v2865_v11 = vadd.f32 %v5831_v37, %v5788_v36 }
 0x7f9   :  { %v4506_v14 = vpop.eup %4505  ;;  %4525 = vtanh.f32 %v2893_v4  ;;  %v2894_v30 = vadd.f32 %v2878_v26, %v2374_v21  ;;  %v2705_v9 = vadd.f32 1.0, %v4504_v54  ;;  %v2511_v34 = vpop.f32.mrb[69].mxu1  ;;  %v4123_v12 = vadd.f32 %v2509_v57, %v5447_v20 }
 0x7fa   :  { %v4508_v8 = vpop.eup %4507  ;;  %4527 = vrcp.f32 %v2815_v56  ;;  %v2513_v47 = vpop.f32.mrb[70].mxu1  ;;  %v2864_v4 = vadd.f32 %v5831_v37, %v5794_v63  ;;  %v2817_v26 = vadd.f32 1.0, %v4506_v14  ;;  %v4124_v19 = vadd.f32 %v2511_v34, %v5449_v61 }
 0x7fb   :  { %v4510_v2 = vpop.eup %4509  ;;  %4529 = vtanh.f32 %v2894_v30  ;;  %v2706_v59 = vadd.f32 1.0, %v4508_v8  ;;  %v2515_v21 = vpop.f32.mrb[71].mxu1  ;;  %v3393_v31 = vmul.f32 -1.442695, %v4123_v12 }
 0x7fc   :  { %v4512_v40 = vpop.eup %4511  ;;  %4531 = vrcp.f32 %v2705_v9  ;;  %v2939_v0 = vmul.f32 %v4510_v2, %v2923_v6  ;;  %v3408_v9 = vmul.f32 -1.442695, %v4122_v32  ;;  %v4125_v6 = vadd.f32 %v2513_v47, %v5447_v20 }
 0x7fd   :  { %v4514_v56 = vpop.eup %4513  ;;  %4533 = vpow2.f32 %v3407_v18  ;;  %v2925_v32 = vsub.f32 1.0, %v4512_v40 }
 0x7fe   :  { %v4516_v1 = vpop.eup %4515  ;;  %4535 = vrcp.f32 %v2706_v59  ;;  %v2940_v54 = vmul.f32 %v4514_v56, %v2924_v13  ;;  %v2971_v57 = vadd.f32 %v2955_v60, %v2939_v0  ;;  %v3409_v13 = vmul.f32 -1.442695, %v4124_v19 }
 0x7ff   :  { %v4518_v45 = vpop.eup %4517  ;;  %v2879_v30 = vmul.f32 %v4516_v1, %v2863_v7  ;;  %4537 = vrcp.f32 %v2816_v42  ;;  %v3394_v36 = vmul.f32 -1.442695, %v4125_v6 }
 0x800   :  { %v4520_v8 = vpop.eup %4519  ;;  %4539 = vpow2.f32 %v3392_v10  ;;  %v2519_v63 = vpop.f32.mrb[72].mxu1  ;;  %v2972_v14 = vadd.f32 %v2956_v24, %v2940_v54  ;;  %v2987_v18 = vmul.f32 %v5493_v25, %v2971_v57 }
 0x801   :  { %v4522_v35 = vpop.eup %4521  ;;  %v2895_v12 = vadd.f32 %v2879_v30, %v2379_v28  ;;  %v2880_v60 = vmul.f32 %v4520_v8, %v2864_v4  ;;  %4541 = vrcp.f32 %v2817_v26  ;;  %v2521_v7 = vpop.f32.mrb[73].mxu1  ;;  %v4127_v34 = vadd.f32 %v2519_v63, %v5447_v20 }
 0x802   :  { %v4524_v2 = vpop.eup %4523  ;;  %4543 = vpow2.f32 %v3393_v31  ;;  %v2523_v42 = vpop.f32.mrb[74].mxu1  ;;  %v3005_v59 = vpack.c.bf16 %v2972_v14, %v2987_v18  ;;  %v4126_v28 = vadd.f32 %v2515_v21, %v5449_v61  ;;  %v2926_v4 = vsub.f32 1.0, %v4518_v45 }
 0x803   :  { %v4526_v47 = vpop.eup %4525  ;;  %4545 = vtanh.f32 %v2895_v12  ;;  %v2896_v10 = vadd.f32 %v2880_v60, %v5867_v62  ;;  %v2707_v25 = vadd.f32 1.0, %v4524_v2  ;;  %v2525_v0 = vpop.f32.mrb[75].mxu1  ;;  %v2818_v24 = vadd.f32 1.0, %v4522_v35 }
 0x804   :  { %v4528_v56 = vpop.eup %4527  ;;  %4547 = vpow2.f32 %v3408_v9  ;;  %3933 = vmatpush3.bf16.msra.mxu0 %v3005_v59  ;;  %v2941_v1 = vmul.f32 %v4526_v47, %v2925_v32  ;;  %v2957_v31 = vmul.f32 %v4512_v40, %v5566_v52  ;;  %v3395_v62 = vmul.f32 -1.442695, %v4127_v34 }
 0x805   :  { %v4530_v26 = vpop.eup %4529  ;;  %4549 = vtanh.f32 %v2896_v10  ;;  %3934 = vmatprep.subr.bf16.mxu0 %v6085_v53  ;;  %v2958_v30 = vmul.f32 %v4518_v45, %v5560_v44  ;;  %v2866_v21 = vadd.f32 %v5831_v37, %v5792_v17  ;;  %v3410_v63 = vmul.f32 -1.442695, %v4126_v28 }
 0x806   :  { %v4532_v54 = vpop.eup %4531  ;;  %4551 = vrcp.f32 %v2707_v25  ;;  %v2942_v57 = vmul.f32 %v4530_v26, %v2926_v4  ;;  %v2973_v8 = vadd.f32 %v2957_v31, %v2941_v1  ;;  %v4128_v14 = vadd.f32 %v2521_v7, %v5449_v61 }
 0x807   :  { %v4534_v9 = vpop.eup %4533  ;;  %v2881_v19 = vmul.f32 %v4532_v54, %v2865_v11  ;;  %4553 = vpow2.f32 %v3409_v13  ;;  %v2927_v45 = vsub.f32 1.0, %v4528_v56  ;;  %v4129_v17 = vadd.f32 %v2523_v42, %v5447_v20 }
 0x808   :  { %v4536_v6 = vpop.eup %4535  ;;  %4555 = vpow2.f32 %v3394_v36  ;;  %v2529_v18 = vpop.f32.mrb[76].mxu1  ;;  %v2974_v52 = vadd.f32 %v2958_v30, %v2942_v57  ;;  %v2819_v2 = vadd.f32 1.0, %v4534_v9  ;;  %v3411_v25 = vmul.f32 -1.442695, %v4128_v14 }
 0x809   :  { %v4538_v40 = vpop.eup %4537  ;;  %v2897_v35 = vadd.f32 %v2881_v19, %v5857_v55  ;;  %v2882_v12 = vmul.f32 %v4536_v6, %v2866_v21  ;;  %4557 = vrcp.f32 %v2818_v24  ;;  %v2531_v44 = vpop.f32.mrb[77].mxu1  ;;  %v2989_v55 = vmul.f32 %v5501_v41, %v2973_v8 }
 0x80a   :  { %v4540_v60 = vpop.eup %4539  ;;  %4559 = vpow2.f32 %v3395_v62  ;;  %v2533_v11 = vpop.f32.mrb[78].mxu1  ;;  %v2990_v34 = vmul.f32 0.0, %v2974_v52  ;;  %v4131_v13 = vadd.f32 %v2529_v18, %v5447_v20  ;;  %v2928_v36 = vsub.f32 1.0, %v4538_v40 }
 0x80b   :  { %v4542_v59 = vpop.eup %4541  ;;  %4561 = vtanh.f32 %v2897_v35  ;;  %v2898_v7 = vadd.f32 %v2882_v12, %v5863_v50  ;;  %v2708_v32 = vadd.f32 1.0, %v4540_v60  ;;  %v5897_v47 = vpop.f32.mrb[79].mxu1  ;;  %v4130_v4 = vadd.f32 %v2525_v0, %v5449_v61 }
 0x80c   :  { %v4544_v10 = vpop.eup %4543  ;;  %4563 = vpow2.f32 %v3410_v63  ;;  %v3006_v26 = vpack.c.bf16 %v2990_v34, %v2989_v55  ;;  %v3396_v50 = vmul.f32 -1.442695, %v4129_v17  ;;  %v2959_v31 = vmul.f32 %v4528_v56, %v5588_v23 }
 0x80d   :  { %v4546_v28 = vpop.eup %4545  ;;  %4565 = vtanh.f32 %v2898_v7  ;;  %v2709_v42 = vadd.f32 1.0, %v4544_v10  ;;  %v2867_v41 = vadd.f32 %v5831_v37, %v5798_v38  ;;  %v2960_v62 = vmul.f32 %v4538_v40, %v5590_v51 }
 0x80e   :  { %v4548_v24 = vpop.eup %4547  ;;  %4567 = vrcp.f32 %v2708_v32  ;;  %v2943_v1 = vmul.f32 %v4546_v28, %v2927_v45  ;;  %3935 = vmatpush3.bf16.msra.mxu0 %v3006_v26  ;;  %v3397_v30 = vmul.f32 -1.442695, %v4131_v13  ;;  %v2395_v19 = vadd.f32 %v5766_v16, %v5464_v5 }
 0x80f   :  { %v4550_v54 = vpop.eup %4549  ;;  %4569 = vrcp.f32 %v2819_v2  ;;  %3936 = vmatprep.subr.bf16.mxu0 %v6085_v53  ;;  %v2398_v23 = vadd.f32 %v5770_v43, %v5464_v5  ;;  %v3412_v8 = vmul.f32 -1.442695, %v4130_v4  ;;  %v4132_v51 = vadd.f32 %v2531_v44, %v5449_v61 }
 0x810   :  { %v4552_v57 = vpop.eup %4551  ;;  %4571 = vrcp.f32 %v2709_v42  ;;  %v2944_v0 = vmul.f32 %v4550_v54, %v2928_v36  ;;  %v2975_v9 = vadd.f32 %v2959_v31, %v2943_v1  ;;  %v2820_v18 = vadd.f32 1.0, %v4548_v24 }
 0x811   :  { %v4554_v21 = vpop.eup %4553  ;;  %v2883_v56 = vmul.f32 %v4552_v57, %v2867_v41  ;;  %4573 = vpow2.f32 %v3411_v25  ;;  %v4133_v40 = vadd.f32 %v2533_v11, %v5447_v20  ;;  %v2929_v45 = vsub.f32 1.0, %v4542_v59 }
 0x812   :  { %v4556_v38 = vpop.eup %4555  ;;  %4575 = vpow2.f32 %v3396_v50  ;;  %v2976_v6 = vadd.f32 %v2960_v62, %v2944_v0  ;;  %v2991_v16 = vmul.f32 0.0, %v2975_v9  ;;  %v2821_v60 = vadd.f32 1.0, %v4554_v21 }
 0x813   :  { %v4558_v63 = vpop.eup %4557  ;;  %v2899_v14 = vadd.f32 %v2883_v56, %v2395_v19  ;;  %v2710_v52 = vadd.f32 1.0, %v4556_v38  ;;  %4577 = vpow2.f32 %v3397_v30  ;;  %v2961_v17 = vmul.f32 %v4542_v59, %v5610_v46 }
 0x814   :  { %v4560_v35 = vpop.eup %4559  ;;  %v2992_v12 = vmul.f32 0.0, %v2976_v6  ;;  %v2930_v7 = vsub.f32 1.0, %v4558_v63  ;;  %v2868_v20 = vadd.f32 %v5831_v37, %v5802_v58  ;;  %v3413_v11 = vmul.f32 -1.442695, %v4132_v51 }
 0x815   :  { %v4562_v43 = vpop.eup %4561  ;;  %4579 = vtanh.f32 %v2899_v14  ;;  %v2711_v2 = vadd.f32 1.0, %v4560_v35  ;;  %v3398_v10 = vmul.f32 -1.442695, %v4133_v40  ;;  %v2962_v36 = vmul.f32 %v4558_v63, %v5612_v33 }
 0x816   :  { %v4564_v34 = vpop.eup %4563  ;;  %4581 = vrcp.f32 %v2710_v52  ;;  %v3007_v44 = vpack.c.bf16 %v2992_v12, %v2991_v16  ;;  %v2945_v32 = vmul.f32 %v4562_v43, %v2929_v45  ;;  %v2869_v59 = vadd.f32 %v5831_v37, %v5796_v29 }
 0x817   :  { %v4566_v55 = vpop.eup %4565  ;;  %4583 = vrcp.f32 %v2820_v18  ;;  %v4134_v4 = vadd.f32 %v5897_v47, %v5449_v61  ;;  %v2822_v26 = vadd.f32 1.0, %v4564_v34  ;;  %v2403_v33 = vadd.f32 %v5764_v49, %v5464_v5 }
 0x818   :  { %v4568_v25 = vpop.eup %4567  ;;  %4585 = vrcp.f32 %v2711_v2  ;;  %3937 = vmatpush3.bf16.msra.mxu0 %v3007_v44  ;;  %v2946_v13 = vmul.f32 %v4566_v55, %v2930_v7  ;;  %v2977_v28 = vadd.f32 %v2961_v17, %v2945_v32  ;;  %v2870_v21 = vadd.f32 %v5831_v37, %v5800_v22 }
 0x819   :  { %v4570_v46 = vpop.eup %4569  ;;  %v2884_v42 = vmul.f32 %v4568_v25, %v2868_v20  ;;  %4587 = vrcp.f32 %v2821_v60  ;;  %3938 = vmatprep.subr.bf16.mxu0 %v6085_v53  ;;  %v3414_v47 = vmul.f32 -1.442695, %v4134_v4  ;;  %v2406_v51 = vadd.f32 %v5768_v39, %v5464_v5  ;;  %v6093_v25 = vld [vmem:[#allocation26_spill] sm:$0xff] }
 0x81a   :  { %v4572_v58 = vpop.eup %4571  ;;  %4589 = vpow2.f32 %v3412_v8  ;;  %v2978_v24 = vadd.f32 %v2962_v36, %v2946_v13  ;;  %v2993_v29 = vmul.f32 0.0, %v2977_v28  ;;  %v2931_v0 = vsub.f32 1.0, %v4570_v46  ;;  %v6094_v28 = vld [vmem:[#allocation27_spill] sm:$0xff] }
 0x81b   :  { %v4574_v50 = vpop.eup %4573  ;;  %v2900_v1 = vadd.f32 %v2884_v42, %v2398_v23  ;;  %v2885_v31 = vmul.f32 %v4572_v58, %v2869_v59  ;;  %4591 = vpow2.f32 %v3398_v10  ;;  %v2963_v38 = vmul.f32 %v4570_v46, %v5640_v15  ;;  %v6095_v59 = vld [vmem:[#allocation30_spill] sm:$0xff] }
 0x81c   :  { %v4576_v54 = vpop.eup %4575  ;;  %4593 = vpow2.f32 %v3413_v11  ;;  %v2994_v41 = vmul.f32 0.0, %v2978_v24  ;;  %v2823_v49 = vadd.f32 1.0, %v4574_v50  ;;  %v2871_v6 = vadd.f32 %v5831_v37, %v5806_v3 }
 0x81d   :  { %4595 = vtanh.f32 %v2900_v1  ;;  %v2901_v62 = vadd.f32 %v2885_v31, %v2403_v33  ;;  %v2712_v61 = vadd.f32 1.0, %v4576_v54  ;;  %v4578_v57 = vpop.eup %4577  ;;  %v2411_v52 = vadd.f32 %v5774_v48, %v5464_v5  ;;  %v6092_v48 = vld [vmem:[#allocation24_spill] sm:$0xff] }
 0x81e   :  { %4597 = vrcp.f32 %v2822_v26  ;;  %v3008_v30 = vpack.c.bf16 %v2994_v41, %v2993_v29  ;;  %v2713_v19 = vadd.f32 1.0, %v4578_v57  ;;  %v2872_v32 = vadd.f32 %v5831_v37, %v6092_v48  ;;  %v6096_v33 = vld [vmem:[#allocation28_spill] sm:$0xff] }
 0x81f   :  { %v4580_v9 = vpop.eup %4579  ;;  %4599 = vtanh.f32 %v2901_v62  ;;  %v2414_v46 = vadd.f32 %v6094_v28, %v5464_v5  ;;  %v2873_v42 = vadd.f32 %v5831_v37, %v6095_v59  ;;  %v2419_v1 = vadd.f32 %v6096_v33, %v5464_v5  ;;  %v4305_v33 = vld [vmem:[#allocation16 + $0x30] sm:$0xff]  }
 0x820   :  { %v4582_v23 = vpop.eup %4581  ;;  %4601 = vrcp.f32 %v2712_v61  ;;  %3939 = vmatpush3.bf16.msra.mxu0 %v3008_v30  ;;  %v2947_v56 = vmul.f32 %v4580_v9, %v2931_v0  ;;  %v6097_v30 = vld [vmem:[#allocation33_spill] sm:$0xff] }
 0x821   :  { %v4584_v8 = vpop.eup %4583  ;;  %v2886_v63 = vmul.f32 %v4582_v23, %v2870_v21  ;;  %4603 = vpow2.f32 %v3414_v47  ;;  %3940 = vmatprep.subr.bf16.mxu0 %v6085_v53 }
 0x822   :  { %v4586_v22 = vpop.eup %4585  ;;  %4605 = vrcp.f32 %v2713_v19  ;;  %v2979_v14 = vadd.f32 %v2963_v38, %v2947_v56  ;;  %v2932_v45 = vsub.f32 1.0, %v4584_v8  ;;  %v2964_v34 = vmul.f32 %v4584_v8, %v5642_v27  ;;  %v6099_v38 = vld [vmem:[#allocation34_spill] sm:$0xff] }
 0x823   :  { %v4588_v18 = vpop.eup %4587  ;;  %v2902_v40 = vadd.f32 %v2886_v63, %v2406_v51  ;;  %v2887_v15 = vmul.f32 %v4586_v22, %v2871_v6  ;;  %4607 = vrcp.f32 %v2823_v49  ;;  %v6098_v49 = vld [vmem:[#allocation29_spill] sm:$0xff]  ;;  %v6100_v6 = vld [vmem:[#allocation32_spill] sm:$0xff] }
 0x824   :  { %v4590_v35 = vpop.eup %4589  ;;  %v2933_v44 = vsub.f32 1.0, %v4588_v18  ;;  %v2965_v13 = vmul.f32 %v4588_v18, %v6093_v25  ;;  %v2995_v58 = vmul.f32 0.0, %v2979_v14  ;;  %v2874_v19 = vadd.f32 %v5831_v37, %v6098_v49  ;;  %v6103_v25 = vld [vmem:[#allocation35_spill] sm:$0xff] }
 0x825   :  { %v4592_v16 = vpop.eup %4591  ;;  %4609 = vtanh.f32 %v2902_v40  ;;  %v2903_v39 = vadd.f32 %v2887_v15, %v2411_v52  ;;  %v2824_v60 = vadd.f32 1.0, %v4590_v35  ;;  %v2422_v63 = vadd.f32 %v6100_v6, %v5464_v5 }
 0x826   :  { %v4594_v12 = vpop.eup %4593  ;;  %v2714_v3 = vadd.f32 1.0, %v4592_v16 }
 0x827   :  { %v4596_v43 = vpop.eup %4595  ;;  %4611 = vtanh.f32 %v2903_v39  ;;  %v2825_v55 = vadd.f32 1.0, %v4594_v12 }
 0x828   :  { %v4598_v2 = vpop.eup %4597  ;;  %v2948_v17 = vmul.f32 %v4596_v43, %v2932_v45  ;;  %4613 = vrcp.f32 %v2714_v3  ;;  %v6101_v3 = vld [vmem:[#allocation31_spill] sm:$0xff] }
 0x829   :  { %v4600_v7 = vpop.eup %4599  ;;  %4615 = vrcp.f32 %v2824_v60  ;;  %v2934_v41 = vsub.f32 1.0, %v4598_v2  ;;  %v2966_v0 = vmul.f32 %v4598_v2, %v6097_v30 }
 0x82a   :  { %v4602_v20 = vpop.eup %4601  ;;  %v2980_v11 = vadd.f32 %v2964_v34, %v2948_v17  ;;  %v2949_v10 = vmul.f32 %v4600_v7, %v2933_v44  ;;  %4617 = vrcp.f32 %v2825_v55  ;;  %v6102_v17 = vld [vmem:[#allocation25_spill] sm:$0xff] }
 0x82b   :  { %v4604_v36 = vpop.eup %4603  ;;  %v2888_v27 = vmul.f32 %v4602_v20, %v2872_v32 }
 0x82c   :  { %v4606_v4 = vpop.eup %4605  ;;  %v2996_v26 = vmul.f32 0.0, %v2980_v11  ;;  %v2981_v24 = vadd.f32 %v2965_v13, %v2949_v10  ;;  %v2826_v47 = vadd.f32 1.0, %v4604_v36 }
 0x82d   :  { %v4608_v50 = vpop.eup %4607  ;;  %v2904_v31 = vadd.f32 %v2888_v27, %v2414_v46  ;;  %v2889_v54 = vmul.f32 %v4606_v4, %v2873_v42  ;;  %v4298_v42 = vld [vmem:[%s5987_s3] sm:$0xff]   ;;  %v4299_v27 = vld [vmem:[#allocation16] sm:$0xff]   ;;  %v4300_v4 = vld [vmem:[#allocation16 + $0x8] sm:$0xff]   ;;  %s4924_s3 = smov [#allocation17]  }
 0x82e   :  { %v3009_v29 = vpack.c.bf16 %v2996_v26, %v2995_v58  ;;  %v2935_v9 = vsub.f32 1.0, %v4608_v50  ;;  %v2967_v8 = vmul.f32 %v4608_v50, %v6099_v38  ;;  %v2997_v14 = vmul.f32 0.0, %v2981_v24  ;;  %v4301_v58 = vld [vmem:[#allocation16 + $0x10] sm:$0xff]   ;;  %v4302_v26 = vld [vmem:[#allocation16 + $0x18] sm:$0xff]   ;;  %v4303_v24 = vld [vmem:[#allocation16 + $0x20] sm:$0xff]   ;;  %s3268_s1 = sshll.u32 %s4924_s3, 4  ;;  %s3269_s1 = int_to_ptr.vmem [resolvable:$true] %s3268_s1 }
 0x82f   :  { %v4610_v62 = vpop.eup %4609  ;;  %4619 = vtanh.f32 %v2904_v31  ;;  %v2905_v61 = vadd.f32 %v2889_v54, %v2419_v1  ;;  %v4304_v50 = vld [vmem:[#allocation16 + $0x28] sm:$0xff]   ;;  %v4306_v1 = vld [vmem:[#allocation16 + $0x38] sm:$0xff]   ;;  %v3060_v31 = vld [vmem:[#allocation2] sm:$0xff]  ;;  %s4872_s29 = scalar_lea.vmem %s3269_s1, 256  ;;  %p4877_p3 = scmp.lt.s32.totalorder %s3269_s1, %s3269_s1 }
 0x830   :  { %3941 = vmatpush3.bf16.msra.mxu0 %v3009_v29  ;;  %v2950_v57 = vmul.f32 %v4610_v62, %v2934_v41  ;;  %4004 = vmatprep.mubr.f32.mxu1 %v3060_v31  ;;  %v3061_v54 = vld [vmem:[#allocation2 + $0x8] sm:$0xff]  ;;  %p4873_p2 = scmp.ne.s32.totalorder %s3269_s1, %s4872_s29  ;;  %p4878_p4 = scmp.lt.s32.totalorder %s4872_s29, %s4872_s29 }
 0x831   :  { %v4612_v21 = vpop.eup %4611  ;;  %4621 = vtanh.f32 %v2905_v61  ;;  %3942 = vmatprep.subr.bf16.mxu0 %v6085_v53  ;;  %4005 = vmatmul.mubr.f32.vlgmr.msra.gmra.mrb[80].mxu1 %v3061_v54 }
 0x832   :  { %v2982_v23 = vadd.f32 %v2966_v0, %v2950_v57  ;;  %v2951_v56 = vmul.f32 %v4612_v21, %v2935_v9  ;;  %v4614_v51 = vpop.eup %4613  ;;  %4623 = vrcp.f32 %v2826_v47  ;;  %p4879_p5 = por %p4878_p4, %p4877_p3 }
 0x833   :  { %v2890_v22 = vmul.f32 %v4614_v51, %v2874_v19  ;;  %v4616_v40 = vpop.eup %4615 }
 0x834   :  { %v2998_v18 = vmul.f32 0.0, %v2982_v23  ;;  %v2983_v52 = vadd.f32 %v2967_v8, %v2951_v56  ;;  %v4618_v16 = vpop.eup %4617  ;;  %v2936_v37 = vsub.f32 1.0, %v4616_v40  ;;  %v2968_v45 = vmul.f32 %v4616_v40, %v6101_v3  ;;  %p4880_p6 = pnand %p4879_p5, %p4873_p2 }
 0x835   :  { %v2906_v15 = vadd.f32 %v2890_v22, %v2422_v63  ;;  %v2937_v43 = vsub.f32 1.0, %v4618_v16  ;;  %v2969_v34 = vmul.f32 %v4618_v16, %v6102_v17 }
 0x836   :  { %v3010_v35 = vpack.c.bf16 %v2998_v18, %v2997_v14  ;;  %v2999_v7 = vmul.f32 0.0, %v2983_v52 }
 0x837   :  { %4625 = vtanh.f32 %v2906_v15 }
 0x838   :  { %3943 = vmatpush3.bf16.msra.mxu0 %v3010_v35 }
 0x839   :  { %v4620_v39 = vpop.eup %4619  ;;  %3944 = vmatprep.subr.bf16.mxu0 %v6085_v53 }
 0x83a   :  { %v2952_v12 = vmul.f32 %v4620_v39, %v2936_v37 }
 0x83b   :  { %v4622_v5 = vpop.eup %4621 }
 0x83c   :  { %v2984_v60 = vadd.f32 %v2968_v45, %v2952_v12  ;;  %v2953_v2 = vmul.f32 %v4622_v5, %v2937_v43  ;;  %v4624_v44 = vpop.eup %4623 }
 0x83d   :  { %v2938_v20 = vsub.f32 1.0, %v4624_v44  ;;  %v2970_v13 = vmul.f32 %v4624_v44, %v6103_v25 }
 0x83e   :  { %v3000_v48 = vmul.f32 0.0, %v2984_v60  ;;  %v2985_v32 = vadd.f32 %v2969_v34, %v2953_v2 }
 0x840   :  { %v3011_v55 = vpack.c.bf16 %v3000_v48, %v2999_v7  ;;  %v3001_v28 = vmul.f32 0.0, %v2985_v32 }
 0x841   :  { %v4626_v11 = vpop.eup %4625 }
 0x842   :  { %3945 = vmatpush3.bf16.msra.mxu0 %v3011_v55  ;;  %v2954_v10 = vmul.f32 %v4626_v11, %v2938_v20 }
 0x843   :  { %3946 = vmatprep.subr.bf16.mxu0 %v6085_v53 }
 0x844   :  { %v2986_v36 = vadd.f32 %v2970_v13, %v2954_v10 }
 0x846   :  { %v3002_v46 = vmul.f32 0.0, %v2986_v36 }
 0x848   :  { %v3012_v59 = vpack.c.bf16 %v3002_v46, %v3001_v28 }
 0x84a   :  { %3947 = vmatpush3.bf16.msra.mxu0 %v3012_v59 }
 0x84b   :  { %3952 = vmatprep.subr.bf16.mxu0 %v6085_v53 }
 0x84d   :  { %3949 = vmatmul.mubr.bf16.vlgmr.msra.gmra.mrb[128].mxu0 %v4298_v42 }
 0x84e   :  { %3953 = vmatpush3.bf16.msra.mxu0 %v4299_v27  ;;  %3968 = vmatprep.mubr.msk.bf16.mxu0 %vm4923_vm2, %v6085_v53 }
 0x84f   :  { %3954 = vmatprep.subr.bf16.mxu0 %v6085_v53 }
 0x852   :  { %3955 = vmatpush3.bf16.msra.mxu0 %v4300_v4 }
 0x853   :  { %3956 = vmatprep.subr.bf16.mxu0 %v6085_v53 }
 0x856   :  { %3957 = vmatpush3.bf16.msra.mxu0 %v4301_v58 }
 0x857   :  { %3958 = vmatprep.subr.bf16.mxu0 %v6085_v53 }
 0x85a   :  { %3959 = vmatpush3.bf16.msra.mxu0 %v4302_v26 }
 0x85b   :  { %3960 = vmatprep.subr.bf16.mxu0 %v6085_v53 }
 0x85e   :  { %3961 = vmatpush3.bf16.msra.mxu0 %v4303_v24 }
 0x85f   :  { %3962 = vmatprep.subr.bf16.mxu0 %v6085_v53 }
 0x862   :  { %3963 = vmatpush3.bf16.msra.mxu0 %v4304_v50 }
 0x863   :  { %3964 = vmatprep.subr.bf16.mxu0 %v6085_v53 }
 0x866   :  { %3965 = vmatpush3.bf16.msra.mxu0 %v4305_v33 }
 0x867   :  { %3966 = vmatprep.subr.bf16.mxu0 %v6085_v53 }
 0x86a   :  { %3967 = vmatpush3.bf16.msra.mxu0 %v4306_v1 }
 0x904   :  { %v4006_v57 = vpop.f32.mrb[80].mxu1 }
 0x905   :  { %v3250_v30 = vpop.f32.mrb[81].mxu1 }
 0x920   :  { %v3053_v29 = vpop.f32.mrb[128].mxu0 }
 0x921   :  { %v3950_v41 = vpop.f32.mrb[129].mxu0 }
 0x922   :  { %v3056_v62 = vpop.f32.mrb[130].mxu0 }
 0x923   :  { %v3078_v61 = vpack.c.bf16 %v3056_v62, %v3053_v29  ;;  %v3951_v47 = vpop.f32.mrb[131].mxu0 }
 0x925   :  { %3969 = vmatmul.mubr.bf16.vlgmr.msra.gmra.mrb[132].mxu0 %v3078_v61 }
 0x9f8   :  { %v3177_v0 = vpop.f32.mrb[132].mxu0 }
 0x9f9   :  { %v3251_v9 = vadd.f32 %v3250_v30, %v3177_v0  ;;  %v3970_v21 = vpop.f32.mrb[133].mxu0 }
 0x9fa   :  { %v3180_v49 = vpop.f32.mrb[134].mxu0 }
 0x9fb   :  { %v3259_v53 = vmax.f32 %v3251_v9, 0.0  ;;  %v3256_v19 = vadd.f32 %v4006_v57, %v3180_v49  ;;  %v3971_v23 = vpop.f32.mrb[135].mxu0 }
 0x9fd   :  { %3261 = vst [vmem:[#allocation17] sm:$0xff] %v3259_v53  ;;  %v3260_v56 = vmax.f32 %v3256_v19, 0.0 }
 0x9ff   :  { %3262 = vst [vmem:[#allocation17 + $0x8] sm:$0xff] %v3260_v56 }
 0xa00   :  { %4883 = shalt.err (!%p4880_p6)
}
 0xa01   :  { %s4884_s17 = scalar_lea.hbm %s5996_s12, 256 }
 0xa02   :  { %p4885_p7 = scmp.ne.s32.totalorder %s5996_s12, %s4884_s17  ;;  %p4888_p8 = scmp.lt.u32.totalorder %s4884_s17, %s5996_s12 }
 0xa04   :  { %p4890_p9 = pnand %p4888_p8, %p4885_p7 }
 0xa06   :  { %4893 = shalt.err (!%p4890_p9)
}
 0xa07   :  { %3274 = dma.vmem_to_hbm [thread:$0]  %s3269_s1, 256, %s5996_s12, [#allocation4], %s4908_s15, %s4908_s15, %s4909_s16  }
 0xa08   :  { %4904 = dma.done.wait [#allocation4], 256  }
 0xa09   :  { %4905 = vsyncadd [#allocation4], 4294967040 }
 0xa0a   :  { %3278 = vsyncpa [#allocation3], 1 }
 0xa0b   :  { %3279 = vsyncpa [#allocation6], 1 }
 0xa0c   :  { %3280 = vsyncpa [#allocation9], 1 }
 0xa0d   :  { %3281 = vsyncpa [#allocation12], 1 }
 0xa0e   :  { %3282 = vsyncpa [#allocation15], 1 }
 0xa0f   :  { %3283 = vsyncpa [#allocation4], 1 }

</bundles_post_ra>
